<compile_context>
chip_gen: v7x
topology: tpu7x:2x2x1
jax: 0.10.0
libtpu: 0.0.40
codegen_flags: <defaults>
</compile_context>

<pallas_src>
import functools

import jax
import jax.numpy as jnp
from jax.experimental import pallas as pl
from jax.experimental.pallas import tpu as pltpu


def _make_kernel(*, first, downsample, tl, seq_len, slope, n_tiles):
    """Builds a kernel whose ref list matches the conditionally-built arg list."""

    def kernel(*refs):
        it = iter(refs)
        x_ref = next(it)            # (1, tl, Cin) f32   current length tile (NLC)
        halo_ref = next(it)         # (1, 1, 4, Cin) f32 rows [pos-2,pos) & [pos+tl,pos+tl+2)
        w1_ref = next(it)           # (3*Cin, Cout) compute_dtype, bn2 folded, taps fused in K
        b1_ref = next(it)           # (1, Cout) f32, bn2 folded
        if not first:
            bn1s_ref = next(it)     # (1, Cin) f32 folded BN1 scale
            bn1b_ref = next(it)     # (1, Cin) f32 folded BN1 shift
        w2_ref = next(it)           # (3*Cout, Cout) compute_dtype, taps fused in K
        b2_ref = next(it)           # (1, Cout) f32
        if downsample:
            wd_ref = next(it)       # (Cin, Cout) f32 (identity path kept f32)
            bd_ref = next(it)       # (1, Cout) f32
        o_ref = next(it)            # (1, tl//3, Cout) f32, NLC output tile
        hw_ref = next(it)           # (tl+4, Cin) compute_dtype  haloed lrelu(bn1(x))
        c1_ref = next(it)           # (tl+2, Cout) compute_dtype lrelu(bn2(conv1)) + 1-row halo
        res_ref = next(it)          # (tl, Cout) f32             pre-pool residual output

        t = pl.program_id(1)
        pos0 = t * tl

        x_blk = x_ref[0]                      # (tl, Cin) raw signal rows of this tile
        halo = halo_ref[0, 0]                 # (4, Cin)
        h_lo, h_hi = halo[0:2], halo[2:4]
        h_mid = x_blk

        # ---- bn1 (folded scale/shift, inference mode) + leaky relu
        if not first:
            def bn1_lrelu(v):
                h = v * bn1s_ref[...] + bn1b_ref[...]
                return jnp.where(h >= 0, h, slope * h)

            h_mid = bn1_lrelu(h_mid)
            h_lo = bn1_lrelu(h_lo)
            h_hi = bn1_lrelu(h_hi)
            # conv1 zero padding: the 2-row halo of the first/last tile lies
            # outside the signal and must be exactly 0 (the wrapper halo rows
            # are 0 there, but bn1's shift makes them nonzero).
            h_lo = jnp.where(t > 0, h_lo, 0.0)
            h_hi = jnp.where(t < n_tiles - 1, h_hi, 0.0)

        # ---- assemble the haloed activation window once in VMEM
        hw_ref[pl.ds(0, 2), :] = h_lo.astype(hw_ref.dtype)
        hw_ref[pl.ds(2, tl), :] = h_mid.astype(hw_ref.dtype)
        hw_ref[pl.ds(2 + tl, 2), :] = h_hi.astype(hw_ref.dtype)

        # ---- conv1 (k=3, pad=1; bn2 folded into w1/b1).  The 3 taps are fused
        #      into one MXU matmul with K = 3*Cin.  Keep a 1-row halo for conv2.
        h1 = jnp.concatenate(
            [hw_ref[pl.ds(k, tl + 2), :] for k in range(3)], axis=-1)  # (tl+2, 3*Cin)
        c1 = jnp.dot(h1, w1_ref[...],
                     preferred_element_type=jnp.float32) + b1_ref[...]
        c1 = jnp.where(c1 >= 0, c1, slope * c1)          # leaky relu (post bn2)
        # conv2 zero padding: zero the c1 rows at global positions -1 / seq_len.
        r1 = jax.lax.broadcasted_iota(jnp.int32, (tl + 2, 1), 0) + (pos0 - 1)
        c1 = jnp.where((r1 >= 0) & (r1 < seq_len), c1, 0.0)
        c1_ref[...] = c1.astype(c1_ref.dtype)

        # ---- conv2 (k=3, pad=1), taps fused into one matmul with K = 3*Cout.
        h2 = jnp.concatenate(
            [c1_ref[pl.ds(k, tl), :] for k in range(3)], axis=-1)      # (tl, 3*Cout)
        c2 = jnp.dot(h2, w2_ref[...],
                     preferred_element_type=jnp.float32) + b2_ref[...]

        # ---- residual path (kept f32 for accuracy; the 1x1 matmul is tiny)
        if downsample:
            identity = jnp.dot(x_blk, wd_ref[...],
                               preferred_element_type=jnp.float32) + bd_ref[...]
        else:
            identity = x_blk
        res_ref[...] = c2 + identity

        # ---- MaxPool1d(kernel=3, stride=3): stride-3 sublane loads + VPU max.
        tlo = tl // 3
        p0 = res_ref[pl.ds(0, tlo, 3), :]
        p1 = res_ref[pl.ds(1, tlo, 3), :]
        p2 = res_ref[pl.ds(2, tlo, 3), :]
        o_ref[0] = jnp.maximum(jnp.maximum(p0, p1), p2).astype(o_ref.dtype)

    return kernel


def residual_block_pallas_nlc(x_nlc, params, *, first, downsample,
                              tl=1536, slope=0.3,
                              compute_dtype=jnp.bfloat16, eps=1e-5):
    """NLC-in / NLC-out residual block: (N, L, Cin) -> (N, L // 3, Cout).

    Prefer this entry point when chaining blocks (keeps NLC end-to-end).
    """
    x_nlc = x_nlc.astype(jnp.float32)
    N, L, Cin = x_nlc.shape
    Cout = params["w1"].shape[2]
    if not downsample:
        assert Cin == Cout, "downsample=False requires Cin == Cout"

    tl = min(tl, L)
    assert tl % 24 == 0, "tile must be divisible by 8 (sublanes) and 3 (pool)"
    assert L % tl == 0, "length must be a multiple of the tile"
    n_tiles = L // tl
    tlo = tl // 3
    Lo = L // 3

    # ---- constant folding (inference-mode BatchNorm)
    bn1_scale = params["bn1_gamma"] / jnp.sqrt(params["bn1_var"] + eps)
    bn1_shift = params["bn1_beta"] - params["bn1_mean"] * bn1_scale
    bn2_scale = params["bn2_gamma"] / jnp.sqrt(params["bn2_var"] + eps)
    bn2_shift = params["bn2_beta"] - params["bn2_mean"] * bn2_scale

    # Fold bn2 into conv1, and fuse the 3 taps into the matmul K dimension.
    w1f = (params["w1"] * bn2_scale.reshape(1, 1, Cout)).reshape(3 * Cin, Cout)
    w1f = w1f.astype(compute_dtype)
    b1f = params["b1"] * bn2_scale + bn2_shift
    w2f = params["w2"].reshape(3 * Cout, Cout).astype(compute_dtype)
    wd = params["wd"].astype(jnp.float32)       # identity path stays f32
    bd = params["bd"].astype(jnp.float32)

    # ---- per-tile 2-row halos (N, n_tiles, 4, Cin); boundary halos are zero.
    xt = x_nlc.reshape(N, n_tiles, tl, Cin)
    z2 = jnp.zeros((N, 1, 2, Cin), x_nlc.dtype)
    left = jnp.concatenate([z2, xt[:, :-1, tl - 2:, :]], axis=1)    # rows pos-2, pos-1
    right = jnp.concatenate([xt[:, 1:, :2, :], z2], axis=1)         # rows pos+tl, pos+tl+1
    halo = jnp.concatenate([left, right], axis=2)                   # (N, nt, 4, Cin)

    kernel = _make_kernel(first=first, downsample=downsample, tl=tl,
                          seq_len=L, slope=slope, n_tiles=n_tiles)

    def fullspec(a):
        nd = a.ndim
        return pl.BlockSpec(a.shape, lambda b, t, _nd=nd: (0,) * _nd)

    in_specs = [
        pl.BlockSpec((1, tl, Cin), lambda b, t: (b, t, 0)),          # x tile
        pl.BlockSpec((1, 1, 4, Cin), lambda b, t: (b, t, 0, 0)),     # halo
        fullspec(w1f), fullspec(b1f),
    ]
    args = [x_nlc, halo, w1f, b1f]
    if not first:
        in_specs += [fullspec(bn1_scale), fullspec(bn1_shift)]
        args += [bn1_scale, bn1_shift]
    in_specs += [fullspec(w2f), fullspec(params["b2"])]
    args += [w2f, params["b2"]]
    if downsample:
        in_specs += [fullspec(wd), fullspec(bd)]
        args += [wd, bd]

    # ---- explicit VMEM budget (v5e scoped default is 16 MiB, v7x 32/64 MiB).
    cb = jnp.dtype(compute_dtype).itemsize
    est = (2 * (tl * Cin + 4 * Cin) * 4           # x + halo blocks (double buffered)
           + 2 * tlo * Cout * 4                   # output block (double buffered)
           + (tl + 4) * Cin * cb                  # hw scratch
           + (tl + 2) * Cout * cb                 # c1 scratch
           + tl * Cout * 4                        # res scratch
           + (tl + 2) * 3 * Cin * cb              # fused conv1 operand
           + tl * 3 * Cout * cb                   # fused conv2 operand
           + 4 * tl * Cout * 4                    # misc f32 temporaries
           + 2 * (3 * Cin + 3 * Cout + Cin + 8) * Cout * 4)   # weight/bias blocks
    vmem_limit = int(min(max(32 << 20, 2 * est), 100 << 20))

    return pl.pallas_call(
        kernel,
        out_shape=jax.ShapeDtypeStruct((N, Lo, Cout), jnp.float32),  # NLC
        grid=(N, n_tiles),
        in_specs=in_specs,
        out_specs=pl.BlockSpec((1, tlo, Cout), lambda b, t: (b, t, 0)),
        scratch_shapes=[
            pltpu.VMEM((tl + 4, Cin), compute_dtype),   # haloed lrelu(bn1(x)) window
            pltpu.VMEM((tl + 2, Cout), compute_dtype),  # lrelu(bn2(conv1)) + 1-row halo
            pltpu.VMEM((tl, Cout), jnp.float32),        # pre-pool residual output
        ],
        compiler_params=pltpu.CompilerParams(
            dimension_semantics=("parallel", "parallel"),
            vmem_limit_bytes=vmem_limit),
    )(*args)


def residual_block_pallas(x_ncl, params, **kw):
    """PyTorch-layout wrapper: (N, Cin, L) -> (N, Cout, L // 3).

    Transposes only at the model boundary; chained blocks should use
    residual_block_pallas_nlc directly and stay NLC end-to-end.
    """
    out_nlc = residual_block_pallas_nlc(jnp.transpose(x_ncl, (0, 2, 1)),
                                        params, **kw)
    return jnp.transpose(out_nlc, (0, 2, 1))


def residual_block_ref(x_ncl, params, *, first, downsample, slope=0.3, eps=1e-5):
    """Pure-JAX f32 reference (PyTorch semantics, NCL in / NCL out)."""
    x = jnp.transpose(x_ncl, (0, 2, 1))                 # NLC
    if not first:
        s1 = params["bn1_gamma"] / jnp.sqrt(params["bn1_var"] + eps)
        t1 = params["bn1_beta"] - params["bn1_mean"] * s1
        out = x * s1 + t1
        out = jnp.where(out >= 0, out, slope * out)
    else:
        out = x

    def conv3(h, w, b):
        L = h.shape[1]
        hp = jnp.pad(h, ((0, 0), (1, 1), (0, 0)))
        return sum(jnp.einsum("nlc,cd->nld", hp[:, k:k + L], w[k])
                   for k in range(3)) + b

    out = conv3(out, params["w1"], params["b1"])
    s2 = params["bn2_gamma"] / jnp.sqrt(params["bn2_var"] + eps)
    t2 = params["bn2_beta"] - params["bn2_mean"] * s2
    out = out * s2 + t2
    out = jnp.where(out >= 0, out, slope * out)
    out = conv3(out, params["w2"], params["b2"])

    identity = x
    if downsample:
        identity = jnp.einsum("nlc,cd->nld", x, params["wd"]) + params["bd"]
    out = out + identity

    N, L, C = out.shape
    Lo = L // 3
    out = out[:, :Lo * 3].reshape(N, Lo, 3, C).max(axis=2)   # MaxPool1d(3)
    return jnp.transpose(out, (0, 2, 1))                     # back to NCL


def make_params(key, cin, cout):
    ks = jax.random.split(key, 14)
    p = {}
    # Conv weights stored in (k, cin, cout) contraction layout
    # (PyTorch Conv1d weight (cout, cin, k) transposed).
    p["w1"] = 0.1 * jax.random.normal(ks[0], (3, cin, cout), jnp.float32)
    p["b1"] = 0.1 * jax.random.normal(ks[1], (1, cout), jnp.float32)
    p["w2"] = 0.1 * jax.random.normal(ks[2], (3, cout, cout), jnp.float32)
    p["b2"] = 0.1 * jax.random.normal(ks[3], (1, cout), jnp.float32)
    p["wd"] = 0.1 * jax.random.normal(ks[4], (cin, cout), jnp.float32)
    p["bd"] = 0.1 * jax.random.normal(ks[5], (1, cout), jnp.float32)
    # BatchNorm1d params + running stats (inference mode).
    p["bn1_gamma"] = 1.0 + 0.1 * jax.random.normal(ks[6], (1, cin), jnp.float32)
    p["bn1_beta"] = 0.1 * jax.random.normal(ks[7], (1, cin), jnp.float32)
    p["bn1_mean"] = 0.1 * jax.random.normal(ks[8], (1, cin), jnp.float32)
    p["bn1_var"] = jnp.abs(1.0 + 0.1 * jax.random.normal(ks[9], (1, cin), jnp.float32))
    p["bn2_gamma"] = 1.0 + 0.1 * jax.random.normal(ks[10], (1, cout), jnp.float32)
    p["bn2_beta"] = 0.1 * jax.random.normal(ks[11], (1, cout), jnp.float32)
    p["bn2_mean"] = 0.1 * jax.random.normal(ks[12], (1, cout), jnp.float32)
    p["bn2_var"] = jnp.abs(1.0 + 0.1 * jax.random.normal(ks[13], (1, cout), jnp.float32))
    return p


if __name__ == "__main__":
    # nb_filts = [4, 8], first=False  ->  bn1 active, 1x1 downsample active.
    N, Cin, Cout = 2, 4, 8
    tl = 384                    # small test tile; two tiles exercise inter-tile halos
    L = 2 * tl
    key = jax.random.PRNGKey(0)
    kx, kp = jax.random.split(key)

    x_ncl = jax.random.normal(kx, (N, Cin, L), jnp.float32)     # PyTorch NCL input
    params = make_params(kp, Cin, Cout)

    ref = jax.block_until_ready(
        residual_block_ref(x_ncl, params, first=False, downsample=True))

    # Strict check with f32 matmuls (exact up to f32 reassociation / BN folding).
    out32 = residual_block_pallas(x_ncl, params, first=False, downsample=True,
                                  tl=tl, compute_dtype=jnp.float32)
    out32 = jax.block_until_ready(out32)
    assert out32.shape == (N, Cout, L // 3), out32.shape
    assert jnp.allclose(out32, ref, atol=1e-3, rtol=1e-3), \
        float(jnp.max(jnp.abs(out32 - ref)))

    # Default bf16-matmul path (f32 MXU accumulation) -> looser tolerance.
    out16 = residual_block_pallas(x_ncl, params, first=False, downsample=True,
                                  tl=tl, compute_dtype=jnp.bfloat16)
    out16 = jax.block_until_ready(out16)
    assert jnp.allclose(out16, ref, atol=1e-1, rtol=1e-1), \
        float(jnp.max(jnp.abs(out16 - ref)))

    # first=True / no-downsample variant exercises the conditional-operand paths.
    params_same = make_params(jax.random.PRNGKey(1), Cin, Cin)
    ref2 = jax.block_until_ready(
        residual_block_ref(x_ncl, params_same, first=True, downsample=False))
    out2 = residual_block_pallas(x_ncl, params_same, first=True, downsample=False,
                                 tl=tl, compute_dtype=jnp.float32)
    out2 = jax.block_until_ready(out2)
    assert out2.shape == (N, Cin, L // 3), out2.shape
    assert jnp.allclose(out2, ref2, atol=1e-3, rtol=1e-3), \
        float(jnp.max(jnp.abs(out2 - ref2)))

    print("KERNEL_OK")
</pallas_src>

<mosaic_0001>
module attributes {stable_mosaic.version = 11 : i64} {
  func.func @kernel(%arg0: i32, %arg1: i32, %arg2: memref<1x384x4xf32, #tpu.memory_space<vmem>>, %arg3: memref<1x1x4x4xf32, #tpu.memory_space<vmem>>, %arg4: memref<12x8xf32, #tpu.memory_space<vmem>>, %arg5: memref<1x8xf32, #tpu.memory_space<vmem>>, %arg6: memref<1x4xf32, #tpu.memory_space<vmem>>, %arg7: memref<1x4xf32, #tpu.memory_space<vmem>>, %arg8: memref<24x8xf32, #tpu.memory_space<vmem>>, %arg9: memref<1x8xf32, #tpu.memory_space<vmem>>, %arg10: memref<4x8xf32, #tpu.memory_space<vmem>>, %arg11: memref<1x8xf32, #tpu.memory_space<vmem>>, %arg12: memref<1x128x8xf32, #tpu.memory_space<vmem>>, %arg13: memref<388x4xf32, #tpu.memory_space<vmem>>, %arg14: memref<386x8xf32, #tpu.memory_space<vmem>>, %arg15: memref<384x8xf32, #tpu.memory_space<vmem>>) attributes {dimension_semantics = [#tpu.dimension_semantics<parallel>, #tpu.dimension_semantics<parallel>], iteration_bounds = array<i64: 2, 2>, scalar_prefetch = 0 : i64, scratch_operands = 3 : i64, tpu.core_type = #tpu.core_type<tc>, window_params = [{transform_indices = @transform_0, window_bounds = array<i64: 1, 384, 4>}, {transform_indices = @transform_1, window_bounds = array<i64: 1, 1, 4, 4>}, {pipeline_mode = #tpu.pipeline_mode<synchronous>, transform_indices = @transform_2, window_bounds = array<i64: 12, 8>}, {pipeline_mode = #tpu.pipeline_mode<synchronous>, transform_indices = @transform_3, window_bounds = array<i64: 1, 8>}, {pipeline_mode = #tpu.pipeline_mode<synchronous>, transform_indices = @transform_4, window_bounds = array<i64: 1, 4>}, {pipeline_mode = #tpu.pipeline_mode<synchronous>, transform_indices = @transform_5, window_bounds = array<i64: 1, 4>}, {pipeline_mode = #tpu.pipeline_mode<synchronous>, transform_indices = @transform_6, window_bounds = array<i64: 24, 8>}, {pipeline_mode = #tpu.pipeline_mode<synchronous>, transform_indices = @transform_7, window_bounds = array<i64: 1, 8>}, {pipeline_mode = #tpu.pipeline_mode<synchronous>, transform_indices = @transform_8, window_bounds = array<i64: 4, 8>}, {pipeline_mode = #tpu.pipeline_mode<synchronous>, transform_indices = @transform_9, window_bounds = array<i64: 1, 8>}, {transform_indices = @transform_10, window_bounds = array<i64: 1, 128, 8>}]} {
    %c384_i32 = arith.constant 384 : i32
    %0 = arith.muli %arg1, %c384_i32 : i32
    %c0 = arith.constant 0 : index
    %c0_0 = arith.constant 0 : index
    %c0_1 = arith.constant 0 : index
    %1 = vector.load %arg2[%c0, %c0_0, %c0_1] : memref<1x384x4xf32, #tpu.memory_space<vmem>>, vector<1x384x4xf32>
    %2 = vector.shape_cast %1 : vector<1x384x4xf32> to vector<384x4xf32>
    %c0_2 = arith.constant 0 : index
    %c0_3 = arith.constant 0 : index
    %c0_4 = arith.constant 0 : index
    %c0_5 = arith.constant 0 : index
    %3 = vector.load %arg3[%c0_2, %c0_3, %c0_4, %c0_5] : memref<1x1x4x4xf32, #tpu.memory_space<vmem>>, vector<1x1x4x4xf32>
    %4 = vector.shape_cast %3 : vector<1x1x4x4xf32> to vector<4x4xf32>
    %5 = vector.extract_strided_slice %4 {offsets = [0, 0], sizes = [2, 4], strides = [1, 1]} : vector<4x4xf32> to vector<2x4xf32>
    %6 = vector.extract_strided_slice %4 {offsets = [2, 0], sizes = [2, 4], strides = [1, 1]} : vector<4x4xf32> to vector<2x4xf32>
    %c0_6 = arith.constant 0 : index
    %c0_7 = arith.constant 0 : index
    %7 = vector.load %arg6[%c0_6, %c0_7] : memref<1x4xf32, #tpu.memory_space<vmem>>, vector<1x4xf32>
    %8 = vector.broadcast %7 : vector<1x4xf32> to vector<384x4xf32>
    %9 = arith.mulf %2, %8 : vector<384x4xf32>
    %c0_8 = arith.constant 0 : index
    %c0_9 = arith.constant 0 : index
    %10 = vector.load %arg7[%c0_8, %c0_9] : memref<1x4xf32, #tpu.memory_space<vmem>>, vector<1x4xf32>
    %11 = vector.broadcast %10 : vector<1x4xf32> to vector<384x4xf32>
    %12 = arith.addf %9, %11 : vector<384x4xf32>
    %cst = arith.constant 0.000000e+00 : f32
    %13 = vector.broadcast %cst : f32 to vector<384x4xf32>
    %14 = arith.cmpf oge, %12, %13 : vector<384x4xf32>
    %cst_10 = arith.constant 3.000000e-01 : f32
    %15 = vector.broadcast %cst_10 : f32 to vector<384x4xf32>
    %16 = arith.mulf %15, %12 : vector<384x4xf32>
    %17 = arith.select %14, %12, %16 : vector<384x4xi1>, vector<384x4xf32>
    %c0_11 = arith.constant 0 : index
    %c0_12 = arith.constant 0 : index
    %18 = vector.load %arg6[%c0_11, %c0_12] : memref<1x4xf32, #tpu.memory_space<vmem>>, vector<1x4xf32>
    %19 = vector.broadcast %18 : vector<1x4xf32> to vector<2x4xf32>
    %20 = arith.mulf %5, %19 : vector<2x4xf32>
    %c0_13 = arith.constant 0 : index
    %c0_14 = arith.constant 0 : index
    %21 = vector.load %arg7[%c0_13, %c0_14] : memref<1x4xf32, #tpu.memory_space<vmem>>, vector<1x4xf32>
    %22 = vector.broadcast %21 : vector<1x4xf32> to vector<2x4xf32>
    %23 = arith.addf %20, %22 : vector<2x4xf32>
    %cst_15 = arith.constant 0.000000e+00 : f32
    %24 = vector.broadcast %cst_15 : f32 to vector<2x4xf32>
    %25 = arith.cmpf oge, %23, %24 : vector<2x4xf32>
    %cst_16 = arith.constant 3.000000e-01 : f32
    %26 = vector.broadcast %cst_16 : f32 to vector<2x4xf32>
    %27 = arith.mulf %26, %23 : vector<2x4xf32>
    %28 = arith.select %25, %23, %27 : vector<2x4xi1>, vector<2x4xf32>
    %c0_17 = arith.constant 0 : index
    %c0_18 = arith.constant 0 : index
    %29 = vector.load %arg6[%c0_17, %c0_18] : memref<1x4xf32, #tpu.memory_space<vmem>>, vector<1x4xf32>
    %30 = vector.broadcast %29 : vector<1x4xf32> to vector<2x4xf32>
    %31 = arith.mulf %6, %30 : vector<2x4xf32>
    %c0_19 = arith.constant 0 : index
    %c0_20 = arith.constant 0 : index
    %32 = vector.load %arg7[%c0_19, %c0_20] : memref<1x4xf32, #tpu.memory_space<vmem>>, vector<1x4xf32>
    %33 = vector.broadcast %32 : vector<1x4xf32> to vector<2x4xf32>
    %34 = arith.addf %31, %33 : vector<2x4xf32>
    %cst_21 = arith.constant 0.000000e+00 : f32
    %35 = vector.broadcast %cst_21 : f32 to vector<2x4xf32>
    %36 = arith.cmpf oge, %34, %35 : vector<2x4xf32>
    %cst_22 = arith.constant 3.000000e-01 : f32
    %37 = vector.broadcast %cst_22 : f32 to vector<2x4xf32>
    %38 = arith.mulf %37, %34 : vector<2x4xf32>
    %39 = arith.select %36, %34, %38 : vector<2x4xi1>, vector<2x4xf32>
    %c0_i32 = arith.constant 0 : i32
    %40 = arith.cmpi sgt, %arg1, %c0_i32 : i32
    %cst_23 = arith.constant 0.000000e+00 : f32
    %41 = vector.broadcast %cst_23 : f32 to vector<2x4xf32>
    %42 = arith.select %40, %28, %41 : vector<2x4xf32>
    %c1_i32 = arith.constant 1 : i32
    %43 = arith.cmpi slt, %arg1, %c1_i32 : i32
    %cst_24 = arith.constant 0.000000e+00 : f32
    %44 = vector.broadcast %cst_24 : f32 to vector<2x4xf32>
    %45 = arith.select %43, %39, %44 : vector<2x4xf32>
    %c0_25 = arith.constant 0 : index
    %c0_26 = arith.constant 0 : index
    %46 = vector.load %arg13[%c0_25, %c0_26] : memref<388x4xf32, #tpu.memory_space<vmem>>, vector<2x4xf32>
    tpu.vector_store %arg13[%c0_25, %c0_26], %42 {strides = array<i32>} : memref<388x4xf32, #tpu.memory_space<vmem>>, vector<2x4xf32>,
    %c2 = arith.constant 2 : index
    %c0_27 = arith.constant 0 : index
    %47 = vector.load %arg13[%c2, %c0_27] : memref<388x4xf32, #tpu.memory_space<vmem>>, vector<384x4xf32>
    tpu.vector_store %arg13[%c2, %c0_27], %17 {strides = array<i32>} : memref<388x4xf32, #tpu.memory_space<vmem>>, vector<384x4xf32>,
    %c386 = arith.constant 386 : index
    %c0_28 = arith.constant 0 : index
    %48 = vector.load %arg13[%c386, %c0_28] : memref<388x4xf32, #tpu.memory_space<vmem>>, vector<2x4xf32>
    tpu.vector_store %arg13[%c386, %c0_28], %45 {strides = array<i32>} : memref<388x4xf32, #tpu.memory_space<vmem>>, vector<2x4xf32>,
    %c0_29 = arith.constant 0 : index
    %c0_30 = arith.constant 0 : index
    %49 = vector.load %arg13[%c0_29, %c0_30] : memref<388x4xf32, #tpu.memory_space<vmem>>, vector<386x4xf32>
    %c1 = arith.constant 1 : index
    %c0_31 = arith.constant 0 : index
    %50 = vector.load %arg13[%c1, %c0_31] : memref<388x4xf32, #tpu.memory_space<vmem>>, vector<386x4xf32>
    %c2_32 = arith.constant 2 : index
    %c0_33 = arith.constant 0 : index
    %51 = vector.load %arg13[%c2_32, %c0_33] : memref<388x4xf32, #tpu.memory_space<vmem>>, vector<386x4xf32>
    %52 = tpu.concatenate %49, %50, %51 in 1 : vector<386x4xf32>, vector<386x4xf32>, vector<386x4xf32> -> vector<386x12xf32>
    %c0_34 = arith.constant 0 : index
    %c0_35 = arith.constant 0 : index
    %53 = vector.load %arg4[%c0_34, %c0_35] : memref<12x8xf32, #tpu.memory_space<vmem>>, vector<12x8xf32>
    %cst_36 = arith.constant dense<0.000000e+00> : vector<386x8xf32>
    %54 = tpu.matmul %52, %53, %cst_36 {dimension_numbers = #tpu.dot_dimension_numbers<[1], [0], [0], [1], [0, 0, 1, 1], [], []>} : vector<386x12xf32>, vector<12x8xf32>, vector<386x8xf32> -> vector<386x8xf32>
    %c0_37 = arith.constant 0 : index
    %c0_38 = arith.constant 0 : index
    %55 = vector.load %arg5[%c0_37, %c0_38] : memref<1x8xf32, #tpu.memory_space<vmem>>, vector<1x8xf32>
    %56 = vector.broadcast %55 : vector<1x8xf32> to vector<386x8xf32>
    %57 = arith.addf %54, %56 : vector<386x8xf32>
    %cst_39 = arith.constant 0.000000e+00 : f32
    %58 = vector.broadcast %cst_39 : f32 to vector<386x8xf32>
    %59 = arith.cmpf oge, %57, %58 : vector<386x8xf32>
    %cst_40 = arith.constant 3.000000e-01 : f32
    %60 = vector.broadcast %cst_40 : f32 to vector<386x8xf32>
    %61 = arith.mulf %60, %57 : vector<386x8xf32>
    %62 = arith.select %59, %57, %61 : vector<386x8xi1>, vector<386x8xf32>
    %63 = tpu.iota {dimensions = array<i32: 0>} : vector<386x1xi32>
    %c1_i32_41 = arith.constant 1 : i32
    %64 = arith.subi %0, %c1_i32_41 : i32
    %65 = vector.broadcast %64 : i32 to vector<386x1xi32>
    %66 = arith.addi %63, %65 : vector<386x1xi32>
    %c0_i32_42 = arith.constant 0 : i32
    %67 = vector.broadcast %c0_i32_42 : i32 to vector<386x1xi32>
    %68 = arith.cmpi sge, %66, %67 : vector<386x1xi32>
    %c768_i32 = arith.constant 768 : i32
    %69 = vector.broadcast %c768_i32 : i32 to vector<386x1xi32>
    %70 = arith.cmpi slt, %66, %69 : vector<386x1xi32>
    %71 = arith.andi %68, %70 : vector<386x1xi1>
    %cst_43 = arith.constant 0.000000e+00 : f32
    %72 = vector.shape_cast %71 : vector<386x1xi1> to vector<386x1xi1>
    %73 = vector.broadcast %72 : vector<386x1xi1> to vector<386x8xi1>
    %74 = vector.broadcast %cst_43 : f32 to vector<386x8xf32>
    %75 = arith.select %73, %62, %74 : vector<386x8xi1>, vector<386x8xf32>
    %c0_44 = arith.constant 0 : index
    %c0_45 = arith.constant 0 : index
    %76 = vector.load %arg14[%c0_44, %c0_45] : memref<386x8xf32, #tpu.memory_space<vmem>>, vector<386x8xf32>
    tpu.vector_store %arg14[%c0_44, %c0_45], %75 {strides = array<i32>} : memref<386x8xf32, #tpu.memory_space<vmem>>, vector<386x8xf32>,
    %c0_46 = arith.constant 0 : index
    %c0_47 = arith.constant 0 : index
    %77 = vector.load %arg14[%c0_46, %c0_47] : memref<386x8xf32, #tpu.memory_space<vmem>>, vector<384x8xf32>
    %c1_48 = arith.constant 1 : index
    %c0_49 = arith.constant 0 : index
    %78 = vector.load %arg14[%c1_48, %c0_49] : memref<386x8xf32, #tpu.memory_space<vmem>>, vector<384x8xf32>
    %c2_50 = arith.constant 2 : index
    %c0_51 = arith.constant 0 : index
    %79 = vector.load %arg14[%c2_50, %c0_51] : memref<386x8xf32, #tpu.memory_space<vmem>>, vector<384x8xf32>
    %80 = tpu.concatenate %77, %78, %79 in 1 : vector<384x8xf32>, vector<384x8xf32>, vector<384x8xf32> -> vector<384x24xf32>
    %c0_52 = arith.constant 0 : index
    %c0_53 = arith.constant 0 : index
    %81 = vector.load %arg8[%c0_52, %c0_53] : memref<24x8xf32, #tpu.memory_space<vmem>>, vector<24x8xf32>
    %cst_54 = arith.constant dense<0.000000e+00> : vector<384x8xf32>
    %82 = tpu.matmul %80, %81, %cst_54 {dimension_numbers = #tpu.dot_dimension_numbers<[1], [0], [0], [1], [0, 0, 1, 1], [], []>} : vector<384x24xf32>, vector<24x8xf32>, vector<384x8xf32> -> vector<384x8xf32>
    %c0_55 = arith.constant 0 : index
    %c0_56 = arith.constant 0 : index
    %83 = vector.load %arg9[%c0_55, %c0_56] : memref<1x8xf32, #tpu.memory_space<vmem>>, vector<1x8xf32>
    %84 = vector.broadcast %83 : vector<1x8xf32> to vector<384x8xf32>
    %85 = arith.addf %82, %84 : vector<384x8xf32>
    %c0_57 = arith.constant 0 : index
    %c0_58 = arith.constant 0 : index
    %86 = vector.load %arg10[%c0_57, %c0_58] : memref<4x8xf32, #tpu.memory_space<vmem>>, vector<4x8xf32>
    %cst_59 = arith.constant dense<0.000000e+00> : vector<384x8xf32>
    %87 = tpu.matmul %2, %86, %cst_59 {dimension_numbers = #tpu.dot_dimension_numbers<[1], [0], [0], [1], [0, 0, 1, 1], [], []>} : vector<384x4xf32>, vector<4x8xf32>, vector<384x8xf32> -> vector<384x8xf32>
    %c0_60 = arith.constant 0 : index
    %c0_61 = arith.constant 0 : index
    %88 = vector.load %arg11[%c0_60, %c0_61] : memref<1x8xf32, #tpu.memory_space<vmem>>, vector<1x8xf32>
    %89 = vector.broadcast %88 : vector<1x8xf32> to vector<384x8xf32>
    %90 = arith.addf %87, %89 : vector<384x8xf32>
    %91 = arith.addf %85, %90 : vector<384x8xf32>
    %c0_62 = arith.constant 0 : index
    %c0_63 = arith.constant 0 : index
    %92 = vector.load %arg15[%c0_62, %c0_63] : memref<384x8xf32, #tpu.memory_space<vmem>>, vector<384x8xf32>
    tpu.vector_store %arg15[%c0_62, %c0_63], %91 {strides = array<i32>} : memref<384x8xf32, #tpu.memory_space<vmem>>, vector<384x8xf32>,
    %c0_64 = arith.constant 0 : index
    %c0_65 = arith.constant 0 : index
    %93 = tpu.strided_load %arg15[%c0_64, %c0_65] {strides = array<i32: 3, 1>} : memref<384x8xf32, #tpu.memory_space<vmem>>, vector<128x8xf32>
    %c1_66 = arith.constant 1 : index
    %c0_67 = arith.constant 0 : index
    %94 = tpu.strided_load %arg15[%c1_66, %c0_67] {strides = array<i32: 3, 1>} : memref<384x8xf32, #tpu.memory_space<vmem>>, vector<128x8xf32>
    %c2_68 = arith.constant 2 : index
    %c0_69 = arith.constant 0 : index
    %95 = tpu.strided_load %arg15[%c2_68, %c0_69] {strides = array<i32: 3, 1>} : memref<384x8xf32, #tpu.memory_space<vmem>>, vector<128x8xf32>
    %96 = arith.maximumf %93, %94 : vector<128x8xf32>
    %97 = arith.maximumf %96, %95 : vector<128x8xf32>
    %c0_70 = arith.constant 0 : index
    %c0_71 = arith.constant 0 : index
    %c0_72 = arith.constant 0 : index
    %98 = vector.load %arg12[%c0_70, %c0_71, %c0_72] : memref<1x128x8xf32, #tpu.memory_space<vmem>>, vector<1x128x8xf32>
    %99 = vector.shape_cast %98 : vector<1x128x8xf32> to vector<128x8xf32>
    %100 = vector.shape_cast %97 : vector<128x8xf32> to vector<1x128x8xf32>
    tpu.vector_store %arg12[%c0_70, %c0_71, %c0_72], %100 {strides = array<i32>} : memref<1x128x8xf32, #tpu.memory_space<vmem>>, vector<1x128x8xf32>,
    return
  }
  func.func @transform_0(%arg0: i32, %arg1: i32) -> (i32, i32, i32) {
    %c0_i32 = arith.constant 0 : i32
    %c0_i32_0 = arith.constant 0 : i32
    return %arg0, %arg1, %c0_i32 : i32, i32, i32
  }
  func.func @transform_1(%arg0: i32, %arg1: i32) -> (i32, i32, i32, i32) {
    %c0_i32 = arith.constant 0 : i32
    %c0_i32_0 = arith.constant 0 : i32
    %c0_i32_1 = arith.constant 0 : i32
    return %arg0, %arg1, %c0_i32, %c0_i32_0 : i32, i32, i32, i32
  }
  func.func @transform_2(%arg0: i32, %arg1: i32) -> (i32, i32) {
    %c0_i32 = arith.constant 0 : i32
    %c0_i32_0 = arith.constant 0 : i32
    %c0_i32_1 = arith.constant 0 : i32
    return %c0_i32, %c0_i32_0 : i32, i32
  }
  func.func @transform_3(%arg0: i32, %arg1: i32) -> (i32, i32) {
    %c0_i32 = arith.constant 0 : i32
    %c0_i32_0 = arith.constant 0 : i32
    %c0_i32_1 = arith.constant 0 : i32
    return %c0_i32, %c0_i32_0 : i32, i32
  }
  func.func @transform_4(%arg0: i32, %arg1: i32) -> (i32, i32) {
    %c0_i32 = arith.constant 0 : i32
    %c0_i32_0 = arith.constant 0 : i32
    %c0_i32_1 = arith.constant 0 : i32
    return %c0_i32, %c0_i32_0 : i32, i32
  }
  func.func @transform_5(%arg0: i32, %arg1: i32) -> (i32, i32) {
    %c0_i32 = arith.constant 0 : i32
    %c0_i32_0 = arith.constant 0 : i32
    %c0_i32_1 = arith.constant 0 : i32
    return %c0_i32, %c0_i32_0 : i32, i32
  }
  func.func @transform_6(%arg0: i32, %arg1: i32) -> (i32, i32) {
    %c0_i32 = arith.constant 0 : i32
    %c0_i32_0 = arith.constant 0 : i32
    %c0_i32_1 = arith.constant 0 : i32
    return %c0_i32, %c0_i32_0 : i32, i32
  }
  func.func @transform_7(%arg0: i32, %arg1: i32) -> (i32, i32) {
    %c0_i32 = arith.constant 0 : i32
    %c0_i32_0 = arith.constant 0 : i32
    %c0_i32_1 = arith.constant 0 : i32
    return %c0_i32, %c0_i32_0 : i32, i32
  }
  func.func @transform_8(%arg0: i32, %arg1: i32) -> (i32, i32) {
    %c0_i32 = arith.constant 0 : i32
    %c0_i32_0 = arith.constant 0 : i32
    %c0_i32_1 = arith.constant 0 : i32
    return %c0_i32, %c0_i32_0 : i32, i32
  }
  func.func @transform_9(%arg0: i32, %arg1: i32) -> (i32, i32) {
    %c0_i32 = arith.constant 0 : i32
    %c0_i32_0 = arith.constant 0 : i32
    %c0_i32_1 = arith.constant 0 : i32
    return %c0_i32, %c0_i32_0 : i32, i32
  }
  func.func @transform_10(%arg0: i32, %arg1: i32) -> (i32, i32, i32) {
    %c0_i32 = arith.constant 0 : i32
    %c0_i32_0 = arith.constant 0 : i32
    return %arg0, %arg1, %c0_i32 : i32, i32, i32
  }
}

</mosaic_0001>

<bundles_post_ra>
// kernel: tpu_custom_call.1
= control target key start
LH: loop header
LB: loop body
LE: loop exit
PB: predicated region body
PF: predicated region fallthrough
CT: control target
= control target key end

     0   :  { %s5366_s13 = smov 0   ;;  %s5368_s14 = smov 0   ;;  %s6863_s0 = inlined_call_operand.vmem [shape: f32[2,768,4], index: 0, kind: input, shape index: {}]   ;;  %s6864_s1 = inlined_call_operand.vmem [shape: f32[2,2,4,4], index: 1, kind: input, shape index: {}]   ;;  %s6865_s2 = inlined_call_operand.vmem [shape: f32[12,8], index: 2, kind: input, shape index: {}]   ;;  %s6866_s3 = inlined_call_operand.vmem [shape: f32[1,8], index: 3, kind: input, shape index: {}]   ;;  %s6867_s4 = inlined_call_operand.vmem [shape: f32[1,4], index: 4, kind: input, shape index: {}]   ;;  %s6868_s5 = inlined_call_operand.vmem [shape: f32[1,4], index: 5, kind: input, shape index: {}]   ;;  %s6869_s6 = inlined_call_operand.vmem [shape: f32[24,8], index: 6, kind: input, shape index: {}]   ;;  %s6870_s7 = inlined_call_operand.vmem [shape: f32[1,8], index: 7, kind: input, shape index: {}]   ;;  %s6871_s8 = inlined_call_operand.vmem [shape: f32[4,8], index: 8, kind: input, shape index: {}]   ;;  %s6872_s9 = inlined_call_operand.vmem [shape: f32[1,8], index: 9, kind: input, shape index: {}]   ;;  %s6873_s10 = inlined_call_operand.vmem [shape: f32[2,256,8], index: 10, kind: output, shape index: {}]  }
   0x1   :  { %s5370_s15 = smov 0   ;;  %s5372_s16 = smov 0  }
   0x2   :  { %s5374_s17 = smov 0  }
   0x3 LB: > { %s29_s18 = sadd.s32 1, %s5294_s15  ;;  %s32_s19 = sadd.s32 1, %s5298_s16  ;;  %s5302_s17 = sphi %s5374_s17, %s20_s17   ;;  %s5298_s16 = sphi %s5372_s16, %s6919_s16   ;;  %s5294_s15 = sphi %s5370_s15, %s6918_s15   ;;  %s5290_s14 = sphi %s5368_s14, %s6917_s14   ;;  %s5286_s13 = sphi %s5366_s13, %s6916_s13  }
   0x4   : > { %p30_p0 = scmp.ge.s32.totalorder %s29_s18, 2  ;;  %p4399_p1 = scmp.ge.s32.totalorder %s5302_s17, 1 }
   0x5   : > { %p348_p2 = scmp.lt.s32.totalorder %s5302_s17, 5 }
   0x6   : > { %s6921_s18 = smov (%p30_p0, %s29_s18), 0  ;;  %s6923_s19 = smov (!%p30_p0, %s32_s19), %s5298_s16 }
   0x7   : > { %p349_p3 = pnand %p4399_p1, %p348_p2  ;;  %p34_p4 = scmp.ge.s32.totalorder %s6923_s19, 2 }
   0x8   : > { %s402_s20 = smul.u32 (!%p349_p3), 48, %s5286_s13  ;;  %p403_p5 = scmp.lt.s32.totalorder (!%p349_p3), %s5290_s14, 1  ;;  %v5410_v0 = vld [vmem:[%s6867_s4] ss:$0 sm:$0xff] (!%p349_p3)  ;;  %vm749_vm0 = vcmask (!%p349_p3), 25600   ;;  %vm751_vm1 = vcmask (!%p349_p3), 31744  }
   0x9   : > { %s6925_s19 = smov (%p34_p4, %s6923_s19), 0  ;;  %352 = sbr.rel (%p349_p3) target bundleno = 1022 (0x3fe), region = 60 }
   0xa   : > { %6874 = sst [smem:[#allocation5_spill]] %s6925_s19  ;;  %p414_p6 = scmp.lt.s32.totalorder (!%p349_p3), %s5286_s13, 1  ;;  %v5420_v1 = vld [vmem:[%s6868_s5] ss:$0 sm:$0xff] (!%p349_p3) }
   0xb   : > { %p405_p7 = scmp.lt.s32.totalorder (!%p349_p3), %s402_s20, 95  ;;  %p739_p8 = scmp.gt.s32.totalorder (!%p349_p3), %s5286_s13, 0 }
   0xc   : > { %s5310_s29 = smov (!%p349_p3), 16  }
  0x10   : > { %s6927_s14 = smov (!%p403_p5, %s5290_s14), 1  ;;  %s6929_s20 = smov (!%p405_p7, %s402_s20), 95 }
  0x11   : > { %s5167_s21 = smul.u32 96, %s6927_s14  ;;  %s4401_s22 = sshll.u32 %s6927_s14, 1 }
  0x12   : > { %s415_s23 = scalar_select %p414_p6, %s5286_s13, 1 }
  0x13   : > { %s408_s24 = sadd.s32 %s5167_s21, %s6929_s20 }
  0x14   : > { %s4400_s25 = sshll.u32 %s408_s24, 3  ;;  %s417_s26 = sadd.s32 %s4401_s22, %s415_s23 }
  0x15   : > { %s5415_s11 = scalar_lea.vmem %s6863_s0, %s4400_s25  ;;  %s4402_s12 = sshll.u32 %s417_s26, 2 }
  0x16   : > { %s419_s23 = scalar_lea.vmem %s6864_s1, %s4402_s12  ;;  %v431_v2 = vld [vmem:[%s5415_s11] sm:$0xff]  ;;  %v432_v3 = vld [vmem:[%s5415_s11 + $0x8] sm:$0xff]  ;;  %v433_v4 = vld [vmem:[%s5415_s11 + $0x10] sm:$0xff]  ;;  %s5304_s24 = smov 4  }
  0x17   : > { %v479_v5 = vld [vmem:[%s419_s23] sm:$0xf]  ;;  %v487_v6 = vmul.f32 %v5410_v0, %v431_v2  ;;  %v488_v7 = vmul.f32 %v5410_v0, %v432_v3  ;;  %v489_v8 = vmul.f32 %v5410_v0, %v433_v4  ;;  %v434_v9 = vld [vmem:[%s5415_s11 + $0x18] sm:$0xff]  ;;  %s740_s19 = scalar_select %p739_p8, 1, 0  ;;  %v436_v14 = vld [vmem:[%s5415_s11 + $0x28] sm:$0xff] }
  0x18   : > { %v435_v10 = vld [vmem:[%s5415_s11 + $0x20] sm:$0xff]  ;;  %v734_v11 = vmul.f32 %v5410_v0, %v479_v5  ;;  %v490_v12 = vmul.f32 %v5410_v0, %v434_v9  ;;  %v492_v18 = vmul.f32 %v5410_v0, %v436_v14  ;;  %v437_v25 = vld [vmem:[%s5415_s11 + $0x30] sm:$0xff]  ;;  %v438_v26 = vld [vmem:[%s5415_s11 + $0x38] sm:$0xff]  ;;  %s5305_s25 = smov 8   ;;  %s430_s12 = smul.u32 384, %s5286_s13 }
  0x19   : > { %v491_v13 = vmul.f32 %v5410_v0, %v435_v10  ;;  %v542_v15 = vadd.f32 %v5420_v1, %v487_v6  ;;  %v543_v16 = vadd.f32 %v5420_v1, %v488_v7  ;;  %v544_v17 = vadd.f32 %v5420_v1, %v489_v8  ;;  %v439_v32 = vld [vmem:[%s5415_s11 + $0x40] sm:$0xff]  ;;  %v440_v36 = vld [vmem:[%s5415_s11 + $0x48] sm:$0xff]  ;;  %v441_v37 = vld [vmem:[%s5415_s11 + $0x50] sm:$0xff]  ;;  %s745_s30 = scalar_select %p414_p6, 1, 0 }
  0x1a   : > { %v735_v19 = vadd.f32 %v5420_v1, %v734_v11  ;;  %v741_v20 = vstv %s740_s19  ;;  %v545_v21 = vadd.f32 %v5420_v1, %v490_v12  ;;  %v547_v41 = vadd.f32 %v5420_v1, %v492_v18  ;;  %v442_v42 = vld [vmem:[%s5415_s11 + $0x58] sm:$0xff]  ;;  %v443_v47 = vld [vmem:[%s5415_s11 + $0x60] sm:$0xff]  ;;  %v444_v59 = vld [vmem:[%s5415_s11 + $0x68] sm:$0xff]  ;;  %s4459_s20 = sadd.s32 4294967295, %s430_s12 }
  0x1b   : > { %v546_v22 = vadd.f32 %v5420_v1, %v491_v13  ;;  %vm590_vm2 = vcmp.ge.f32.partialorder %v542_v15, 0.0  ;;  %v638_v23 = vmul.f32 0.3, %v542_v15  ;;  %vm5445_vm3 = vcmp.eq.s32.totalorder %v741_v20, 1  ;;  %v445_v60 = vld [vmem:[%s5415_s11 + $0x70] sm:$0xff]  ;;  %v446_v2 = vld [vmem:[%s5415_s11 + $0x78] sm:$0xff] }
  0x1c   : > { %vm591_vm4 = vcmp.ge.f32.partialorder %v543_v16, 0.0  ;;  %vm736_vm5 = vcmp.ge.f32.partialorder %v735_v19, 0.0  ;;  %v737_v27 = vmul.f32 0.3, %v735_v19  ;;  %v639_v28 = vmul.f32 0.3, %v543_v16 }
  0x1d   : > { %vm592_vm6 = vcmp.ge.f32.partialorder %v544_v17, 0.0  ;;  %v686_v29 = vsel %vm590_vm2, %v542_v15, %v638_v23  ;;  %v640_v30 = vmul.f32 0.3, %v544_v17  ;;  %vm593_vm7 = vcmp.ge.f32.partialorder %v545_v21, 0.0  ;;  %v447_v13 = vld [vmem:[%s5415_s11 + $0x80] sm:$0xff] }
  0x1e   : > { %v641_v31 = vmul.f32 0.3, %v545_v21  ;;  %v5452_v33 = vsel %vm736_vm5, %v735_v19, %v737_v27  ;;  %752 = vst.msk [vmem:[#allocation2 + $0x2] sm:$0xff] %vm751_vm1, %v686_v29  ;;  %v687_v34 = vsel %vm591_vm4, %v543_v16, %v639_v28  ;;  %vm594_vm8 = vcmp.ge.f32.partialorder %v546_v22, 0.0  ;;  %v448_v19 = vld [vmem:[%s5415_s11 + $0x88] sm:$0xff] }
  0x1f   : > { %v642_v35 = vmul.f32 0.3, %v546_v22  ;;  %v743_v38 = vsel %vm5445_vm3, %v5452_v33, 0.0  ;;  %753 = vst.msk [vmem:[#allocation2 + $0xa] sm:$0xff] %vm751_vm1, %v687_v34  ;;  %v688_v39 = vsel %vm592_vm6, %v544_v17, %v640_v30  ;;  %v493_v44 = vmul.f32 %v5410_v0, %v437_v25  ;;  %v449_v30 = vld [vmem:[%s5415_s11 + $0x90] sm:$0xff] }
  0x20   : > { %v689_v40 = vsel %vm593_vm7, %v545_v21, %v641_v31  ;;  %750 = vst.msk [vmem:[#allocation2] sm:$0x3] %vm749_vm0, %v743_v38  ;;  %v494_v45 = vmul.f32 %v5410_v0, %v438_v26  ;;  %v495_v46 = vmul.f32 %v5410_v0, %v439_v32  ;;  %vm595_vm9 = vcmp.ge.f32.partialorder %v547_v41, 0.0  ;;  %v450_v31 = vld [vmem:[%s5415_s11 + $0x98] sm:$0xff]  ;;  %v451_v32 = vld [vmem:[%s5415_s11 + $0xa0] sm:$0xff] }
  0x21   : > { %754 = vst.msk [vmem:[#allocation2 + $0x12] sm:$0xff] %vm751_vm1, %v688_v39  ;;  %755 = vst.msk [vmem:[#allocation2 + $0x1a] sm:$0xff] %vm751_vm1, %v689_v40  ;;  %v690_v43 = vsel %vm594_vm8, %v546_v22, %v642_v35  ;;  %v643_v48 = vmul.f32 0.3, %v547_v41  ;;  %v496_v49 = vmul.f32 %v5410_v0, %v440_v36  ;;  %v497_v50 = vmul.f32 %v5410_v0, %v441_v37  ;;  %v452_v37 = vld [vmem:[%s5415_s11 + $0xa8] sm:$0xff] }
  0x22   : > { %756 = vst.msk [vmem:[#allocation2 + $0x22] sm:$0xff] %vm751_vm1, %v690_v43  ;;  %v548_v51 = vadd.f32 %v5420_v1, %v493_v44  ;;  %v549_v52 = vadd.f32 %v5420_v1, %v494_v45  ;;  %v550_v53 = vadd.f32 %v5420_v1, %v495_v46  ;;  %v498_v54 = vmul.f32 %v5410_v0, %v442_v42 }
  0x23   : > { %v691_v55 = vsel %vm595_vm9, %v547_v41, %v643_v48  ;;  %v551_v56 = vadd.f32 %v5420_v1, %v496_v49  ;;  %v552_v57 = vadd.f32 %v5420_v1, %v497_v50  ;;  %v499_v58 = vmul.f32 %v5410_v0, %v443_v47  ;;  %v453_v47 = vld [vmem:[%s5415_s11 + $0xb0] sm:$0xff] }
  0x24   : > { %757 = vst.msk [vmem:[#allocation2 + $0x2a] sm:$0xff] %vm751_vm1, %v691_v55  ;;  %vm596_vm10 = vcmp.ge.f32.partialorder %v548_v51, 0.0  ;;  %v644_v61 = vmul.f32 0.3, %v548_v51  ;;  %vm597_vm11 = vcmp.ge.f32.partialorder %v549_v52, 0.0  ;;  %vm598_vm12 = vcmp.ge.f32.partialorder %v550_v53, 0.0 }
  0x25   : > { %v645_v62 = vmul.f32 0.3, %v549_v52  ;;  %v646_v63 = vmul.f32 0.3, %v550_v53  ;;  %vm599_vm13 = vcmp.ge.f32.partialorder %v551_v56, 0.0  ;;  %vm600_vm14 = vcmp.ge.f32.partialorder %v552_v57, 0.0 }
  0x26   : > { %v852_v3 = vld [vmem:[#allocation2 + $0x9] sm:$0xff]  ;;  %v692_v4 = vsel %vm596_vm10, %v548_v51, %v644_v61  ;;  %v647_v6 = vmul.f32 0.3, %v551_v56  ;;  %v648_v7 = vmul.f32 0.3, %v552_v57  ;;  %v553_v10 = vadd.f32 %v5420_v1, %v498_v54 }
  0x27   : > { %v693_v5 = vsel %vm597_vm11, %v549_v52, %v645_v62  ;;  %v851_v8 = vld [vmem:[#allocation2 + $0x1] sm:$0xff]  ;;  %1000 = vrot.lane.b32.xlu1 %v852_v3, %s5304_s24  ;;  %758 = vst.msk [vmem:[#allocation2 + $0x32] sm:$0xff] %vm751_vm1, %v692_v4  ;;  %v694_v9 = vsel %vm598_vm12, %v550_v53, %v646_v63  ;;  %v554_v11 = vadd.f32 %v5420_v1, %v499_v58  ;;  %v901_v14 = vld [vmem:[#allocation2 + $0xa] sm:$0xff] }
  0x28   : > { %759 = vst.msk [vmem:[#allocation2 + $0x3a] sm:$0xff] %vm751_vm1, %v693_v5  ;;  %v500_v12 = vmul.f32 %v5410_v0, %v444_v59  ;;  %998 = vrot.lane.b32.xlu0 %v851_v8, %s5304_s24  ;;  %760 = vst.msk [vmem:[#allocation2 + $0x42] sm:$0xff] %vm751_vm1, %v694_v9  ;;  %v695_v15 = vsel %vm599_vm13, %v551_v56, %v647_v6  ;;  %v696_v16 = vsel %vm600_vm14, %v552_v57, %v648_v7  ;;  %v900_v20 = vld [vmem:[#allocation2 + $0x2] sm:$0xff]  ;;  %v902_v34 = vld [vmem:[#allocation2 + $0x12] sm:$0xff] }
  0x29   : > { %v501_v17 = vmul.f32 %v5410_v0, %v445_v60  ;;  %v502_v18 = vmul.f32 %v5410_v0, %v446_v2  ;;  %761 = vst.msk [vmem:[#allocation2 + $0x4a] sm:$0xff] %vm751_vm1, %v695_v15  ;;  %762 = vst.msk [vmem:[#allocation2 + $0x52] sm:$0xff] %vm751_vm1, %v696_v16  ;;  %vm601_vm15 = vcmp.ge.f32.partialorder %v553_v10, 0.0  ;;  %v649_v21 = vmul.f32 0.3, %v553_v10  ;;  %v853_v38 = vld [vmem:[#allocation2 + $0x11] sm:$0xff] }
  0x2a   : > { %vm602_vm0 = vcmp.ge.f32.partialorder %v554_v11, 0.0  ;;  %v555_v22 = vadd.f32 %v5420_v1, %v500_v12  ;;  %v650_v23 = vmul.f32 0.3, %v554_v11  ;;  %v503_v26 = vmul.f32 %v5410_v0, %v447_v13  ;;  %v903_v51 = vld [vmem:[#allocation2 + $0x1a] sm:$0xff]  ;;  %v456_v4 = vld [vmem:[%s5415_s11 + $0xc8] sm:$0xff]  ;;  %v457_v5 = vld [vmem:[%s5415_s11 + $0xd0] sm:$0xff] }
  0x2b   : > { %v556_v24 = vadd.f32 %v5420_v1, %v501_v17  ;;  %v557_v25 = vadd.f32 %v5420_v1, %v502_v18  ;;  %1196 = vrot.lane.b32.xlu1 %v901_v14, %s5305_s25  ;;  %v697_v27 = vsel %vm601_vm15, %v553_v10, %v649_v21  ;;  %v504_v29 = vmul.f32 %v5410_v0, %v448_v19  ;;  %v854_v55 = vld [vmem:[#allocation2 + $0x19] sm:$0xff]  ;;  %v904_v6 = vld [vmem:[#allocation2 + $0x22] sm:$0xff] }
  0x2c   : > { %vm603_vm2 = vcmp.ge.f32.partialorder %v555_v22, 0.0  ;;  %v651_v28 = vmul.f32 0.3, %v555_v22  ;;  %1194 = vrot.lane.b32.xlu0 %v900_v20, %s5305_s25  ;;  %763 = vst.msk [vmem:[#allocation2 + $0x5a] sm:$0xff] %vm751_vm1, %v697_v27  ;;  %v698_v35 = vsel %vm602_vm0, %v554_v11, %v650_v23  ;;  %v558_v41 = vadd.f32 %v5420_v1, %v503_v26  ;;  %v454_v60 = vld [vmem:[%s5415_s11 + $0xb8] sm:$0xff]  ;;  %v455_v63 = vld [vmem:[%s5415_s11 + $0xc0] sm:$0xff] }
  0x2d   : > { %vm604_vm3 = vcmp.ge.f32.partialorder %v556_v24, 0.0  ;;  %v652_v36 = vmul.f32 0.3, %v556_v24  ;;  %vm605_vm4 = vcmp.ge.f32.partialorder %v557_v25, 0.0  ;;  %764 = vst.msk [vmem:[#allocation2 + $0x62] sm:$0xff] %vm751_vm1, %v698_v35  ;;  %v559_v42 = vadd.f32 %v5420_v1, %v504_v29  ;;  %v458_v11 = vld [vmem:[%s5415_s11 + $0xd8] sm:$0xff] }
  0x2e   : > { %v699_v39 = vsel %vm603_vm2, %v555_v22, %v651_v28  ;;  %v653_v40 = vmul.f32 0.3, %v557_v25  ;;  %v505_v44 = vmul.f32 %v5410_v0, %v449_v30  ;;  %v506_v45 = vmul.f32 %v5410_v0, %v450_v31  ;;  %v855_v12 = vld [vmem:[#allocation2 + $0x21] sm:$0xff]  ;;  %v856_v29 = vld [vmem:[#allocation2 + $0x29] sm:$0xff] }
  0x2f   : > { %765 = vst.msk [vmem:[#allocation2 + $0x6a] sm:$0xff] %vm751_vm1, %v699_v39  ;;  %v700_v43 = vsel %vm604_vm3, %v556_v24, %v652_v36  ;;  %v507_v46 = vmul.f32 %v5410_v0, %v451_v32  ;;  %1198 = vrot.lane.b32.xlu1 %v902_v34, %s5305_s25  ;;  %vm606_vm5 = vcmp.ge.f32.partialorder %v558_v41, 0.0  ;;  %v654_v49 = vmul.f32 0.3, %v558_v41  ;;  %v459_v16 = vld [vmem:[%s5415_s11 + $0xe0] sm:$0xff] }
  0x30   : > { %766 = vst.msk [vmem:[#allocation2 + $0x72] sm:$0xff] %vm751_vm1, %v700_v43  ;;  %v701_v48 = vsel %vm605_vm4, %v557_v25, %v653_v40  ;;  %v508_v50 = vmul.f32 %v5410_v0, %v452_v37  ;;  %1002 = vrot.lane.b32.xlu0 %v853_v38, %s5304_s24  ;;  %vm607_vm6 = vcmp.ge.f32.partialorder %v559_v42, 0.0  ;;  %v655_v52 = vmul.f32 0.3, %v559_v42  ;;  %v905_v25 = vld [vmem:[#allocation2 + $0x2a] sm:$0xff]  ;;  %v1440_v37 = vld [vmem:[%s6865_s2] sm:$0xff] }
  0x31   : > { %767 = vst.msk [vmem:[#allocation2 + $0x7a] sm:$0xff] %vm751_vm1, %v701_v48  ;;  %v560_v53 = vadd.f32 %v5420_v1, %v505_v44  ;;  %v561_v54 = vadd.f32 %v5420_v1, %v506_v45  ;;  %v702_v56 = vsel %vm606_vm5, %v558_v41, %v654_v49  ;;  %v562_v57 = vadd.f32 %v5420_v1, %v507_v46  ;;  %v1441_v38 = vld [vmem:[%s6865_s2 + $0x8] sm:$0xf]  ;;  %v461_v45 = vld [vmem:[%s5415_s11 + $0xf0] sm:$0xff] }
  0x32   : > { %v563_v58 = vadd.f32 %v5420_v1, %v508_v50  ;;  %v509_v59 = vmul.f32 %v5410_v0, %v453_v47  ;;  %768 = vst.msk [vmem:[#allocation2 + $0x82] sm:$0xff] %vm751_vm1, %v702_v56  ;;  %v703_v61 = vsel %vm607_vm6, %v559_v42, %v655_v52  ;;  %v510_v10 = vmul.f32 %v5410_v0, %v454_v60  ;;  %v460_v41 = vld [vmem:[%s5415_s11 + $0xe8] sm:$0xff]  ;;  %v906_v42 = vld [vmem:[#allocation2 + $0x32] sm:$0xff]  ;;  %v463_v52 = vld [vmem:[%s5415_s11 + $0x100] sm:$0xff] }
  0x33   : > { %vm608_vm7 = vcmp.ge.f32.partialorder %v560_v53, 0.0  ;;  %v656_v62 = vmul.f32 0.3, %v560_v53  ;;  %vm609_vm8 = vcmp.ge.f32.partialorder %v561_v54, 0.0  ;;  %1200 = vrot.lane.b32.xlu1 %v903_v51, %s5305_s25  ;;  %769 = vst.msk [vmem:[#allocation2 + $0x8a] sm:$0xff] %vm751_vm1, %v703_v61  ;;  %vm610_vm9 = vcmp.ge.f32.partialorder %v562_v57, 0.0 }
  0x34   : > { %v657_v2 = vmul.f32 0.3, %v561_v54  ;;  %vm611_vm10 = vcmp.ge.f32.partialorder %v563_v58, 0.0  ;;  %v564_v3 = vadd.f32 %v5420_v1, %v509_v59  ;;  %1004 = vrot.lane.b32.xlu0 %v854_v55, %s5304_s24  ;;  %v658_v8 = vmul.f32 0.3, %v562_v57  ;;  %v857_v46 = vld [vmem:[#allocation2 + $0x31] sm:$0xff] }
  0x35   : > { %v704_v7 = vsel %vm608_vm7, %v560_v53, %v656_v62  ;;  %v659_v9 = vmul.f32 0.3, %v563_v58  ;;  %v511_v15 = vmul.f32 %v5410_v0, %v455_v63  ;;  %v565_v19 = vadd.f32 %v5420_v1, %v510_v10  ;;  %v462_v51 = vld [vmem:[%s5415_s11 + $0xf8] sm:$0xff]  ;;  %v465_v55 = vld [vmem:[%s5415_s11 + $0x110] sm:$0xff]  ;;  %v467_v59 = vld [vmem:[%s5415_s11 + $0x120] sm:$0xff] }
  0x36   : > { %770 = vst.msk [vmem:[#allocation2 + $0x92] sm:$0xff] %vm751_vm1, %v704_v7  ;;  %v705_v13 = vsel %vm609_vm8, %v561_v54, %v657_v2  ;;  %vm612_vm11 = vcmp.ge.f32.partialorder %v564_v3, 0.0  ;;  %v660_v14 = vmul.f32 0.3, %v564_v3  ;;  %v706_v17 = vsel %vm610_vm9, %v562_v57, %v658_v8  ;;  %v464_v54 = vld [vmem:[%s5415_s11 + $0x108] sm:$0xff]  ;;  %v466_v56 = vld [vmem:[%s5415_s11 + $0x118] sm:$0xff] }
  0x37   : > { %771 = vst.msk [vmem:[#allocation2 + $0x9a] sm:$0xff] %vm751_vm1, %v705_v13  ;;  %v707_v18 = vsel %vm611_vm10, %v563_v58, %v659_v9  ;;  %v512_v20 = vmul.f32 %v5410_v0, %v456_v4  ;;  %1202 = vrot.lane.b32.xlu1 %v904_v6, %s5305_s25  ;;  %772 = vst.msk [vmem:[#allocation2 + $0xa2] sm:$0xff] %vm751_vm1, %v706_v17  ;;  %v566_v22 = vadd.f32 %v5420_v1, %v511_v15  ;;  %v5306_v49 = vmov 0.0|0.0   ;;  %v907_v60 = vld [vmem:[#allocation2 + $0x3a] sm:$0xff]  ;;  %v908_v15 = vld [vmem:[#allocation2 + $0x42] sm:$0xff] }
  0x38   : > { %773 = vst.msk [vmem:[#allocation2 + $0xaa] sm:$0xff] %vm751_vm1, %v707_v18  ;;  %v708_v21 = vsel %vm612_vm11, %v564_v3, %v660_v14  ;;  %v513_v23 = vmul.f32 %v5410_v0, %v457_v5  ;;  %v514_v24 = vmul.f32 %v5410_v0, %v458_v11  ;;  %1006 = vrot.lane.b32.xlu0 %v855_v12, %s5304_s24  ;;  %vm613_vm12 = vcmp.ge.f32.partialorder %v565_v19, 0.0  ;;  %v858_v3 = vld [vmem:[#allocation2 + $0x39] sm:$0xff]  ;;  %v859_v18 = vld [vmem:[#allocation2 + $0x41] sm:$0xff] }
  0x39   : > { %774 = vst.msk [vmem:[#allocation2 + $0xb2] sm:$0xff] %vm751_vm1, %v708_v21  ;;  %v661_v26 = vmul.f32 0.3, %v565_v19  ;;  %v567_v27 = vadd.f32 %v5420_v1, %v512_v20  ;;  %v515_v28 = vmul.f32 %v5410_v0, %v459_v16  ;;  %vm614_vm13 = vcmp.ge.f32.partialorder %v566_v22, 0.0  ;;  %5015 = vmatprep.subr.bf16.mxu0 %v5306_v49  ;;  %v468_v21 = vld [vmem:[%s5415_s11 + $0x128] sm:$0xff] }
  0x3a   : > { %v662_v30 = vmul.f32 0.3, %v566_v22  ;;  %v568_v31 = vadd.f32 %v5420_v1, %v513_v23  ;;  %v569_v32 = vadd.f32 %v5420_v1, %v514_v24  ;;  %vm1597_vm3 = vcmask 1043456  }
  0x3b   : > { %v709_v34 = vsel %vm613_vm12, %v565_v19, %v661_v26  ;;  %vm615_vm14 = vcmp.ge.f32.partialorder %v567_v27, 0.0  ;;  %v663_v35 = vmul.f32 0.3, %v567_v27  ;;  %v570_v36 = vadd.f32 %v5420_v1, %v515_v28  ;;  %1204 = vrot.lane.b32.xlu1 %v905_v25, %s5305_s25  ;;  %v469_v26 = vld [vmem:[%s5415_s11 + $0x130] sm:$0xff] }
  0x3c   : > { %775 = vst.msk [vmem:[#allocation2 + $0xba] sm:$0xff] %vm751_vm1, %v709_v34  ;;  %v710_v39 = vsel %vm614_vm13, %v566_v22, %v662_v30  ;;  %vm616_vm15 = vcmp.ge.f32.partialorder %v568_v31, 0.0  ;;  %v664_v40 = vmul.f32 0.3, %v568_v31  ;;  %vm617_vm0 = vcmp.ge.f32.partialorder %v569_v32, 0.0  ;;  %1008 = vrot.lane.b32.xlu0 %v856_v29, %s5304_s24  ;;  %v471_v30 = vld [vmem:[%s5415_s11 + $0x140] sm:$0xff] }
  0x3d   : > { %776 = vst.msk [vmem:[#allocation2 + $0xc2] sm:$0xff] %vm751_vm1, %v710_v39  ;;  %v711_v43 = vsel %vm615_vm14, %v567_v27, %v663_v35  ;;  %v665_v44 = vmul.f32 0.3, %v569_v32  ;;  %vm618_vm2 = vcmp.ge.f32.partialorder %v570_v36, 0.0  ;;  %v666_v48 = vmul.f32 0.3, %v570_v36 }
  0x3e   : > { %777 = vst.msk [vmem:[#allocation2 + $0xca] sm:$0xff] %vm751_vm1, %v711_v43  ;;  %v712_v47 = vsel %vm616_vm15, %v568_v31, %v664_v40  ;;  %v5016_v50 = vpack.c.bf16 %v1441_v38, %v1440_v37  ;;  %v516_v58 = vmul.f32 %v5410_v0, %v460_v41  ;;  %vm5307_vm4 = vmmov 1   ;;  %v470_v27 = vld [vmem:[%s5415_s11 + $0x138] sm:$0xff]  ;;  %v472_v31 = vld [vmem:[%s5415_s11 + $0x148] sm:$0xff]  ;;  %v473_v37 = vld [vmem:[%s5415_s11 + $0x150] sm:$0xff] }
  0x3f   : > { %778 = vst.msk [vmem:[#allocation2 + $0xd2] sm:$0xff] %vm751_vm1, %v712_v47  ;;  %v713_v53 = vsel %vm617_vm0, %v569_v32, %v665_v44  ;;  %1206 = vrot.lane.b32.xlu1 %v906_v42, %s5305_s25  ;;  %v714_v57 = vsel %vm618_vm2, %v570_v36, %v666_v48  ;;  %vm5017_vm5 = vmpackc.low %vm1597_vm3, %vm5307_vm4  ;;  %vm5308_vm6 = vmmov 0   ;;  %v5309_v61 = vmov 0.0   ;;  %v909_v32 = vld [vmem:[#allocation2 + $0x4a] sm:$0xff]  ;;  %v474_v43 = vld [vmem:[%s5415_s11 + $0x158] sm:$0xff] }
  0x40   : > { %779 = vst.msk [vmem:[#allocation2 + $0xda] sm:$0xff] %vm751_vm1, %v713_v53  ;;  %1010 = vrot.lane.b32.xlu0 %v857_v46, %s5304_s24  ;;  %780 = vst.msk [vmem:[#allocation2 + $0xe2] sm:$0xff] %vm751_vm1, %v714_v57  ;;  %4716 = vmatprep.mubr.msk.f32.mxu0 %vm5308_vm6, %v5309_v61  ;;  %v517_v62 = vmul.f32 %v5410_v0, %v461_v45  ;;  %v518_v63 = vmul.f32 %v5410_v0, %v462_v51  ;;  %v860_v38 = vld [vmem:[#allocation2 + $0x49] sm:$0xff]  ;;  %v475_v57 = vld [vmem:[%s5415_s11 + $0x160] sm:$0xff] }
  0x41   : > { %v519_v2 = vmul.f32 %v5410_v0, %v463_v52  ;;  %5018 = vmatpush3.bf16.msk.msra.mxu0 %vm5017_vm5, %v5016_v50  ;;  %v571_v4 = vadd.f32 %v5420_v1, %v516_v58  ;;  %v520_v5 = vmul.f32 %v5410_v0, %v464_v54  ;;  %v521_v6 = vmul.f32 %v5410_v0, %v465_v55  ;;  %v910_v52 = vld [vmem:[#allocation2 + $0x52] sm:$0xff] }
  0x42   : > { %v522_v7 = vmul.f32 %v5410_v0, %v466_v56  ;;  %v572_v8 = vadd.f32 %v5420_v1, %v517_v62  ;;  %v573_v9 = vadd.f32 %v5420_v1, %v518_v63  ;;  %v523_v11 = vmul.f32 %v5410_v0, %v467_v59  ;;  %v861_v58 = vld [vmem:[#allocation2 + $0x51] sm:$0xff] }
  0x43   : > { %v574_v10 = vadd.f32 %v5420_v1, %v519_v2  ;;  %1208 = vrot.lane.b32.xlu1 %v907_v60, %s5305_s25  ;;  %vm619_vm7 = vcmp.ge.f32.partialorder %v571_v4, 0.0  ;;  %v667_v12 = vmul.f32 0.3, %v571_v4  ;;  %v575_v13 = vadd.f32 %v5420_v1, %v520_v5 }
  0x44   : > { %v576_v14 = vadd.f32 %v5420_v1, %v521_v6  ;;  %1012 = vrot.lane.b32.xlu0 %v858_v3, %s5304_s24  ;;  %vm620_vm8 = vcmp.ge.f32.partialorder %v572_v8, 0.0  ;;  %v668_v16 = vmul.f32 0.3, %v572_v8  ;;  %vm621_vm9 = vcmp.ge.f32.partialorder %v573_v9, 0.0  ;;  %v911_v6 = vld [vmem:[#allocation2 + $0x5a] sm:$0xff] }
  0x45   : > { %v577_v17 = vadd.f32 %v5420_v1, %v522_v7  ;;  %v715_v19 = vsel %vm619_vm7, %v571_v4, %v667_v12  ;;  %v669_v20 = vmul.f32 0.3, %v573_v9  ;;  %vm622_vm10 = vcmp.ge.f32.partialorder %v574_v10, 0.0 }
  0x46   : > { %vm623_vm11 = vcmp.ge.f32.partialorder %v575_v13, 0.0  ;;  %781 = vst.msk [vmem:[#allocation2 + $0xea] sm:$0xff] %vm751_vm1, %v715_v19  ;;  %v716_v22 = vsel %vm620_vm8, %v572_v8, %v668_v16  ;;  %v670_v23 = vmul.f32 0.3, %v574_v10  ;;  %v671_v24 = vmul.f32 0.3, %v575_v13 }
  0x47   : > { %v578_v25 = vadd.f32 %v5420_v1, %v523_v11  ;;  %1210 = vrot.lane.b32.xlu1 %v908_v15, %s5305_s25  ;;  %782 = vst.msk [vmem:[#allocation2 + $0xf2] sm:$0xff] %vm751_vm1, %v716_v22  ;;  %v717_v28 = vsel %vm621_vm9, %v573_v9, %v669_v20  ;;  %vm624_vm12 = vcmp.ge.f32.partialorder %v576_v14, 0.0  ;;  %v672_v29 = vmul.f32 0.3, %v576_v14  ;;  %v862_v9 = vld [vmem:[#allocation2 + $0x59] sm:$0xff]  ;;  %v477_v22 = vld [vmem:[%s5415_s11 + $0x170] sm:$0xff] }
  0x48   : > { %vm625_vm13 = vcmp.ge.f32.partialorder %v577_v17, 0.0  ;;  %1014 = vrot.lane.b32.xlu0 %v859_v18, %s5304_s24  ;;  %783 = vst.msk [vmem:[#allocation2 + $0xfa] sm:$0xff] %vm751_vm1, %v717_v28  ;;  %v718_v34 = vsel %vm622_vm10, %v574_v10, %v670_v23  ;;  %v719_v35 = vsel %vm623_vm11, %v575_v13, %v671_v24  ;;  %v673_v36 = vmul.f32 0.3, %v577_v17  ;;  %v912_v18 = vld [vmem:[#allocation2 + $0x62] sm:$0xff]  ;;  %v478_v28 = vld [vmem:[%s5415_s11 + $0x178] sm:$0xff] }
  0x49   : > { %vm626_vm14 = vcmp.ge.f32.partialorder %v578_v25, 0.0  ;;  %784 = vst.msk [vmem:[#allocation2 + $0x102] sm:$0xff] %vm751_vm1, %v718_v34  ;;  %785 = vst.msk [vmem:[#allocation2 + $0x10a] sm:$0xff] %vm751_vm1, %v719_v35  ;;  %v720_v39 = vsel %vm624_vm12, %v576_v14, %v672_v29  ;;  %v674_v40 = vmul.f32 0.3, %v578_v25  ;;  %v524_v41 = vmul.f32 %v5410_v0, %v468_v21  ;;  %v863_v23 = vld [vmem:[#allocation2 + $0x61] sm:$0xff] }
  0x4a   : > { %v525_v42 = vmul.f32 %v5410_v0, %v469_v26  ;;  %786 = vst.msk [vmem:[#allocation2 + $0x112] sm:$0xff] %vm751_vm1, %v720_v39  ;;  %v721_v44 = vsel %vm625_vm13, %v577_v17, %v673_v36  ;;  %v526_v45 = vmul.f32 %v5410_v0, %v470_v27  ;;  %v527_v46 = vmul.f32 %v5410_v0, %v471_v30  ;;  %v476_v17 = vld [vmem:[%s5415_s11 + $0x168] sm:$0xff] }
  0x4b   : > { %v528_v47 = vmul.f32 %v5410_v0, %v472_v31  ;;  %1212 = vrot.lane.b32.xlu1 %v909_v32, %s5305_s25  ;;  %787 = vst.msk [vmem:[#allocation2 + $0x11a] sm:$0xff] %vm751_vm1, %v721_v44  ;;  %v722_v48 = vsel %vm626_vm14, %v578_v25, %v674_v40  ;;  %v579_v49 = vadd.f32 %v5420_v1, %v524_v41  ;;  %v913_v29 = vld [vmem:[#allocation2 + $0x6a] sm:$0xff]  ;;  %v746_v41 = vstv %s745_s30  ;;  %v916_v44 = vld [vmem:[#allocation2 + $0x82] sm:$0xff] }
  0x4c   : > { %v580_v50 = vadd.f32 %v5420_v1, %v525_v42  ;;  %v529_v51 = vmul.f32 %v5410_v0, %v473_v37  ;;  %1016 = vrot.lane.b32.xlu0 %v860_v38, %s5304_s24  ;;  %788 = vst.msk [vmem:[#allocation2 + $0x122] sm:$0xff] %vm751_vm1, %v722_v48  ;;  %v581_v53 = vadd.f32 %v5420_v1, %v526_v45  ;;  %v864_v32 = vld [vmem:[#allocation2 + $0x69] sm:$0xff]  ;;  %v914_v38 = vld [vmem:[#allocation2 + $0x72] sm:$0xff]  ;;  %vm747_vm13 = vcmp.eq.s32.totalorder %v746_v41, 1  ;;  %v867_v45 = vld [vmem:[#allocation2 + $0x81] sm:$0xff] }
  0x4d   : > { %v582_v54 = vadd.f32 %v5420_v1, %v527_v46  ;;  %v583_v55 = vadd.f32 %v5420_v1, %v528_v47  ;;  %v530_v56 = vmul.f32 %v5410_v0, %v474_v43  ;;  %vm627_vm15 = vcmp.ge.f32.partialorder %v579_v49, 0.0  ;;  %v865_v40 = vld [vmem:[#allocation2 + $0x71] sm:$0xff]  ;;  %v866_v42 = vld [vmem:[#allocation2 + $0x79] sm:$0xff]  ;;  %v868_v47 = vld [vmem:[#allocation2 + $0x89] sm:$0xff] }
  0x4e   : > { %v675_v59 = vmul.f32 0.3, %v579_v49  ;;  %vm628_vm0 = vcmp.ge.f32.partialorder %v580_v50, 0.0  ;;  %v584_v60 = vadd.f32 %v5420_v1, %v529_v51  ;;  %v676_v62 = vmul.f32 0.3, %v580_v50  ;;  %v917_v46 = vld [vmem:[#allocation2 + $0x8a] sm:$0xff] }
  0x4f   : > { %vm629_vm2 = vcmp.ge.f32.partialorder %v581_v53, 0.0  ;;  %vm630_vm4 = vcmp.ge.f32.partialorder %v582_v54, 0.0  ;;  %v585_v63 = vadd.f32 %v5420_v1, %v530_v56  ;;  %1214 = vrot.lane.b32.xlu1 %v910_v52, %s5305_s25  ;;  %v677_v3 = vmul.f32 0.3, %v581_v53  ;;  %v918_v48 = vld [vmem:[#allocation2 + $0x92] sm:$0xff]  ;;  %v920_v51 = vld [vmem:[#allocation2 + $0xa2] sm:$0xff] }
  0x50   : > { %v723_v2 = vsel %vm627_vm15, %v579_v49, %v675_v59  ;;  %v678_v4 = vmul.f32 0.3, %v582_v54  ;;  %v531_v5 = vmul.f32 %v5410_v0, %v475_v57  ;;  %1018 = vrot.lane.b32.xlu0 %v861_v58, %s5304_s24  ;;  %v724_v7 = vsel %vm628_vm0, %v580_v50, %v676_v62  ;;  %v919_v49 = vld [vmem:[#allocation2 + $0x9a] sm:$0xff]  ;;  %v873_v56 = vld [vmem:[#allocation2 + $0xb1] sm:$0xff]  ;;  %v924_v59 = vld [vmem:[#allocation2 + $0xc2] sm:$0xff] }
  0x51   : > { %789 = vst.msk [vmem:[#allocation2 + $0x12a] sm:$0xff] %vm751_vm1, %v723_v2  ;;  %vm631_vm5 = vcmp.ge.f32.partialorder %v583_v55, 0.0  ;;  %v679_v8 = vmul.f32 0.3, %v583_v55  ;;  %790 = vst.msk [vmem:[#allocation2 + $0x132] sm:$0xff] %vm751_vm1, %v724_v7  ;;  %v725_v10 = vsel %vm629_vm2, %v581_v53, %v677_v3  ;;  %vm632_vm7 = vcmp.ge.f32.partialorder %v584_v60, 0.0 }
  0x52   : > { %v726_v11 = vsel %vm630_vm4, %v582_v54, %v678_v4  ;;  %v680_v12 = vmul.f32 0.3, %v584_v60  ;;  %791 = vst.msk [vmem:[#allocation2 + $0x13a] sm:$0xff] %vm751_vm1, %v725_v10  ;;  %vm633_vm8 = vcmp.ge.f32.partialorder %v585_v63, 0.0  ;;  %v681_v14 = vmul.f32 0.3, %v585_v63 }
  0x53   : > { %792 = vst.msk [vmem:[#allocation2 + $0x142] sm:$0xff] %vm751_vm1, %v726_v11  ;;  %v727_v13 = vsel %vm631_vm5, %v583_v55, %v679_v8  ;;  %v586_v15 = vadd.f32 %v5420_v1, %v531_v5  ;;  %1216 = vrot.lane.b32.xlu1 %v911_v6, %s5305_s25  ;;  %v532_v21 = vmul.f32 %v5410_v0, %v476_v17  ;;  %v748_v43 = vsel %vm747_vm13, %v5452_v33, 0.0  ;;  %v869_v33 = vld [vmem:[#allocation2 + $0x91] sm:$0xff]  ;;  %v870_v50 = vld [vmem:[#allocation2 + $0x99] sm:$0xff]  ;;  %v871_v52 = vld [vmem:[#allocation2 + $0xa1] sm:$0xff] }
  0x54   : > { %793 = vst.msk [vmem:[#allocation2 + $0x14a] sm:$0xff] %vm751_vm1, %v727_v13  ;;  %v728_v16 = vsel %vm632_vm7, %v584_v60, %v680_v12  ;;  %1020 = vrot.lane.b32.xlu0 %v862_v9, %s5304_s24  ;;  %v729_v19 = vsel %vm633_vm8, %v585_v63, %v681_v14  ;;  %v533_v24 = vmul.f32 %v5410_v0, %v477_v22  ;;  %vm800_vm14 = vcmask 27650   ;;  %v921_v53 = vld [vmem:[#allocation2 + $0xaa] sm:$0xff]  ;;  %v922_v55 = vld [vmem:[#allocation2 + $0xb2] sm:$0xff]  ;;  %v923_v57 = vld [vmem:[#allocation2 + $0xba] sm:$0xff] }
  0x55   : > { %794 = vst.msk [vmem:[#allocation2 + $0x152] sm:$0xff] %vm751_vm1, %v728_v16  ;;  %vm634_vm9 = vcmp.ge.f32.partialorder %v586_v15, 0.0  ;;  %v682_v20 = vmul.f32 0.3, %v586_v15  ;;  %795 = vst.msk [vmem:[#allocation2 + $0x15a] sm:$0xff] %vm751_vm1, %v729_v19  ;;  %v587_v26 = vadd.f32 %v5420_v1, %v532_v21  ;;  %v534_v31 = vmul.f32 %v5410_v0, %v478_v28  ;;  %v872_v54 = vld [vmem:[#allocation2 + $0xa9] sm:$0xff] }
  0x56   : > { %v588_v27 = vadd.f32 %v5420_v1, %v533_v24  ;;  %801 = vst.msk [vmem:[#allocation2 + $0x180] sm:$0xc] %vm800_vm14, %v748_v43  ;;  %v874_v58 = vld [vmem:[#allocation2 + $0xb9] sm:$0xff]  ;;  %v875_v60 = vld [vmem:[#allocation2 + $0xc1] sm:$0xff]  ;;  %v925_v62 = vld [vmem:[#allocation2 + $0xca] sm:$0xff]  ;;  %vm1390_vm15 = vcmask 64512  }
  0x57   : > { %v730_v25 = vsel %vm634_vm9, %v586_v15, %v682_v20  ;;  %1218 = vrot.lane.b32.xlu1 %v912_v18, %s5305_s25  ;;  %vm635_vm10 = vcmp.ge.f32.partialorder %v587_v26, 0.0  ;;  %v683_v30 = vmul.f32 0.3, %v587_v26  ;;  %v589_v36 = vadd.f32 %v5420_v1, %v534_v31  ;;  %v915_v1 = vld [vmem:[#allocation2 + $0x7a] sm:$0xff]  ;;  %v876_v63 = vld [vmem:[#allocation2 + $0xc9] sm:$0xff]  ;;  %v926_v2 = vld [vmem:[#allocation2 + $0xd2] sm:$0xff] }
  0x58   : > { %796 = vst.msk [vmem:[#allocation2 + $0x162] sm:$0xff] %vm751_vm1, %v730_v25  ;;  %1022 = vrot.lane.b32.xlu0 %v863_v23, %s5304_s24  ;;  %vm636_vm11 = vcmp.ge.f32.partialorder %v588_v27, 0.0  ;;  %v684_v34 = vmul.f32 0.3, %v588_v27  ;;  %v877_v3 = vld [vmem:[#allocation2 + $0xd1] sm:$0xff]  ;;  %v927_v4 = vld [vmem:[#allocation2 + $0xda] sm:$0xff] }
  0x59   : > { %v731_v35 = vsel %vm635_vm10, %v587_v26, %v683_v30  ;;  %v685_v39 = vmul.f32 0.3, %v589_v36  ;;  %vm637_vm12 = vcmp.ge.f32.partialorder %v589_v36, 0.0  ;;  %v878_v5 = vld [vmem:[#allocation2 + $0xd9] sm:$0xff]  ;;  %v928_v6 = vld [vmem:[#allocation2 + $0xe2] sm:$0xff]  ;;  %v929_v8 = vld [vmem:[#allocation2 + $0xea] sm:$0xff] }
  0x5a   : > { %797 = vst.msk [vmem:[#allocation2 + $0x16a] sm:$0xff] %vm751_vm1, %v731_v35  ;;  %v732_v37 = vsel %vm636_vm11, %v588_v27, %v684_v34  ;;  %v879_v7 = vld [vmem:[#allocation2 + $0xe1] sm:$0xff]  ;;  %v880_v10 = vld [vmem:[#allocation2 + $0xe9] sm:$0xff]  ;;  %v930_v13 = vld [vmem:[#allocation2 + $0xf2] sm:$0xff]  ;;  %vm1449_vm0 = vcmask 97280  }
  0x5b   : > { %1220 = vrot.lane.b32.xlu1 %v913_v29, %s5305_s25  ;;  %798 = vst.msk [vmem:[#allocation2 + $0x172] sm:$0xff] %vm751_vm1, %v732_v37  ;;  %v733_v0 = vsel %vm637_vm12, %v589_v36, %v685_v39  ;;  %v802_v12 = vld [vmem:[#allocation2] sm:$0xff]  ;;  %v803_v14 = vld [vmem:[#allocation2 + $0x8] sm:$0xff]  ;;  %v881_v16 = vld [vmem:[#allocation2 + $0xf1] sm:$0xff] }
  0x5c   : > { %1024 = vrot.lane.b32.xlu0 %v864_v32, %s5304_s24  ;;  %799 = vst.msk [vmem:[#allocation2 + $0x17a] sm:$0xff] %vm751_vm1, %v733_v0  ;;  %v804_v21 = vld [vmem:[#allocation2 + $0x10] sm:$0xff]  ;;  %v931_v22 = vld [vmem:[#allocation2 + $0xfa] sm:$0xff]  ;;  %v932_v29 = vld [vmem:[#allocation2 + $0x102] sm:$0xff] }
  0x5d   : > { %v882_v24 = vld [vmem:[#allocation2 + $0xf9] sm:$0xff]  ;;  %v883_v32 = vld [vmem:[#allocation2 + $0x101] sm:$0xff]  ;;  %v933_v37 = vld [vmem:[#allocation2 + $0x10a] sm:$0xff] }
  0x5e   : > { %v805_v28 = vld [vmem:[#allocation2 + $0x18] sm:$0xff]  ;;  %v806_v36 = vld [vmem:[#allocation2 + $0x20] sm:$0xff]  ;;  %v807_v41 = vld [vmem:[#allocation2 + $0x28] sm:$0xff] }
  0x5f   : > { %1222 = vrot.lane.b32.xlu1 %v914_v38, %s5305_s25 }
  0x60   : > { %1026 = vrot.lane.b32.xlu0 %v865_v40, %s5304_s24  ;;  %v884_v40 = vld [vmem:[#allocation2 + $0x109] sm:$0xff] }
  0x63   : > { %1224 = vrot.lane.b32.xlu1 %v915_v1, %s5305_s25 }
  0x64   : > { %1028 = vrot.lane.b32.xlu0 %v866_v42, %s5304_s24  ;;  %v934_v42 = vld [vmem:[#allocation2 + $0x112] sm:$0xff] }
  0x67   : > { %1226 = vrot.lane.b32.xlu1 %v916_v44, %s5305_s25 }
  0x68   : > { %1030 = vrot.lane.b32.xlu0 %v867_v45, %s5304_s24  ;;  %v885_v45 = vld [vmem:[#allocation2 + $0x111] sm:$0xff] }
  0x6b   : > { %1228 = vrot.lane.b32.xlu1 %v917_v46, %s5305_s25 }
  0x6c   : > { %1032 = vrot.lane.b32.xlu0 %v868_v47, %s5304_s24 }
  0x6f   : > { %1230 = vrot.lane.b32.xlu1 %v918_v48, %s5305_s25  ;;  %v808_v48 = vld [vmem:[#allocation2 + $0x30] sm:$0xff] }
  0x70   : > { %1034 = vrot.lane.b32.xlu0 %v869_v33, %s5304_s24  ;;  %v935_v33 = vld [vmem:[#allocation2 + $0x11a] sm:$0xff] }
  0x73   : > { %1232 = vrot.lane.b32.xlu1 %v919_v49, %s5305_s25 }
  0x74   : > { %1036 = vrot.lane.b32.xlu0 %v870_v50, %s5304_s24 }
  0x77   : > { %1234 = vrot.lane.b32.xlu1 %v920_v51, %s5305_s25  ;;  %v886_v51 = vld [vmem:[#allocation2 + $0x119] sm:$0xff] }
  0x78   : > { %1038 = vrot.lane.b32.xlu0 %v871_v52, %s5304_s24 }
  0x7b   : > { %1236 = vrot.lane.b32.xlu1 %v921_v53, %s5305_s25 }
  0x7c   : > { %1040 = vrot.lane.b32.xlu0 %v872_v54, %s5304_s24  ;;  %v809_v54 = vld [vmem:[#allocation2 + $0x38] sm:$0xff] }
  0x7f   : > { %1238 = vrot.lane.b32.xlu1 %v922_v55, %s5305_s25  ;;  %v936_v55 = vld [vmem:[#allocation2 + $0x122] sm:$0xff] }
  0x80   : > { %1042 = vrot.lane.b32.xlu0 %v873_v56, %s5304_s24 }
  0x83   : > { %1240 = vrot.lane.b32.xlu1 %v923_v57, %s5305_s25 }
  0x84   : > { %1044 = vrot.lane.b32.xlu0 %v874_v58, %s5304_s24  ;;  %v887_v58 = vld [vmem:[#allocation2 + $0x121] sm:$0xff] }
  0x87   : > { %1242 = vrot.lane.b32.xlu1 %v924_v59, %s5305_s25 }
  0x88   : > { %1046 = vrot.lane.b32.xlu0 %v875_v60, %s5304_s24 }
  0x8b   : > { %1244 = vrot.lane.b32.xlu1 %v925_v62, %s5305_s25  ;;  %v810_v62 = vld [vmem:[#allocation2 + $0x40] sm:$0xff] }
  0x8c   : > { %1048 = vrot.lane.b32.xlu0 %v876_v63, %s5304_s24  ;;  %v937_v63 = vld [vmem:[#allocation2 + $0x12a] sm:$0xff] }
  0x8f   : > { %1246 = vrot.lane.b32.xlu1 %v926_v2, %s5305_s25 }
  0x90   : > { %1050 = vrot.lane.b32.xlu0 %v877_v3, %s5304_s24 }
  0x93   : > { %1248 = vrot.lane.b32.xlu1 %v927_v4, %s5305_s25  ;;  %v888_v4 = vld [vmem:[#allocation2 + $0x129] sm:$0xff] }
  0x94   : > { %1052 = vrot.lane.b32.xlu0 %v878_v5, %s5304_s24 }
  0x97   : > { %1250 = vrot.lane.b32.xlu1 %v928_v6, %s5305_s25 }
  0x98   : > { %1054 = vrot.lane.b32.xlu0 %v879_v7, %s5304_s24  ;;  %v811_v7 = vld [vmem:[#allocation2 + $0x48] sm:$0xff] }
  0x99   : > { %v1001_v9 = vpop.permute.xlu1 %1000 }
  0x9a   : > { %v999_v11 = vpop.permute.xlu0 %998  ;;  %v1342_v20 = vsel %vm751_vm1, %v803_v14, %v1001_v9  ;;  %v812_v14 = vld [vmem:[#allocation2 + $0x50] sm:$0xff] }
  0x9b   : > { %1252 = vrot.lane.b32.xlu1 %v929_v8, %s5305_s25  ;;  %v1341_v17 = vsel %vm751_vm1, %v802_v12, %v999_v11  ;;  %v938_v8 = vld [vmem:[#allocation2 + $0x132] sm:$0xff] }
  0x9c   : > { %1056 = vrot.lane.b32.xlu0 %v880_v10, %s5304_s24  ;;  %v889_v11 = vld [vmem:[#allocation2 + $0x131] sm:$0xff] }
  0x9d   : > { %v1197_v15 = vpop.permute.xlu1 %1196 }
  0x9e   : > { %v1195_v18 = vpop.permute.xlu0 %1194  ;;  %v1392_v26 = vsel %vm1390_vm15, %v1342_v20, %v1197_v15  ;;  %v939_v15 = vld [vmem:[#allocation2 + $0x13a] sm:$0xff] }
  0x9f   : > { %v1391_v19 = vsel %vm1390_vm15, %v1341_v17, %v1195_v18  ;;  %1254 = vrot.lane.b32.xlu1 %v930_v13, %s5305_s25  ;;  %v890_v18 = vld [vmem:[#allocation2 + $0x139] sm:$0xff] }
  0xa0   : > { %4717 = vmatmul.mubr.msk.f32.vlgmr.msra.gmra.mrb[0].mxu0 %vm1449_vm0, %v1391_v19  ;;  %1058 = vrot.lane.b32.xlu0 %v881_v16, %s5304_s24 }
  0xa1   : > { %4719 = vmatprep.mubr.msk.f32.mxu0 %vm5308_vm6, %v5309_v61  ;;  %v1199_v23 = vpop.permute.xlu1 %1198 }
  0xa2   : > { %v1003_v25 = vpop.permute.xlu0 %1002 }
  0xa3   : > { %v1343_v27 = vsel %vm751_vm1, %v804_v21, %v1003_v25  ;;  %1256 = vrot.lane.b32.xlu1 %v931_v22, %s5305_s25  ;;  %v813_v21 = vld [vmem:[#allocation2 + $0x58] sm:$0xff]  ;;  %v940_v22 = vld [vmem:[#allocation2 + $0x142] sm:$0xff] }
  0xa4   : > { %4720 = vmatmul.mubr.msk.f32.gmra.mrb[2].mxu0 %vm1449_vm0, %v1392_v26  ;;  %1060 = vrot.lane.b32.xlu0 %v882_v24, %s5304_s24  ;;  %v1393_v30 = vsel %vm1390_vm15, %v1343_v27, %v1199_v23  ;;  %v891_v25 = vld [vmem:[#allocation2 + $0x141] sm:$0xff] }
  0xa5   : > { %4722 = vmatprep.mubr.msk.f32.mxu0 %vm5308_vm6, %v5309_v61  ;;  %v1201_v31 = vpop.permute.xlu1 %1200 }
  0xa6   : > { %v1005_v34 = vpop.permute.xlu0 %1004 }
  0xa7   : > { %v1344_v35 = vsel %vm751_vm1, %v805_v28, %v1005_v34  ;;  %1258 = vrot.lane.b32.xlu1 %v932_v29, %s5305_s25  ;;  %v814_v28 = vld [vmem:[#allocation2 + $0x60] sm:$0xff]  ;;  %v941_v29 = vld [vmem:[#allocation2 + $0x14a] sm:$0xff] }
  0xa8   : > { %4723 = vmatmul.mubr.msk.f32.gmra.mrb[4].mxu0 %vm1449_vm0, %v1393_v30  ;;  %1062 = vrot.lane.b32.xlu0 %v883_v32, %s5304_s24  ;;  %v1394_v38 = vsel %vm1390_vm15, %v1344_v35, %v1201_v31  ;;  %v892_v32 = vld [vmem:[#allocation2 + $0x149] sm:$0xff] }
  0xa9   : > { %4725 = vmatprep.mubr.msk.f32.mxu0 %vm5308_vm6, %v5309_v61  ;;  %v1203_v39 = vpop.permute.xlu1 %1202 }
  0xaa   : > { %v1007_v0 = vpop.permute.xlu0 %1006 }
  0xab   : > { %v1345_v1 = vsel %vm751_vm1, %v806_v36, %v1007_v0  ;;  %1260 = vrot.lane.b32.xlu1 %v933_v37, %s5305_s25  ;;  %v815_v36 = vld [vmem:[#allocation2 + $0x68] sm:$0xff]  ;;  %v942_v37 = vld [vmem:[#allocation2 + $0x152] sm:$0xff] }
  0xac   : > { %4726 = vmatmul.mubr.msk.f32.gmra.mrb[6].mxu0 %vm1449_vm0, %v1394_v38  ;;  %1064 = vrot.lane.b32.xlu0 %v884_v40, %s5304_s24  ;;  %v1395_v43 = vsel %vm1390_vm15, %v1345_v1, %v1203_v39  ;;  %v893_v40 = vld [vmem:[#allocation2 + $0x151] sm:$0xff] }
  0xad   : > { %4728 = vmatprep.mubr.msk.f32.mxu0 %vm5308_vm6, %v5309_v61  ;;  %v1205_v44 = vpop.permute.xlu1 %1204 }
  0xae   : > { %v1009_v46 = vpop.permute.xlu0 %1008 }
  0xaf   : > { %v1346_v47 = vsel %vm751_vm1, %v807_v41, %v1009_v46  ;;  %1262 = vrot.lane.b32.xlu1 %v934_v42, %s5305_s25  ;;  %v816_v41 = vld [vmem:[#allocation2 + $0x70] sm:$0xff]  ;;  %v943_v42 = vld [vmem:[#allocation2 + $0x15a] sm:$0xff] }
  0xb0   : > { %4729 = vmatmul.mubr.msk.f32.gmra.mrb[8].mxu0 %vm1449_vm0, %v1395_v43  ;;  %1066 = vrot.lane.b32.xlu0 %v885_v45, %s5304_s24  ;;  %v1396_v49 = vsel %vm1390_vm15, %v1346_v47, %v1205_v44  ;;  %v894_v45 = vld [vmem:[#allocation2 + $0x159] sm:$0xff] }
  0xb1   : > { %4731 = vmatprep.mubr.msk.f32.mxu0 %vm5308_vm6, %v5309_v61  ;;  %v1207_v50 = vpop.permute.xlu1 %1206 }
  0xb2   : > { %v1011_v52 = vpop.permute.xlu0 %1010 }
  0xb3   : > { %v1347_v53 = vsel %vm751_vm1, %v808_v48, %v1011_v52  ;;  %1264 = vrot.lane.b32.xlu1 %v935_v33, %s5305_s25  ;;  %v817_v48 = vld [vmem:[#allocation2 + $0x78] sm:$0xff]  ;;  %v944_v33 = vld [vmem:[#allocation2 + $0x162] sm:$0xff] }
  0xb4   : > { %4732 = vmatmul.mubr.msk.f32.gmra.mrb[10].mxu0 %vm1449_vm0, %v1396_v49  ;;  %1068 = vrot.lane.b32.xlu0 %v886_v51, %s5304_s24  ;;  %v1397_v56 = vsel %vm1390_vm15, %v1347_v53, %v1207_v50  ;;  %v895_v51 = vld [vmem:[#allocation2 + $0x161] sm:$0xff] }
  0xb5   : > { %4734 = vmatprep.mubr.msk.f32.mxu0 %vm5308_vm6, %v5309_v61  ;;  %v1209_v57 = vpop.permute.xlu1 %1208 }
  0xb6   : > { %v1013_v59 = vpop.permute.xlu0 %1012 }
  0xb7   : > { %v1348_v60 = vsel %vm751_vm1, %v809_v54, %v1013_v59  ;;  %1266 = vrot.lane.b32.xlu1 %v936_v55, %s5305_s25  ;;  %v818_v54 = vld [vmem:[#allocation2 + $0x80] sm:$0xff]  ;;  %v945_v55 = vld [vmem:[#allocation2 + $0x16a] sm:$0xff] }
  0xb8   : > { %4735 = vmatmul.mubr.msk.f32.gmra.mrb[12].mxu0 %vm1449_vm0, %v1397_v56  ;;  %1070 = vrot.lane.b32.xlu0 %v887_v58, %s5304_s24  ;;  %v1398_v2 = vsel %vm1390_vm15, %v1348_v60, %v1209_v57  ;;  %v896_v58 = vld [vmem:[#allocation2 + $0x169] sm:$0xff] }
  0xb9   : > { %4737 = vmatprep.mubr.msk.f32.mxu0 %vm5308_vm6, %v5309_v61  ;;  %v1211_v3 = vpop.permute.xlu1 %1210 }
  0xba   : > { %v1015_v5 = vpop.permute.xlu0 %1014 }
  0xbb   : > { %v1349_v6 = vsel %vm751_vm1, %v810_v62, %v1015_v5  ;;  %1268 = vrot.lane.b32.xlu1 %v937_v63, %s5305_s25  ;;  %v819_v62 = vld [vmem:[#allocation2 + $0x88] sm:$0xff]  ;;  %v946_v63 = vld [vmem:[#allocation2 + $0x172] sm:$0xff] }
  0xbc   : > { %4738 = vmatmul.mubr.msk.f32.gmra.mrb[14].mxu0 %vm1449_vm0, %v1398_v2  ;;  %1072 = vrot.lane.b32.xlu0 %v888_v4, %s5304_s24  ;;  %v1399_v9 = vsel %vm1390_vm15, %v1349_v6, %v1211_v3  ;;  %v897_v4 = vld [vmem:[#allocation2 + $0x171] sm:$0xff] }
  0xbd   : > { %4740 = vmatprep.mubr.msk.f32.mxu0 %vm5308_vm6, %v5309_v61  ;;  %v1213_v10 = vpop.permute.xlu1 %1212 }
  0xbe   : > { %v1017_v12 = vpop.permute.xlu0 %1016 }
  0xbf   : > { %v1350_v13 = vsel %vm751_vm1, %v811_v7, %v1017_v12  ;;  %1270 = vrot.lane.b32.xlu1 %v938_v8, %s5305_s25  ;;  %v820_v7 = vld [vmem:[#allocation2 + $0x90] sm:$0xff]  ;;  %v947_v8 = vld [vmem:[#allocation2 + $0x17a] sm:$0xff] }
  0xc0   : > { %4741 = vmatmul.mubr.msk.f32.gmra.mrb[16].mxu0 %vm1449_vm0, %v1399_v9  ;;  %1074 = vrot.lane.b32.xlu0 %v889_v11, %s5304_s24  ;;  %v1400_v16 = vsel %vm1390_vm15, %v1350_v13, %v1213_v10  ;;  %v898_v11 = vld [vmem:[#allocation2 + $0x179] sm:$0xff] }
  0xc1   : > { %4743 = vmatprep.mubr.msk.f32.mxu0 %vm5308_vm6, %v5309_v61  ;;  %v1215_v17 = vpop.permute.xlu1 %1214 }
  0xc2   : > { %v1019_v19 = vpop.permute.xlu0 %1018 }
  0xc3   : > { %v1351_v20 = vsel %vm751_vm1, %v812_v14, %v1019_v19  ;;  %1272 = vrot.lane.b32.xlu1 %v939_v15, %s5305_s25  ;;  %v821_v14 = vld [vmem:[#allocation2 + $0x98] sm:$0xff]  ;;  %v948_v15 = vld [vmem:[#allocation2 + $0x182] sm:$0x3] }
  0xc4   : > { %4744 = vmatmul.mubr.msk.f32.gmra.mrb[18].mxu0 %vm1449_vm0, %v1400_v16  ;;  %1076 = vrot.lane.b32.xlu0 %v890_v18, %s5304_s24  ;;  %v1401_v23 = vsel %vm1390_vm15, %v1351_v20, %v1215_v17  ;;  %v899_v18 = vld [vmem:[#allocation2 + $0x181] sm:$0x3] }
  0xc5   : > { %4746 = vmatprep.mubr.msk.f32.mxu0 %vm5308_vm6, %v5309_v61  ;;  %v1217_v24 = vpop.permute.xlu1 %1216 }
  0xc6   : > { %v1021_v26 = vpop.permute.xlu0 %1020 }
  0xc7   : > { %v1352_v27 = vsel %vm751_vm1, %v813_v21, %v1021_v26  ;;  %1274 = vrot.lane.b32.xlu1 %v940_v22, %s5305_s25  ;;  %v822_v21 = vld [vmem:[#allocation2 + $0xa0] sm:$0xff]  ;;  %v823_v26 = vld [vmem:[#allocation2 + $0xa8] sm:$0xff] }
  0xc8   : > { %4747 = vmatmul.mubr.msk.f32.gmra.mrb[20].mxu0 %vm1449_vm0, %v1401_v23  ;;  %1078 = vrot.lane.b32.xlu0 %v891_v25, %s5304_s24  ;;  %v1402_v30 = vsel %vm1390_vm15, %v1352_v27, %v1217_v24 }
  0xc9   : > { %4749 = vmatprep.mubr.msk.f32.mxu0 %vm5308_vm6, %v5309_v61  ;;  %v1219_v31 = vpop.permute.xlu1 %1218 }
  0xca   : > { %v1023_v34 = vpop.permute.xlu0 %1022 }
  0xcb   : > { %v1353_v35 = vsel %vm751_vm1, %v814_v28, %v1023_v34  ;;  %1276 = vrot.lane.b32.xlu1 %v941_v29, %s5305_s25 }
  0xcc   : > { %4750 = vmatmul.mubr.msk.f32.gmra.mrb[22].mxu0 %vm1449_vm0, %v1402_v30  ;;  %1080 = vrot.lane.b32.xlu0 %v892_v32, %s5304_s24  ;;  %v1403_v38 = vsel %vm1390_vm15, %v1353_v35, %v1219_v31  ;;  %v824_v31 = vld [vmem:[#allocation2 + $0xb0] sm:$0xff] }
  0xcd   : > { %4752 = vmatprep.mubr.msk.f32.mxu0 %vm5308_vm6, %v5309_v61  ;;  %v1221_v39 = vpop.permute.xlu1 %1220 }
  0xce   : > { %v1025_v0 = vpop.permute.xlu0 %1024 }
  0xcf   : > { %v1354_v1 = vsel %vm751_vm1, %v815_v36, %v1025_v0  ;;  %1278 = vrot.lane.b32.xlu1 %v942_v37, %s5305_s25  ;;  %v825_v37 = vld [vmem:[#allocation2 + $0xb8] sm:$0xff] }
  0xd0   : > { %4753 = vmatmul.mubr.msk.f32.gmra.mrb[24].mxu0 %vm1449_vm0, %v1403_v38  ;;  %1082 = vrot.lane.b32.xlu0 %v893_v40, %s5304_s24  ;;  %v1404_v43 = vsel %vm1390_vm15, %v1354_v1, %v1221_v39  ;;  %v826_v1 = vld [vmem:[#allocation2 + $0xc0] sm:$0xff] }
  0xd1   : > { %4755 = vmatprep.mubr.msk.f32.mxu0 %vm5308_vm6, %v5309_v61  ;;  %v1223_v44 = vpop.permute.xlu1 %1222 }
  0xd2   : > { %v1027_v46 = vpop.permute.xlu0 %1026 }
  0xd3   : > { %v1355_v47 = vsel %vm751_vm1, %v816_v41, %v1027_v46  ;;  %1280 = vrot.lane.b32.xlu1 %v943_v42, %s5305_s25 }
  0xd4   : > { %4756 = vmatmul.mubr.msk.f32.gmra.mrb[26].mxu0 %vm1449_vm0, %v1404_v43  ;;  %1084 = vrot.lane.b32.xlu0 %v894_v45, %s5304_s24  ;;  %v1405_v49 = vsel %vm1390_vm15, %v1355_v47, %v1223_v44  ;;  %v827_v45 = vld [vmem:[#allocation2 + $0xc8] sm:$0xff] }
  0xd5   : > { %4758 = vmatprep.mubr.msk.f32.mxu0 %vm5308_vm6, %v5309_v61  ;;  %v1225_v50 = vpop.permute.xlu1 %1224 }
  0xd6   : > { %v1029_v52 = vpop.permute.xlu0 %1028 }
  0xd7   : > { %v1356_v53 = vsel %vm751_vm1, %v817_v48, %v1029_v52  ;;  %1282 = vrot.lane.b32.xlu1 %v944_v33, %s5305_s25 }
  0xd8   : > { %4759 = vmatmul.mubr.msk.f32.gmra.mrb[28].mxu0 %vm1449_vm0, %v1405_v49  ;;  %1086 = vrot.lane.b32.xlu0 %v895_v51, %s5304_s24  ;;  %v1406_v56 = vsel %vm1390_vm15, %v1356_v53, %v1225_v50  ;;  %v828_v49 = vld [vmem:[#allocation2 + $0xd0] sm:$0xff] }
  0xd9   : > { %4761 = vmatprep.mubr.msk.f32.mxu0 %vm5308_vm6, %v5309_v61  ;;  %v1227_v57 = vpop.permute.xlu1 %1226 }
  0xda   : > { %v1031_v59 = vpop.permute.xlu0 %1030 }
  0xdb   : > { %v1357_v60 = vsel %vm751_vm1, %v818_v54, %v1031_v59  ;;  %1284 = vrot.lane.b32.xlu1 %v945_v55, %s5305_s25  ;;  %v829_v54 = vld [vmem:[#allocation2 + $0xd8] sm:$0xff]  ;;  %v830_v59 = vld [vmem:[#allocation2 + $0xe0] sm:$0xff] }
  0xdc   : > { %4762 = vmatmul.mubr.msk.f32.gmra.mrb[30].mxu0 %vm1449_vm0, %v1406_v56  ;;  %1088 = vrot.lane.b32.xlu0 %v896_v58, %s5304_s24  ;;  %v1407_v2 = vsel %vm1390_vm15, %v1357_v60, %v1227_v57 }
  0xdd   : > { %4764 = vmatprep.mubr.msk.f32.mxu0 %vm5308_vm6, %v5309_v61  ;;  %v1229_v3 = vpop.permute.xlu1 %1228 }
  0xde   : > { %v1033_v5 = vpop.permute.xlu0 %1032 }
  0xdf   : > { %v1358_v6 = vsel %vm751_vm1, %v819_v62, %v1033_v5  ;;  %1286 = vrot.lane.b32.xlu1 %v946_v63, %s5305_s25 }
  0xe0   : > { %4765 = vmatmul.mubr.msk.f32.gmra.mrb[32].mxu0 %vm1449_vm0, %v1407_v2  ;;  %1090 = vrot.lane.b32.xlu0 %v897_v4, %s5304_s24  ;;  %v1408_v9 = vsel %vm1390_vm15, %v1358_v6, %v1229_v3  ;;  %v831_v3 = vld [vmem:[#allocation2 + $0xe8] sm:$0xff] }
  0xe1   : > { %4767 = vmatprep.mubr.msk.f32.mxu0 %vm5308_vm6, %v5309_v61  ;;  %v1231_v10 = vpop.permute.xlu1 %1230 }
  0xe2   : > { %v1035_v12 = vpop.permute.xlu0 %1034 }
  0xe3   : > { %v1359_v13 = vsel %vm751_vm1, %v820_v7, %v1035_v12  ;;  %1288 = vrot.lane.b32.xlu1 %v947_v8, %s5305_s25  ;;  %v832_v8 = vld [vmem:[#allocation2 + $0xf0] sm:$0xff] }
  0xe4   : > { %4768 = vmatmul.mubr.msk.f32.gmra.mrb[34].mxu0 %vm1449_vm0, %v1408_v9  ;;  %1092 = vrot.lane.b32.xlu0 %v898_v11, %s5304_s24  ;;  %v1409_v16 = vsel %vm1390_vm15, %v1359_v13, %v1231_v10  ;;  %v833_v13 = vld [vmem:[#allocation2 + $0xf8] sm:$0xff] }
  0xe5   : > { %4770 = vmatprep.mubr.msk.f32.mxu0 %vm5308_vm6, %v5309_v61  ;;  %v1233_v17 = vpop.permute.xlu1 %1232 }
  0xe6   : > { %v1037_v19 = vpop.permute.xlu0 %1036 }
  0xe7   : > { %v1360_v20 = vsel %vm751_vm1, %v821_v14, %v1037_v19  ;;  %1290 = vrot.lane.b32.xlu1 %v948_v15, %s5305_s25 }
  0xe8   : > { %4771 = vmatmul.mubr.msk.f32.gmra.mrb[36].mxu0 %vm1449_vm0, %v1409_v16  ;;  %1094 = vrot.lane.b32.xlu0 %v899_v18, %s5304_s24  ;;  %v1410_v22 = vsel %vm1390_vm15, %v1360_v20, %v1233_v17  ;;  %v834_v18 = vld [vmem:[#allocation2 + $0x100] sm:$0xff]  ;;  %s4403_s24 = sshll.u32 %s5286_s13, 4  ;;  %s4404_s13 = sshll.u32 %s6927_s14, 5 }
  0xe9   : > { %4773 = vmatprep.mubr.msk.f32.mxu0 %vm5308_vm6, %v5309_v61  ;;  %v1235_v23 = vpop.permute.xlu1 %1234  ;;  %p423_p9 = scmp.lt.s32.totalorder %s4403_s24, 31 }
  0xea   : > { %v1039_v24 = vpop.permute.xlu0 %1038 }
  0xeb   : > { %v1361_v25 = vsel %vm751_vm1, %v822_v21, %v1039_v24  ;;  %s6931_s24 = smov (!%p423_p9, %s4403_s24), 31 }
  0xec   : > { %4774 = vmatmul.mubr.msk.f32.gmra.mrb[38].mxu0 %vm1449_vm0, %v1410_v22  ;;  %v1411_v27 = vsel %vm1390_vm15, %v1361_v25, %v1235_v23  ;;  %v835_v23 = vld [vmem:[#allocation2 + $0x108] sm:$0xff] }
  0xed   : > { %4776 = vmatprep.mubr.msk.f32.mxu0 %vm5308_vm6, %v5309_v61  ;;  %v1237_v28 = vpop.permute.xlu1 %1236 }
  0xee   : > { %v1041_v29 = vpop.permute.xlu0 %1040 }
  0xef   : > { %v1362_v30 = vsel %vm751_vm1, %v823_v26, %v1041_v29 }
  0xf0   : > { %4777 = vmatmul.mubr.msk.f32.gmra.mrb[40].mxu0 %vm1449_vm0, %v1411_v27  ;;  %v1412_v32 = vsel %vm1390_vm15, %v1362_v30, %v1237_v28  ;;  %v836_v28 = vld [vmem:[#allocation2 + $0x110] sm:$0xff] }
  0xf1   : > { %4779 = vmatprep.mubr.msk.f32.mxu0 %vm5308_vm6, %v5309_v61  ;;  %v1239_v34 = vpop.permute.xlu1 %1238 }
  0xf2   : > { %v1043_v35 = vpop.permute.xlu0 %1042 }
  0xf3   : > { %v1363_v36 = vsel %vm751_vm1, %v824_v31, %v1043_v35 }
  0xf4   : > { %4780 = vmatmul.mubr.msk.f32.gmra.mrb[42].mxu0 %vm1449_vm0, %v1412_v32  ;;  %v1413_v38 = vsel %vm1390_vm15, %v1363_v36, %v1239_v34  ;;  %v837_v34 = vld [vmem:[#allocation2 + $0x118] sm:$0xff] }
  0xf5   : > { %4782 = vmatprep.mubr.msk.f32.mxu0 %vm5308_vm6, %v5309_v61  ;;  %v1241_v39 = vpop.permute.xlu1 %1240 }
  0xf6   : > { %v1045_v40 = vpop.permute.xlu0 %1044 }
  0xf7   : > { %v1364_v0 = vsel %vm751_vm1, %v825_v37, %v1045_v40 }
  0xf8   : > { %4783 = vmatmul.mubr.msk.f32.gmra.mrb[44].mxu0 %vm1449_vm0, %v1413_v38  ;;  %v1414_v41 = vsel %vm1390_vm15, %v1364_v0, %v1241_v39  ;;  %v838_v39 = vld [vmem:[#allocation2 + $0x120] sm:$0xff] }
  0xf9   : > { %4785 = vmatprep.mubr.msk.f32.mxu0 %vm5308_vm6, %v5309_v61  ;;  %v1243_v42 = vpop.permute.xlu1 %1242 }
  0xfa   : > { %v1047_v43 = vpop.permute.xlu0 %1046 }
  0xfb   : > { %v1365_v44 = vsel %vm751_vm1, %v826_v1, %v1047_v43 }
  0xfc   : > { %4786 = vmatmul.mubr.msk.f32.gmra.mrb[46].mxu0 %vm1449_vm0, %v1414_v41  ;;  %v1415_v46 = vsel %vm1390_vm15, %v1365_v44, %v1243_v42  ;;  %v839_v42 = vld [vmem:[#allocation2 + $0x128] sm:$0xff] }
  0xfd   : > { %4788 = vmatprep.mubr.msk.f32.mxu0 %vm5308_vm6, %v5309_v61  ;;  %v1245_v47 = vpop.permute.xlu1 %1244 }
  0xfe   : > { %v1049_v48 = vpop.permute.xlu0 %1048 }
  0xff   : > { %v1366_v33 = vsel %vm751_vm1, %v827_v45, %v1049_v48 }
 0x100   : > { %4789 = vmatmul.mubr.msk.f32.gmra.mrb[48].mxu0 %vm1449_vm0, %v1415_v46  ;;  %v1416_v50 = vsel %vm1390_vm15, %v1366_v33, %v1245_v47  ;;  %v840_v47 = vld [vmem:[#allocation2 + $0x130] sm:$0xff] }
 0x101   : > { %4791 = vmatprep.mubr.msk.f32.mxu0 %vm5308_vm6, %v5309_v61  ;;  %v1247_v51 = vpop.permute.xlu1 %1246 }
 0x102   : > { %v1051_v52 = vpop.permute.xlu0 %1050 }
 0x103   : > { %v1367_v53 = vsel %vm751_vm1, %v828_v49, %v1051_v52 }
 0x104   : > { %4792 = vmatmul.mubr.msk.f32.gmra.mrb[50].mxu0 %vm1449_vm0, %v1416_v50  ;;  %v1417_v55 = vsel %vm1390_vm15, %v1367_v53, %v1247_v51  ;;  %v841_v51 = vld [vmem:[#allocation2 + $0x138] sm:$0xff] }
 0x105   : > { %4794 = vmatprep.mubr.msk.f32.mxu0 %vm5308_vm6, %v5309_v61  ;;  %v1249_v56 = vpop.permute.xlu1 %1248 }
 0x106   : > { %v1053_v57 = vpop.permute.xlu0 %1052 }
 0x107   : > { %v1368_v58 = vsel %vm751_vm1, %v829_v54, %v1053_v57 }
 0x108   : > { %4795 = vmatmul.mubr.msk.f32.gmra.mrb[52].mxu0 %vm1449_vm0, %v1417_v55  ;;  %v1418_v60 = vsel %vm1390_vm15, %v1368_v58, %v1249_v56  ;;  %v842_v56 = vld [vmem:[#allocation2 + $0x140] sm:$0xff] }
 0x109   : > { %4797 = vmatprep.mubr.msk.f32.mxu0 %vm5308_vm6, %v5309_v61  ;;  %v1251_v62 = vpop.permute.xlu1 %1250 }
 0x10a   : > { %v1055_v63 = vpop.permute.xlu0 %1054 }
 0x10b   : > { %v1369_v2 = vsel %vm751_vm1, %v830_v59, %v1055_v63 }
 0x10c   : > { %4798 = vmatmul.mubr.msk.f32.gmra.mrb[54].mxu0 %vm1449_vm0, %v1418_v60  ;;  %v1419_v4 = vsel %vm1390_vm15, %v1369_v2, %v1251_v62  ;;  %v843_v62 = vld [vmem:[#allocation2 + $0x148] sm:$0xff] }
 0x10d   : > { %4800 = vmatprep.mubr.msk.f32.mxu0 %vm5308_vm6, %v5309_v61  ;;  %v1253_v5 = vpop.permute.xlu1 %1252 }
 0x10e   : > { %v1057_v6 = vpop.permute.xlu0 %1056 }
 0x10f   : > { %v1370_v7 = vsel %vm751_vm1, %v831_v3, %v1057_v6 }
 0x110   : > { %4801 = vmatmul.mubr.msk.f32.gmra.mrb[56].mxu0 %vm1449_vm0, %v1419_v4  ;;  %v1420_v9 = vsel %vm1390_vm15, %v1370_v7, %v1253_v5  ;;  %v844_v5 = vld [vmem:[#allocation2 + $0x150] sm:$0xff] }
 0x111   : > { %4803 = vmatprep.mubr.msk.f32.mxu0 %vm5308_vm6, %v5309_v61  ;;  %v1255_v10 = vpop.permute.xlu1 %1254 }
 0x112   : > { %v1059_v11 = vpop.permute.xlu0 %1058 }
 0x113   : > { %v1371_v12 = vsel %vm751_vm1, %v832_v8, %v1059_v11 }
 0x114   : > { %4804 = vmatmul.mubr.msk.f32.gmra.mrb[58].mxu0 %vm1449_vm0, %v1420_v9  ;;  %v1421_v14 = vsel %vm1390_vm15, %v1371_v12, %v1255_v10  ;;  %v845_v10 = vld [vmem:[#allocation2 + $0x158] sm:$0xff] }
 0x115   : > { %4806 = vmatprep.mubr.msk.f32.mxu0 %vm5308_vm6, %v5309_v61  ;;  %v1257_v15 = vpop.permute.xlu1 %1256 }
 0x116   : > { %v1061_v16 = vpop.permute.xlu0 %1060 }
 0x117   : > { %v1372_v17 = vsel %vm751_vm1, %v833_v13, %v1061_v16 }
 0x118   : > { %4807 = vmatmul.mubr.msk.f32.gmra.mrb[60].mxu0 %vm1449_vm0, %v1421_v14  ;;  %v1422_v19 = vsel %vm1390_vm15, %v1372_v17, %v1257_v15  ;;  %v846_v15 = vld [vmem:[#allocation2 + $0x160] sm:$0xff] }
 0x119   : > { %4809 = vmatprep.mubr.msk.f32.mxu0 %vm5308_vm6, %v5309_v61  ;;  %v1259_v20 = vpop.permute.xlu1 %1258 }
 0x11a   : > { %v1063_v21 = vpop.permute.xlu0 %1062 }
 0x11b   : > { %v1373_v22 = vsel %vm751_vm1, %v834_v18, %v1063_v21 }
 0x11c   : > { %4810 = vmatmul.mubr.msk.f32.gmra.mrb[62].mxu0 %vm1449_vm0, %v1422_v19  ;;  %v1423_v24 = vsel %vm1390_vm15, %v1373_v22, %v1259_v20  ;;  %v847_v20 = vld [vmem:[#allocation2 + $0x168] sm:$0xff] }
 0x11d   : > { %4812 = vmatprep.mubr.msk.f32.mxu0 %vm5308_vm6, %v5309_v61  ;;  %v1261_v25 = vpop.permute.xlu1 %1260 }
 0x11e   : > { %v1065_v26 = vpop.permute.xlu0 %1064 }
 0x11f   : > { %v1374_v27 = vsel %vm751_vm1, %v835_v23, %v1065_v26 }
 0x120   : > { %4813 = vmatmul.mubr.msk.f32.gmra.mrb[64].mxu0 %vm1449_vm0, %v1423_v24  ;;  %v1424_v29 = vsel %vm1390_vm15, %v1374_v27, %v1261_v25  ;;  %v848_v25 = vld [vmem:[#allocation2 + $0x170] sm:$0xff] }
 0x121   : > { %4815 = vmatprep.mubr.msk.f32.mxu0 %vm5308_vm6, %v5309_v61  ;;  %v1263_v30 = vpop.permute.xlu1 %1262 }
 0x122   : > { %v1067_v31 = vpop.permute.xlu0 %1066 }
 0x123   : > { %v1375_v32 = vsel %vm751_vm1, %v836_v28, %v1067_v31 }
 0x124   : > { %4816 = vmatmul.mubr.msk.f32.gmra.mrb[66].mxu0 %vm1449_vm0, %v1424_v29  ;;  %v1425_v35 = vsel %vm1390_vm15, %v1375_v32, %v1263_v30  ;;  %v849_v30 = vld [vmem:[#allocation2 + $0x178] sm:$0xff] }
 0x125   : > { %4818 = vmatprep.mubr.msk.f32.mxu0 %vm5308_vm6, %v5309_v61  ;;  %v1265_v36 = vpop.permute.xlu1 %1264 }
 0x126   : > { %v1069_v37 = vpop.permute.xlu0 %1068 }
 0x127   : > { %v1376_v38 = vsel %vm751_vm1, %v837_v34, %v1069_v37 }
 0x128   : > { %4819 = vmatmul.mubr.msk.f32.gmra.mrb[68].mxu0 %vm1449_vm0, %v1425_v35  ;;  %v1426_v40 = vsel %vm1390_vm15, %v1376_v38, %v1265_v36  ;;  %v850_v36 = vld [vmem:[#allocation2 + $0x180] sm:$0x3] }
 0x129   : > { %4821 = vmatprep.mubr.msk.f32.mxu0 %vm5308_vm6, %v5309_v61  ;;  %v1267_v0 = vpop.permute.xlu1 %1266 }
 0x12a   : > { %v1071_v1 = vpop.permute.xlu0 %1070 }
 0x12b   : > { %v1377_v41 = vsel %vm751_vm1, %v838_v39, %v1071_v1  ;;  %v2058_v1 = vlaneseq }
 0x12c   : > { %4822 = vmatmul.mubr.msk.f32.gmra.mrb[70].mxu0 %vm1449_vm0, %v1426_v40  ;;  %v1427_v43 = vsel %vm1390_vm15, %v1377_v41, %v1267_v0 }
 0x12d   : > { %4824 = vmatprep.mubr.msk.f32.mxu0 %vm5308_vm6, %v5309_v61  ;;  %v1269_v44 = vpop.permute.xlu1 %1268  ;;  %v6002_v41 = vshrl.u32 %v2058_v1, 7 }
 0x12e   : > { %v1073_v45 = vpop.permute.xlu0 %1072 }
 0x12f   : > { %v1378_v46 = vsel %vm751_vm1, %v839_v42, %v1073_v45  ;;  %v6004_v42 = vstv %s4459_s20  ;;  %v6012_v45 = vld [vmem:[%s6866_s3] ss:$0 sm:$0xff] }
 0x130   : > { %4825 = vmatmul.mubr.msk.f32.gmra.mrb[72].mxu0 %vm1449_vm0, %v1427_v43  ;;  %v1428_v48 = vsel %vm1390_vm15, %v1378_v46, %v1269_v44  ;;  %v2110_v43 = vadd.s32 %v6004_v42, %v6002_v41  ;;  %v2060_v44 = vadd.s32 8, %v6002_v41 }
 0x131   : > { %4827 = vmatprep.mubr.msk.f32.mxu0 %vm5308_vm6, %v5309_v61  ;;  %v1271_v33 = vpop.permute.xlu1 %1270 }
 0x132   : > { %v1075_v49 = vpop.permute.xlu0 %1074  ;;  %vm2208_vm2 = vcmp.lt.s32.totalorder %v2110_v43, 768  ;;  %v2111_v46 = vadd.s32 %v6004_v42, %v2060_v44 }
 0x133   : > { %v1379_v50 = vsel %vm751_vm1, %v840_v47, %v1075_v49  ;;  %v2061_v47 = vadd.s32 16, %v6002_v41 }
 0x134   : > { %4828 = vmatmul.mubr.msk.f32.gmra.mrb[74].mxu0 %vm1449_vm0, %v1428_v48  ;;  %v1429_v52 = vsel %vm1390_vm15, %v1379_v50, %v1271_v33  ;;  %vm2160_vm7 = vcmp.ge.s32.totalorder %v2111_v46, 0  ;;  %vm2209_vm8 = vcmp.lt.s32.totalorder %v2111_v46, 768 }
 0x135   : > { %4830 = vmatprep.mubr.msk.f32.mxu0 %vm5308_vm6, %v5309_v61  ;;  %v1273_v53 = vpop.permute.xlu1 %1272  ;;  %vm2258_vm10 = vmand %vm2160_vm7, %vm2209_vm8 }
 0x136   : > { %v1077_v54 = vpop.permute.xlu0 %1076 }
 0x137   : > { %v1380_v55 = vsel %vm751_vm1, %v841_v51, %v1077_v54  ;;  %v2112_v51 = vadd.s32 %v6004_v42, %v2061_v47 }
 0x138   : > { %4831 = vmatmul.mubr.msk.f32.gmra.mrb[76].mxu0 %vm1449_vm0, %v1429_v52  ;;  %v1430_v57 = vsel %vm1390_vm15, %v1380_v55, %v1273_v53  ;;  %v2062_v52 = vadd.s32 24, %v6002_v41 }
 0x139   : > { %4833 = vmatprep.mubr.msk.f32.mxu0 %vm5308_vm6, %v5309_v61  ;;  %v1275_v58 = vpop.permute.xlu1 %1274  ;;  %vm2161_vm11 = vcmp.ge.s32.totalorder %v2112_v51, 0  ;;  %vm2210_vm12 = vcmp.lt.s32.totalorder %v2112_v51, 768 }
 0x13a   : > { %v1079_v59 = vpop.permute.xlu0 %1078  ;;  %vm2259_vm14 = vmand %vm2161_vm11, %vm2210_vm12 }
 0x13b   : > { %v1381_v60 = vsel %vm751_vm1, %v842_v56, %v1079_v59 }
 0x13c   : > { %4834 = vmatmul.mubr.msk.f32.gmra.mrb[78].mxu0 %vm1449_vm0, %v1430_v57  ;;  %v1431_v63 = vsel %vm1390_vm15, %v1381_v60, %v1275_v58  ;;  %v3128_v57 = vld [vmem:[%s6869_s6] sm:$0xff]  ;;  %v3129_v58 = vld [vmem:[%s6869_s6 + $0x8] sm:$0xff] }
 0x13d   : > { %4836 = vmatprep.mubr.msk.f32.mxu0 %vm5308_vm6, %v5309_v61  ;;  %v1277_v2 = vpop.permute.xlu1 %1276  ;;  %v5019_v60 = vpack.c.bf16 %v3129_v58, %v3128_v57 }
 0x13e   : > { %v1081_v3 = vpop.permute.xlu0 %1080 }
 0x13f   : > { %v1382_v4 = vsel %vm751_vm1, %v843_v62, %v1081_v3  ;;  %5020 = vmatprep.subr.bf16.mxu1 %v5019_v60 }
 0x140   : > { %4837 = vmatmul.mubr.msk.f32.gmra.mrb[80].mxu0 %vm1449_vm0, %v1431_v63  ;;  %v1432_v6 = vsel %vm1390_vm15, %v1382_v4, %v1277_v2  ;;  %v2113_v63 = vadd.s32 %v6004_v42, %v2062_v52  ;;  %v2063_v2 = vadd.s32 32, %v6002_v41  ;;  %5022 = vmatpush3.bf16.msra.mxu1 %v5019_v60 }
 0x141   : > { %4839 = vmatprep.mubr.msk.f32.mxu0 %vm5308_vm6, %v5309_v61  ;;  %v1279_v7 = vpop.permute.xlu1 %1278 }
 0x142   : > { %v1083_v8 = vpop.permute.xlu0 %1082 }
 0x143   : > { %v1383_v9 = vsel %vm751_vm1, %v844_v5, %v1083_v8 }
 0x144   : > { %4840 = vmatmul.mubr.msk.f32.gmra.mrb[82].mxu0 %vm1449_vm0, %v1432_v6  ;;  %v1433_v11 = vsel %vm1390_vm15, %v1383_v9, %v1279_v7  ;;  %v2114_v9 = vadd.s32 %v6004_v42, %v2063_v2 }
 0x145   : > { %4842 = vmatprep.mubr.msk.f32.mxu0 %vm5308_vm6, %v5309_v61  ;;  %v1281_v12 = vpop.permute.xlu1 %1280 }
 0x146   : > { %v1085_v13 = vpop.permute.xlu0 %1084  ;;  %vm2212_vm7 = vcmp.lt.s32.totalorder %v2114_v9, 768 }
 0x147   : > { %v1384_v14 = vsel %vm751_vm1, %v845_v10, %v1085_v13  ;;  %v2064_v10 = vadd.s32 40, %v6002_v41 }
 0x148   : > { %4843 = vmatmul.mubr.msk.f32.gmra.mrb[84].mxu0 %vm1449_vm0, %v1433_v11  ;;  %v1434_v16 = vsel %vm1390_vm15, %v1384_v14, %v1281_v12  ;;  %v3130_v14 = vld [vmem:[%s6869_s6 + $0x10] sm:$0xff] }
 0x149   : > { %4845 = vmatprep.mubr.msk.f32.mxu0 %vm5308_vm6, %v5309_v61  ;;  %v1283_v17 = vpop.permute.xlu1 %1282  ;;  %4867 = vmatprep.subr.mxu1 %v3130_v14 }
 0x14a   : > { %v1087_v18 = vpop.permute.xlu0 %1086  ;;  %4868 = vmatpush3.msra.mxu1 %v3130_v14 }
 0x14b   : > { %v1385_v19 = vsel %vm751_vm1, %v846_v15, %v1087_v18  ;;  %v2115_v18 = vadd.s32 %v6004_v42, %v2064_v10 }
 0x14c   : > { %4846 = vmatmul.mubr.msk.f32.gmra.mrb[86].mxu0 %vm1449_vm0, %v1434_v16  ;;  %v1435_v21 = vsel %vm1390_vm15, %v1385_v19, %v1283_v17  ;;  %v2065_v19 = vadd.s32 48, %v6002_v41 }
 0x14d   : > { %4848 = vmatprep.mubr.msk.f32.mxu0 %vm5308_vm6, %v5309_v61  ;;  %v1285_v22 = vpop.permute.xlu1 %1284  ;;  %vm2213_vm11 = vcmp.lt.s32.totalorder %v2115_v18, 768 }
 0x14e   : > { %v1089_v23 = vpop.permute.xlu0 %1088 }
 0x14f   : > { %v1386_v24 = vsel %vm751_vm1, %v847_v20, %v1089_v23 }
 0x150   : > { %4849 = vmatmul.mubr.msk.f32.gmra.mrb[88].mxu0 %vm1449_vm0, %v1435_v21  ;;  %v1436_v26 = vsel %vm1390_vm15, %v1386_v24, %v1285_v22 }
 0x151   : > { %4851 = vmatprep.mubr.msk.f32.mxu0 %vm5308_vm6, %v5309_v61  ;;  %v1287_v27 = vpop.permute.xlu1 %1286 }
 0x152   : > { %v1091_v28 = vpop.permute.xlu0 %1090 }
 0x153   : > { %v1387_v29 = vsel %vm751_vm1, %v848_v25, %v1091_v28  ;;  %v2066_v28 = vadd.s32 56, %v6002_v41 }
 0x154   : > { %4852 = vmatmul.mubr.msk.f32.gmra.mrb[90].mxu0 %vm1449_vm0, %v1436_v26  ;;  %v1437_v31 = vsel %vm1390_vm15, %v1387_v29, %v1287_v27  ;;  %v2116_v27 = vadd.s32 %v6004_v42, %v2065_v19 }
 0x155   : > { %4854 = vmatprep.mubr.msk.f32.mxu0 %vm5308_vm6, %v5309_v61  ;;  %v1289_v32 = vpop.permute.xlu1 %1288 }
 0x156   : > { %v1093_v34 = vpop.permute.xlu0 %1092 }
 0x157   : > { %v1388_v35 = vsel %vm751_vm1, %v849_v30, %v1093_v34 }
 0x158   : > { %4855 = vmatmul.mubr.msk.f32.gmra.mrb[92].mxu0 %vm1449_vm0, %v1437_v31  ;;  %v1438_v37 = vsel %vm1390_vm15, %v1388_v35, %v1289_v32 }
 0x159   : > { %4857 = vmatprep.mubr.msk.f32.mxu0 %vm5308_vm6, %v5309_v61  ;;  %v1291_v39 = vpop.permute.xlu1 %1290 }
 0x15a   : > { %v1095_v38 = vpop.permute.xlu0 %1094 }
 0x15b   : > { %v1389_v40 = vsel %vm751_vm1, %v850_v36, %v1095_v38 }
 0x15c   : > { %4858 = vmatmul.mubr.msk.f32.gmra.mrb[94].mxu0 %vm1449_vm0, %v1438_v37  ;;  %v1439_v0 = vsel %vm1390_vm15, %v1389_v40, %v1291_v39  ;;  %v2117_v39 = vadd.s32 %v6004_v42, %v2066_v28  ;;  %v2067_v40 = vadd.s32 64, %v6002_v41  ;;  %v2072_v28 = vadd.s32 104, %v6002_v41 }
 0x15d   : > { %4860 = vmatprep.mubr.msk.f32.mxu0 %vm5308_vm6, %v5309_v61  ;;  %vm2159_vm6 = vcmp.ge.s32.totalorder %v2110_v43, 0 }
 0x15e   : > { %vm2257_vm5 = vmand %vm2159_vm6, %vm2208_vm2  ;;  %vm2211_vm6 = vcmp.lt.s32.totalorder %v2113_v63, 768 }
 0x160   : > { %4861 = vmatmul.mubr.msk.f32.gmra.mrb[96].mxu0 %vm1449_vm0, %v1439_v0  ;;  %vm2162_vm0 = vcmp.ge.s32.totalorder %v2113_v63, 0 }
 0x173   : > { %v1667_v61 = vpop.f32.mrb[0].mxu0 }
 0x174   : > { %v1668_v48 = vadd.f32 %v6012_v45, %v1667_v61  ;;  %v4718_v33 = vpop.f32.mrb[1].mxu0 }
 0x175   : > { %v2118_v33 = vadd.s32 %v6004_v42, %v2067_v40 }
 0x176   : > { %vm1911_vm4 = vcmp.ge.f32.partialorder %v1668_v48, 0.0  ;;  %v1960_v49 = vmul.f32 0.3, %v1668_v48 }
 0x177   : > { %v1672_v50 = vpop.f32.mrb[2].mxu0 }
 0x178   : > { %v2009_v53 = vsel %vm1911_vm4, %v1668_v48, %v1960_v49  ;;  %v1673_v54 = vadd.f32 %v6012_v45, %v1672_v50  ;;  %v4721_v55 = vpop.f32.mrb[3].mxu0  ;;  %vm2260_vm4 = vmand %vm2162_vm0, %vm2211_vm6  ;;  %vm2214_vm0 = vcmp.lt.s32.totalorder %v2116_v27, 768  ;;  %v2068_v49 = vadd.s32 72, %v6002_v41 }
 0x179   : > { %v2404_v56 = vsel %vm2257_vm5, %v2009_v53, 0.0  ;;  %vm2163_vm5 = vcmp.ge.s32.totalorder %v2114_v9, 0 }
 0x17a   : > { %2453 = vst.msk [vmem:[#allocation3] sm:$0xff] %vm1390_vm15, %v2404_v56  ;;  %vm1912_vm9 = vcmp.ge.f32.partialorder %v1673_v54, 0.0  ;;  %v1961_v59 = vmul.f32 0.3, %v1673_v54  ;;  %v2119_v58 = vadd.s32 %v6004_v42, %v2068_v49 }
 0x17b   : > { %v1677_v62 = vpop.f32.mrb[4].mxu0 }
 0x17c   : > { %v2010_v3 = vsel %vm1912_vm9, %v1673_v54, %v1961_v59  ;;  %v1678_v4 = vadd.f32 %v6012_v45, %v1677_v62  ;;  %v4724_v5 = vpop.f32.mrb[5].mxu0  ;;  %vm2261_vm9 = vmand %vm2163_vm5, %vm2212_vm7  ;;  %vm2215_vm5 = vcmp.lt.s32.totalorder %v2117_v39, 768  ;;  %v2069_v59 = vadd.s32 80, %v6002_v41 }
 0x17d   : > { %v2405_v6 = vsel %vm2258_vm10, %v2010_v3, 0.0  ;;  %vm2164_vm10 = vcmp.ge.s32.totalorder %v2115_v18, 0  ;;  %v2071_v18 = vadd.s32 96, %v6002_v41 }
 0x17e   : > { %2454 = vst.msk [vmem:[#allocation3 + $0x8] sm:$0xff] %vm1390_vm15, %v2405_v6  ;;  %vm1913_vm13 = vcmp.ge.f32.partialorder %v1678_v4, 0.0  ;;  %v1962_v7 = vmul.f32 0.3, %v1678_v4 }
 0x17f   : > { %v1682_v8 = vpop.f32.mrb[6].mxu0 }
 0x180   : > { %v2011_v11 = vsel %vm1913_vm13, %v1678_v4, %v1962_v7  ;;  %v1683_v12 = vadd.f32 %v6012_v45, %v1682_v8  ;;  %v4727_v13 = vpop.f32.mrb[7].mxu0  ;;  %vm6047_vm13 = vmand %vm2164_vm10, %vm2213_vm11  ;;  %vm2216_vm10 = vcmp.lt.s32.totalorder %v2118_v33, 768  ;;  %v2120_v7 = vadd.s32 %v6004_v42, %v2069_v59 }
 0x181   : > { %v2406_v15 = vsel %vm2259_vm14, %v2011_v11, 0.0  ;;  %vm2165_vm14 = vcmp.ge.s32.totalorder %v2116_v27, 0  ;;  %v2070_v8 = vadd.s32 88, %v6002_v41  ;;  %v2122_v27 = vadd.s32 %v6004_v42, %v2071_v18 }
 0x182   : > { %2455 = vst.msk [vmem:[#allocation3 + $0x10] sm:$0xff] %vm1390_vm15, %v2406_v15  ;;  %vm1914_vm2 = vcmp.ge.f32.partialorder %v1683_v12, 0.0  ;;  %v1963_v16 = vmul.f32 0.3, %v1683_v12 }
 0x183   : > { %v1687_v17 = vpop.f32.mrb[8].mxu0 }
 0x184   : > { %v2012_v20 = vsel %vm1914_vm2, %v1683_v12, %v1963_v16  ;;  %v1688_v21 = vadd.f32 %v6012_v45, %v1687_v17  ;;  %v4730_v22 = vpop.f32.mrb[9].mxu0  ;;  %vm2263_vm2 = vmand %vm2165_vm14, %vm2214_vm0  ;;  %vm2217_vm14 = vcmp.lt.s32.totalorder %v2119_v58, 768  ;;  %v2121_v17 = vadd.s32 %v6004_v42, %v2070_v8 }
 0x185   : > { %v2407_v23 = vsel %vm2260_vm4, %v2012_v20, 0.0  ;;  %v2551_v24 = vld [vmem:[#allocation3 + $0x1] sm:$0xff]  ;;  %vm2166_vm4 = vcmp.ge.s32.totalorder %v2117_v39, 0  ;;  %v2073_v39 = vadd.s32 112, %v6002_v41 }
 0x186   : > { %2456 = vst.msk [vmem:[#allocation3 + $0x18] sm:$0xff] %vm1390_vm15, %v2407_v23  ;;  %vm1915_vm8 = vcmp.ge.f32.partialorder %v1688_v21, 0.0  ;;  %v1964_v25 = vmul.f32 0.3, %v1688_v21  ;;  %2695 = vrot.lane.b32.xlu0 %v2551_v24, %s5305_s25  ;;  %v2599_v34 = vld [vmem:[#allocation3 + $0x2] sm:$0xff] }
 0x187   : > { %v1692_v26 = vpop.f32.mrb[10].mxu0 }
 0x188   : > { %v2013_v29 = vsel %vm1915_vm8, %v1688_v21, %v1964_v25  ;;  %v1693_v30 = vadd.f32 %v6012_v45, %v1692_v26  ;;  %v4733_v31 = vpop.f32.mrb[11].mxu0  ;;  %vm2264_vm8 = vmand %vm2166_vm4, %vm2215_vm5  ;;  %vm2218_vm4 = vcmp.lt.s32.totalorder %v2120_v7, 768 }
 0x189   : > { %v2408_v32 = vsel %vm2261_vm9, %v2013_v29, 0.0  ;;  %v2552_v35 = vld [vmem:[#allocation3 + $0x9] sm:$0xff]  ;;  %vm2167_vm9 = vcmp.ge.s32.totalorder %v2118_v33, 0  ;;  %v2074_v33 = vadd.s32 120, %v6002_v41 }
 0x18a   : > { %2457 = vst.msk [vmem:[#allocation3 + $0x20] sm:$0xff] %vm1390_vm15, %v2408_v32  ;;  %vm1916_vm12 = vcmp.ge.f32.partialorder %v1693_v30, 0.0  ;;  %v1965_v36 = vmul.f32 0.3, %v1693_v30  ;;  %2887 = vrot.lane.b32.xlu0 %v2599_v34, %s5310_s29  ;;  %2697 = vrot.lane.b32.xlu1 %v2552_v35, %s5305_s25  ;;  %v2600_v61 = vld [vmem:[#allocation3 + $0xa] sm:$0xff] }
 0x18b   : > { %v1697_v38 = vpop.f32.mrb[12].mxu0 }
 0x18c   : > { %v2014_v0 = vsel %vm1916_vm12, %v1693_v30, %v1965_v36  ;;  %v1698_v1 = vadd.f32 %v6012_v45, %v1697_v38  ;;  %v4736_v43 = vpop.f32.mrb[13].mxu0  ;;  %vm2265_vm12 = vmand %vm2167_vm9, %vm2216_vm10  ;;  %vm2219_vm9 = vcmp.lt.s32.totalorder %v2121_v17, 768  ;;  %v2123_v38 = vadd.s32 %v6004_v42, %v2072_v28 }
 0x18d   : > { %v2409_v44 = vsel %vm6047_vm13, %v2014_v0, 0.0  ;;  %v2553_v46 = vld [vmem:[#allocation3 + $0x11] sm:$0xff]  ;;  %vm2168_vm13 = vcmp.ge.s32.totalorder %v2119_v58, 0  ;;  %v2075_v58 = vadd.s32 128, %v6002_v41 }
 0x18e   : > { %2458 = vst.msk [vmem:[#allocation3 + $0x28] sm:$0xff] %vm1390_vm15, %v2409_v44  ;;  %vm1917_vm6 = vcmp.ge.f32.partialorder %v1698_v1, 0.0  ;;  %v1966_v47 = vmul.f32 0.3, %v1698_v1  ;;  %2889 = vrot.lane.b32.xlu1 %v2600_v61, %s5310_s29  ;;  %2699 = vrot.lane.b32.xlu0 %v2553_v46, %s5305_s25  ;;  %v2601_v54 = vld [vmem:[#allocation3 + $0x12] sm:$0xff] }
 0x18f   : > { %v1702_v48 = vpop.f32.mrb[14].mxu0 }
 0x190   : > { %v2015_v50 = vsel %vm1917_vm6, %v1698_v1, %v1966_v47  ;;  %v1703_v51 = vadd.f32 %v6012_v45, %v1702_v48  ;;  %v4739_v52 = vpop.f32.mrb[15].mxu0  ;;  %vm2266_vm6 = vmand %vm2168_vm13, %vm2217_vm14  ;;  %vm2220_vm13 = vcmp.lt.s32.totalorder %v2122_v27, 768  ;;  %v2124_v48 = vadd.s32 %v6004_v42, %v2073_v39 }
 0x191   : > { %v2410_v53 = vsel %vm2263_vm2, %v2015_v50, 0.0  ;;  %v2554_v55 = vld [vmem:[#allocation3 + $0x19] sm:$0xff]  ;;  %vm2169_vm2 = vcmp.ge.s32.totalorder %v2120_v7, 0  ;;  %v2076_v7 = vadd.s32 136, %v6002_v41 }
 0x192   : > { %2459 = vst.msk [vmem:[#allocation3 + $0x30] sm:$0xff] %vm1390_vm15, %v2410_v53  ;;  %vm1918_vm7 = vcmp.ge.f32.partialorder %v1703_v51, 0.0  ;;  %v1967_v56 = vmul.f32 0.3, %v1703_v51  ;;  %2891 = vrot.lane.b32.xlu0 %v2601_v54, %s5310_s29  ;;  %2701 = vrot.lane.b32.xlu1 %v2554_v55, %s5305_s25  ;;  %v2602_v3 = vld [vmem:[#allocation3 + $0x1a] sm:$0xff] }
 0x193   : > { %v1707_v57 = vpop.f32.mrb[16].mxu0 }
 0x194   : > { %v2016_v60 = vsel %vm1918_vm7, %v1703_v51, %v1967_v56  ;;  %v1708_v62 = vadd.f32 %v6012_v45, %v1707_v57  ;;  %v4742_v63 = vpop.f32.mrb[17].mxu0  ;;  %vm2267_vm7 = vmand %vm2169_vm2, %vm2218_vm4  ;;  %vm2221_vm2 = vcmp.lt.s32.totalorder %v2123_v38, 768  ;;  %v2125_v57 = vadd.s32 %v6004_v42, %v2074_v33 }
 0x195   : > { %v2411_v2 = vsel %vm2264_vm8, %v2016_v60, 0.0  ;;  %v2555_v4 = vld [vmem:[#allocation3 + $0x21] sm:$0xff]  ;;  %vm2170_vm8 = vcmp.ge.s32.totalorder %v2121_v17, 0  ;;  %v2077_v17 = vadd.s32 144, %v6002_v41 }
 0x196   : > { %2460 = vst.msk [vmem:[#allocation3 + $0x38] sm:$0xff] %vm1390_vm15, %v2411_v2  ;;  %vm1919_vm11 = vcmp.ge.f32.partialorder %v1708_v62, 0.0  ;;  %v1968_v5 = vmul.f32 0.3, %v1708_v62  ;;  %2893 = vrot.lane.b32.xlu1 %v2602_v3, %s5310_s29  ;;  %2703 = vrot.lane.b32.xlu0 %v2555_v4, %s5305_s25  ;;  %v2603_v13 = vld [vmem:[#allocation3 + $0x22] sm:$0xff] }
 0x197   : > { %v1712_v6 = vpop.f32.mrb[18].mxu0 }
 0x198   : > { %v2017_v9 = vsel %vm1919_vm11, %v1708_v62, %v1968_v5  ;;  %v1713_v10 = vadd.f32 %v6012_v45, %v1712_v6  ;;  %v4745_v11 = vpop.f32.mrb[19].mxu0  ;;  %vm2268_vm11 = vmand %vm2170_vm8, %vm2219_vm9  ;;  %vm2222_vm8 = vcmp.lt.s32.totalorder %v2124_v48, 768  ;;  %v2126_v6 = vadd.s32 %v6004_v42, %v2075_v58 }
 0x199   : > { %v2412_v12 = vsel %vm2265_vm12, %v2017_v9, 0.0  ;;  %v2556_v14 = vld [vmem:[#allocation3 + $0x29] sm:$0xff]  ;;  %vm2171_vm12 = vcmp.ge.s32.totalorder %v2122_v27, 0  ;;  %v2078_v27 = vadd.s32 152, %v6002_v41 }
 0x19a   : > { %2461 = vst.msk [vmem:[#allocation3 + $0x40] sm:$0xff] %vm1390_vm15, %v2412_v12  ;;  %vm1920_vm0 = vcmp.ge.f32.partialorder %v1713_v10, 0.0  ;;  %v1969_v15 = vmul.f32 0.3, %v1713_v10  ;;  %2895 = vrot.lane.b32.xlu0 %v2603_v13, %s5310_s29  ;;  %2705 = vrot.lane.b32.xlu1 %v2556_v14, %s5305_s25  ;;  %v2604_v23 = vld [vmem:[#allocation3 + $0x2a] sm:$0xff] }
 0x19b   : > { %v1717_v16 = vpop.f32.mrb[20].mxu0 }
 0x19c   : > { %v2018_v19 = vsel %vm1920_vm0, %v1713_v10, %v1969_v15  ;;  %v1718_v20 = vadd.f32 %v6012_v45, %v1717_v16  ;;  %v4748_v21 = vpop.f32.mrb[21].mxu0  ;;  %vm2269_vm0 = vmand %vm2171_vm12, %vm2220_vm13  ;;  %vm2223_vm12 = vcmp.lt.s32.totalorder %v2125_v57, 768  ;;  %v2127_v16 = vadd.s32 %v6004_v42, %v2076_v7 }
 0x19d   : > { %v2413_v22 = vsel %vm2266_vm6, %v2018_v19, 0.0  ;;  %v2557_v24 = vld [vmem:[#allocation3 + $0x31] sm:$0xff]  ;;  %vm2172_vm6 = vcmp.ge.s32.totalorder %v2123_v38, 0  ;;  %v2079_v38 = vadd.s32 160, %v6002_v41 }
 0x19e   : > { %2462 = vst.msk [vmem:[#allocation3 + $0x48] sm:$0xff] %vm1390_vm15, %v2413_v22  ;;  %vm1921_vm5 = vcmp.ge.f32.partialorder %v1718_v20, 0.0  ;;  %v1970_v25 = vmul.f32 0.3, %v1718_v20  ;;  %2897 = vrot.lane.b32.xlu1 %v2604_v23, %s5310_s29  ;;  %2707 = vrot.lane.b32.xlu0 %v2557_v24, %s5305_s25  ;;  %v2605_v34 = vld [vmem:[#allocation3 + $0x32] sm:$0xff] }
 0x19f   : > { %v1722_v26 = vpop.f32.mrb[22].mxu0 }
 0x1a0   : > { %v2019_v29 = vsel %vm1921_vm5, %v1718_v20, %v1970_v25  ;;  %v1723_v30 = vadd.f32 %v6012_v45, %v1722_v26  ;;  %v4751_v31 = vpop.f32.mrb[23].mxu0  ;;  %vm2270_vm5 = vmand %vm2172_vm6, %vm2221_vm2  ;;  %vm2224_vm6 = vcmp.lt.s32.totalorder %v2126_v6, 768  ;;  %v2128_v26 = vadd.s32 %v6004_v42, %v2077_v17 }
 0x1a1   : > { %v2414_v32 = vsel %vm2267_vm7, %v2019_v29, 0.0  ;;  %v2558_v35 = vld [vmem:[#allocation3 + $0x39] sm:$0xff]  ;;  %vm2173_vm7 = vcmp.ge.s32.totalorder %v2124_v48, 0  ;;  %v2080_v48 = vadd.s32 168, %v6002_v41 }
 0x1a2   : > { %2463 = vst.msk [vmem:[#allocation3 + $0x50] sm:$0xff] %vm1390_vm15, %v2414_v32  ;;  %vm1922_vm10 = vcmp.ge.f32.partialorder %v1723_v30, 0.0  ;;  %v1971_v36 = vmul.f32 0.3, %v1723_v30  ;;  %2899 = vrot.lane.b32.xlu0 %v2605_v34, %s5310_s29  ;;  %2709 = vrot.lane.b32.xlu1 %v2558_v35, %s5305_s25  ;;  %v2606_v44 = vld [vmem:[#allocation3 + $0x3a] sm:$0xff] }
 0x1a3   : > { %v1727_v37 = vpop.f32.mrb[24].mxu0 }
 0x1a4   : > { %v2020_v40 = vsel %vm1922_vm10, %v1723_v30, %v1971_v36  ;;  %v1728_v0 = vadd.f32 %v6012_v45, %v1727_v37  ;;  %v4754_v1 = vpop.f32.mrb[25].mxu0  ;;  %vm2271_vm10 = vmand %vm2173_vm7, %vm2222_vm8  ;;  %vm2225_vm7 = vcmp.lt.s32.totalorder %v2127_v16, 768  ;;  %v2129_v37 = vadd.s32 %v6004_v42, %v2078_v27 }
 0x1a5   : > { %v2415_v43 = vsel %vm2268_vm11, %v2020_v40, 0.0  ;;  %v2559_v61 = vld [vmem:[#allocation3 + $0x41] sm:$0xff]  ;;  %vm2174_vm11 = vcmp.ge.s32.totalorder %v2125_v57, 0  ;;  %v2081_v57 = vadd.s32 176, %v6002_v41 }
 0x1a6   : > { %2464 = vst.msk [vmem:[#allocation3 + $0x58] sm:$0xff] %vm1390_vm15, %v2415_v43  ;;  %vm1923_vm14 = vcmp.ge.f32.partialorder %v1728_v0, 0.0  ;;  %v1972_v46 = vmul.f32 0.3, %v1728_v0  ;;  %2901 = vrot.lane.b32.xlu1 %v2606_v44, %s5310_s29  ;;  %2711 = vrot.lane.b32.xlu0 %v2559_v61, %s5305_s25  ;;  %v2607_v53 = vld [vmem:[#allocation3 + $0x42] sm:$0xff] }
 0x1a7   : > { %v1732_v47 = vpop.f32.mrb[26].mxu0 }
 0x1a8   : > { %v2021_v49 = vsel %vm1923_vm14, %v1728_v0, %v1972_v46  ;;  %v1733_v50 = vadd.f32 %v6012_v45, %v1732_v47  ;;  %v4757_v51 = vpop.f32.mrb[27].mxu0  ;;  %vm2272_vm14 = vmand %vm2174_vm11, %vm2223_vm12  ;;  %vm2226_vm11 = vcmp.lt.s32.totalorder %v2128_v26, 768  ;;  %v2130_v47 = vadd.s32 %v6004_v42, %v2079_v38 }
 0x1a9   : > { %v2416_v52 = vsel %vm2269_vm0, %v2021_v49, 0.0  ;;  %v2560_v54 = vld [vmem:[#allocation3 + $0x49] sm:$0xff]  ;;  %vm2175_vm0 = vcmp.ge.s32.totalorder %v2126_v6, 0  ;;  %v2082_v6 = vadd.s32 184, %v6002_v41 }
 0x1aa   : > { %2465 = vst.msk [vmem:[#allocation3 + $0x60] sm:$0xff] %vm1390_vm15, %v2416_v52  ;;  %vm1924_vm4 = vcmp.ge.f32.partialorder %v1733_v50, 0.0  ;;  %v1973_v55 = vmul.f32 0.3, %v1733_v50  ;;  %2903 = vrot.lane.b32.xlu0 %v2607_v53, %s5310_s29  ;;  %2713 = vrot.lane.b32.xlu1 %v2560_v54, %s5305_s25  ;;  %v2608_v2 = vld [vmem:[#allocation3 + $0x4a] sm:$0xff] }
 0x1ab   : > { %v1737_v56 = vpop.f32.mrb[28].mxu0 }
 0x1ac   : > { %v2022_v59 = vsel %vm1924_vm4, %v1733_v50, %v1973_v55  ;;  %v1738_v60 = vadd.f32 %v6012_v45, %v1737_v56  ;;  %v4760_v62 = vpop.f32.mrb[29].mxu0  ;;  %vm2273_vm4 = vmand %vm2175_vm0, %vm2224_vm6  ;;  %vm2227_vm0 = vcmp.lt.s32.totalorder %v2129_v37, 768  ;;  %v2131_v56 = vadd.s32 %v6004_v42, %v2080_v48 }
 0x1ad   : > { %v2417_v63 = vsel %vm2270_vm5, %v2022_v59, 0.0  ;;  %v2561_v3 = vld [vmem:[#allocation3 + $0x51] sm:$0xff]  ;;  %vm2176_vm5 = vcmp.ge.s32.totalorder %v2127_v16, 0  ;;  %v2083_v16 = vadd.s32 192, %v6002_v41 }
 0x1ae   : > { %2466 = vst.msk [vmem:[#allocation3 + $0x68] sm:$0xff] %vm1390_vm15, %v2417_v63  ;;  %vm1925_vm9 = vcmp.ge.f32.partialorder %v1738_v60, 0.0  ;;  %v1974_v4 = vmul.f32 0.3, %v1738_v60  ;;  %2905 = vrot.lane.b32.xlu1 %v2608_v2, %s5310_s29  ;;  %2715 = vrot.lane.b32.xlu0 %v2561_v3, %s5305_s25  ;;  %v2609_v12 = vld [vmem:[#allocation3 + $0x52] sm:$0xff] }
 0x1af   : > { %v1742_v5 = vpop.f32.mrb[30].mxu0 }
 0x1b0   : > { %v2023_v8 = vsel %vm1925_vm9, %v1738_v60, %v1974_v4  ;;  %v1743_v9 = vadd.f32 %v6012_v45, %v1742_v5  ;;  %v4763_v10 = vpop.f32.mrb[31].mxu0  ;;  %vm2274_vm9 = vmand %vm2176_vm5, %vm2225_vm7  ;;  %vm2228_vm5 = vcmp.lt.s32.totalorder %v2130_v47, 768  ;;  %v2132_v5 = vadd.s32 %v6004_v42, %v2081_v57 }
 0x1b1   : > { %v2418_v11 = vsel %vm2271_vm10, %v2023_v8, 0.0  ;;  %v2562_v13 = vld [vmem:[#allocation3 + $0x59] sm:$0xff]  ;;  %vm2177_vm10 = vcmp.ge.s32.totalorder %v2128_v26, 0  ;;  %v2084_v26 = vadd.s32 200, %v6002_v41 }
 0x1b2   : > { %2467 = vst.msk [vmem:[#allocation3 + $0x70] sm:$0xff] %vm1390_vm15, %v2418_v11  ;;  %vm1926_vm13 = vcmp.ge.f32.partialorder %v1743_v9, 0.0  ;;  %v1975_v14 = vmul.f32 0.3, %v1743_v9  ;;  %2907 = vrot.lane.b32.xlu0 %v2609_v12, %s5310_s29  ;;  %2717 = vrot.lane.b32.xlu1 %v2562_v13, %s5305_s25  ;;  %v2610_v22 = vld [vmem:[#allocation3 + $0x5a] sm:$0xff] }
 0x1b3   : > { %v1747_v15 = vpop.f32.mrb[32].mxu0 }
 0x1b4   : > { %v2024_v18 = vsel %vm1926_vm13, %v1743_v9, %v1975_v14  ;;  %v1748_v19 = vadd.f32 %v6012_v45, %v1747_v15  ;;  %v4766_v20 = vpop.f32.mrb[33].mxu0  ;;  %vm2275_vm13 = vmand %vm2177_vm10, %vm2226_vm11  ;;  %vm2229_vm10 = vcmp.lt.s32.totalorder %v2131_v56, 768  ;;  %v2133_v15 = vadd.s32 %v6004_v42, %v2082_v6 }
 0x1b5   : > { %v2419_v21 = vsel %vm2272_vm14, %v2024_v18, 0.0  ;;  %v2563_v23 = vld [vmem:[#allocation3 + $0x61] sm:$0xff]  ;;  %vm2178_vm14 = vcmp.ge.s32.totalorder %v2129_v37, 0  ;;  %v2085_v37 = vadd.s32 208, %v6002_v41 }
 0x1b6   : > { %2468 = vst.msk [vmem:[#allocation3 + $0x78] sm:$0xff] %vm1390_vm15, %v2419_v21  ;;  %vm1927_vm2 = vcmp.ge.f32.partialorder %v1748_v19, 0.0  ;;  %v1976_v24 = vmul.f32 0.3, %v1748_v19  ;;  %2909 = vrot.lane.b32.xlu1 %v2610_v22, %s5310_s29  ;;  %2719 = vrot.lane.b32.xlu0 %v2563_v23, %s5305_s25  ;;  %v2611_v32 = vld [vmem:[#allocation3 + $0x62] sm:$0xff] }
 0x1b7   : > { %v1752_v25 = vpop.f32.mrb[34].mxu0 }
 0x1b8   : > { %v2025_v28 = vsel %vm1927_vm2, %v1748_v19, %v1976_v24  ;;  %v1753_v29 = vadd.f32 %v6012_v45, %v1752_v25  ;;  %v4769_v30 = vpop.f32.mrb[35].mxu0  ;;  %vm2276_vm2 = vmand %vm2178_vm14, %vm2227_vm0  ;;  %vm2230_vm14 = vcmp.lt.s32.totalorder %v2132_v5, 768  ;;  %v2134_v25 = vadd.s32 %v6004_v42, %v2083_v16 }
 0x1b9   : > { %v2420_v31 = vsel %vm2273_vm4, %v2025_v28, 0.0  ;;  %v2564_v34 = vld [vmem:[#allocation3 + $0x69] sm:$0xff]  ;;  %vm2179_vm4 = vcmp.ge.s32.totalorder %v2130_v47, 0  ;;  %v2086_v47 = vadd.s32 216, %v6002_v41 }
 0x1ba   : > { %2469 = vst.msk [vmem:[#allocation3 + $0x80] sm:$0xff] %vm1390_vm15, %v2420_v31  ;;  %vm1928_vm8 = vcmp.ge.f32.partialorder %v1753_v29, 0.0  ;;  %v1977_v35 = vmul.f32 0.3, %v1753_v29  ;;  %2911 = vrot.lane.b32.xlu0 %v2611_v32, %s5310_s29  ;;  %2721 = vrot.lane.b32.xlu1 %v2564_v34, %s5305_s25  ;;  %v2612_v43 = vld [vmem:[#allocation3 + $0x6a] sm:$0xff] }
 0x1bb   : > { %v1757_v36 = vpop.f32.mrb[36].mxu0 }
 0x1bc   : > { %v2026_v39 = vsel %vm1928_vm8, %v1753_v29, %v1977_v35  ;;  %v1758_v40 = vadd.f32 %v6012_v45, %v1757_v36  ;;  %v4772_v0 = vpop.f32.mrb[37].mxu0  ;;  %vm2277_vm8 = vmand %vm2179_vm4, %vm2228_vm5  ;;  %vm2231_vm4 = vcmp.lt.s32.totalorder %v2133_v15, 768  ;;  %v2135_v36 = vadd.s32 %v6004_v42, %v2084_v26 }
 0x1bd   : > { %v2421_v1 = vsel %vm2274_vm9, %v2026_v39, 0.0  ;;  %v2565_v44 = vld [vmem:[#allocation3 + $0x71] sm:$0xff]  ;;  %vm2180_vm9 = vcmp.ge.s32.totalorder %v2131_v56, 0  ;;  %v2087_v56 = vadd.s32 224, %v6002_v41 }
 0x1be   : > { %2470 = vst.msk [vmem:[#allocation3 + $0x88] sm:$0xff] %vm1390_vm15, %v2421_v1  ;;  %vm1929_vm12 = vcmp.ge.f32.partialorder %v1758_v40, 0.0  ;;  %v1978_v61 = vmul.f32 0.3, %v1758_v40  ;;  %2913 = vrot.lane.b32.xlu1 %v2612_v43, %s5310_s29  ;;  %2723 = vrot.lane.b32.xlu0 %v2565_v44, %s5305_s25  ;;  %v2613_v52 = vld [vmem:[#allocation3 + $0x72] sm:$0xff] }
 0x1bf   : > { %v1762_v46 = vpop.f32.mrb[38].mxu0  ;;  %v2138_v6 = vadd.s32 %v6004_v42, %v2087_v56 }
 0x1c0   : > { %v2027_v33 = vsel %vm1929_vm12, %v1758_v40, %v1978_v61  ;;  %v1763_v49 = vadd.f32 %v6012_v45, %v1762_v46  ;;  %v4775_v50 = vpop.f32.mrb[39].mxu0  ;;  %vm2278_vm12 = vmand %vm2180_vm9, %vm2229_vm10  ;;  %vm2232_vm9 = vcmp.lt.s32.totalorder %v2134_v25, 768  ;;  %v2136_v46 = vadd.s32 %v6004_v42, %v2085_v37 }
 0x1c1   : > { %v2422_v51 = vsel %vm2275_vm13, %v2027_v33, 0.0  ;;  %v2566_v53 = vld [vmem:[#allocation3 + $0x79] sm:$0xff]  ;;  %vm2181_vm13 = vcmp.ge.s32.totalorder %v2132_v5, 0 }
 0x1c2   : > { %2471 = vst.msk [vmem:[#allocation3 + $0x90] sm:$0xff] %vm1390_vm15, %v2422_v51  ;;  %vm1930_vm6 = vcmp.ge.f32.partialorder %v1763_v49, 0.0  ;;  %v1979_v54 = vmul.f32 0.3, %v1763_v49  ;;  %2915 = vrot.lane.b32.xlu0 %v2613_v52, %s5310_s29  ;;  %2725 = vrot.lane.b32.xlu1 %v2566_v53, %s5305_s25  ;;  %v2614_v63 = vld [vmem:[#allocation3 + $0x7a] sm:$0xff] }
 0x1c3   : > { %v1767_v55 = vpop.f32.mrb[40].mxu0 }
 0x1c4   : > { %v2028_v58 = vsel %vm1930_vm6, %v1763_v49, %v1979_v54  ;;  %v1768_v59 = vadd.f32 %v6012_v45, %v1767_v55  ;;  %v4778_v60 = vpop.f32.mrb[41].mxu0  ;;  %vm2279_vm6 = vmand %vm2181_vm13, %vm2230_vm14  ;;  %vm2233_vm13 = vcmp.lt.s32.totalorder %v2135_v36, 768  ;;  %v2137_v55 = vadd.s32 %v6004_v42, %v2086_v47 }
 0x1c5   : > { %v2423_v62 = vsel %vm2276_vm2, %v2028_v58, 0.0  ;;  %v2567_v2 = vld [vmem:[#allocation3 + $0x81] sm:$0xff]  ;;  %vm2182_vm2 = vcmp.ge.s32.totalorder %v2133_v15, 0 }
 0x1c6   : > { %2472 = vst.msk [vmem:[#allocation3 + $0x98] sm:$0xff] %vm1390_vm15, %v2423_v62  ;;  %vm1931_vm7 = vcmp.ge.f32.partialorder %v1768_v59, 0.0  ;;  %v1980_v3 = vmul.f32 0.3, %v1768_v59  ;;  %2917 = vrot.lane.b32.xlu1 %v2614_v63, %s5310_s29  ;;  %2727 = vrot.lane.b32.xlu0 %v2567_v2, %s5305_s25  ;;  %v2615_v11 = vld [vmem:[#allocation3 + $0x82] sm:$0xff] }
 0x1c7   : > { %v1772_v4 = vpop.f32.mrb[42].mxu0 }
 0x1c8   : > { %v2029_v7 = vsel %vm1931_vm7, %v1768_v59, %v1980_v3  ;;  %v1773_v8 = vadd.f32 %v6012_v45, %v1772_v4  ;;  %v4781_v9 = vpop.f32.mrb[43].mxu0  ;;  %vm2280_vm7 = vmand %vm2182_vm2, %vm2231_vm4  ;;  %vm2234_vm2 = vcmp.lt.s32.totalorder %v2136_v46, 768  ;;  %v6188_v4 = vld [vmem:[%s6871_s8] sm:$0xf] }
 0x1c9   : > { %v2424_v10 = vsel %vm2277_vm8, %v2029_v7, 0.0  ;;  %v2568_v12 = vld [vmem:[#allocation3 + $0x89] sm:$0xff]  ;;  %vm2183_vm8 = vcmp.ge.s32.totalorder %v2134_v25, 0  ;;  %v2088_v7 = vadd.s32 232, %v6002_v41  ;;  %4941 = vmatprep.subr.msk.mxu1 %vm1597_vm3, %v6188_v4 }
 0x1ca   : > { %2473 = vst.msk [vmem:[#allocation3 + $0xa0] sm:$0xff] %vm1390_vm15, %v2424_v10  ;;  %vm1932_vm11 = vcmp.ge.f32.partialorder %v1773_v8, 0.0  ;;  %v1981_v13 = vmul.f32 0.3, %v1773_v8  ;;  %2919 = vrot.lane.b32.xlu0 %v2615_v11, %s5310_s29  ;;  %2729 = vrot.lane.b32.xlu1 %v2568_v12, %s5305_s25  ;;  %v2616_v21 = vld [vmem:[#allocation3 + $0x8a] sm:$0xff] }
 0x1cb   : > { %v1777_v14 = vpop.f32.mrb[44].mxu0  ;;  %v2139_v16 = vadd.s32 %v6004_v42, %v2088_v7 }
 0x1cc   : > { %v2030_v17 = vsel %vm1932_vm11, %v1773_v8, %v1981_v13  ;;  %v1778_v18 = vadd.f32 %v6012_v45, %v1777_v14  ;;  %v4784_v19 = vpop.f32.mrb[45].mxu0  ;;  %vm2281_vm11 = vmand %vm2183_vm8, %vm2232_vm9  ;;  %vm2235_vm8 = vcmp.lt.s32.totalorder %v2137_v55, 768 }
 0x1cd   : > { %v2425_v20 = vsel %vm2278_vm12, %v2030_v17, 0.0  ;;  %v2569_v22 = vld [vmem:[#allocation3 + $0x91] sm:$0xff]  ;;  %vm2184_vm12 = vcmp.ge.s32.totalorder %v2135_v36, 0  ;;  %v2089_v17 = vadd.s32 240, %v6002_v41 }
 0x1ce   : > { %2474 = vst.msk [vmem:[#allocation3 + $0xa8] sm:$0xff] %vm1390_vm15, %v2425_v20  ;;  %vm1933_vm0 = vcmp.ge.f32.partialorder %v1778_v18, 0.0  ;;  %v1982_v23 = vmul.f32 0.3, %v1778_v18  ;;  %2921 = vrot.lane.b32.xlu1 %v2616_v21, %s5310_s29  ;;  %2731 = vrot.lane.b32.xlu0 %v2569_v22, %s5305_s25  ;;  %v2617_v31 = vld [vmem:[#allocation3 + $0x92] sm:$0xff] }
 0x1cf   : > { %v1782_v24 = vpop.f32.mrb[46].mxu0  ;;  %v2140_v26 = vadd.s32 %v6004_v42, %v2089_v17 }
 0x1d0   : > { %v2031_v27 = vsel %vm1933_vm0, %v1778_v18, %v1982_v23  ;;  %v1783_v28 = vadd.f32 %v6012_v45, %v1782_v24  ;;  %v4787_v29 = vpop.f32.mrb[47].mxu0  ;;  %vm2282_vm0 = vmand %vm2184_vm12, %vm2233_vm13  ;;  %vm2236_vm12 = vcmp.lt.s32.totalorder %v2138_v6, 768 }
 0x1d1   : > { %v2426_v30 = vsel %vm2279_vm6, %v2031_v27, 0.0  ;;  %v2570_v32 = vld [vmem:[#allocation3 + $0x99] sm:$0xff]  ;;  %vm2185_vm6 = vcmp.ge.s32.totalorder %v2136_v46, 0  ;;  %v2090_v27 = vadd.s32 248, %v6002_v41 }
 0x1d2   : > { %2475 = vst.msk [vmem:[#allocation3 + $0xb0] sm:$0xff] %vm1390_vm15, %v2426_v30  ;;  %vm1934_vm5 = vcmp.ge.f32.partialorder %v1783_v28, 0.0  ;;  %v1983_v34 = vmul.f32 0.3, %v1783_v28  ;;  %2923 = vrot.lane.b32.xlu0 %v2617_v31, %s5310_s29  ;;  %2733 = vrot.lane.b32.xlu1 %v2570_v32, %s5305_s25  ;;  %v2618_v1 = vld [vmem:[#allocation3 + $0x9a] sm:$0xff] }
 0x1d3   : > { %v1787_v35 = vpop.f32.mrb[48].mxu0  ;;  %v2141_v37 = vadd.s32 %v6004_v42, %v2090_v27 }
 0x1d4   : > { %v2032_v38 = vsel %vm1934_vm5, %v1783_v28, %v1983_v34  ;;  %v1788_v39 = vadd.f32 %v6012_v45, %v1787_v35  ;;  %v4790_v40 = vpop.f32.mrb[49].mxu0  ;;  %vm6179_vm5 = vmand %vm2185_vm6, %vm2234_vm2  ;;  %vm2237_vm6 = vcmp.lt.s32.totalorder %v2139_v16, 768 }
 0x1d5   : > { %v2427_v0 = vsel %vm2280_vm7, %v2032_v38, 0.0  ;;  %v2571_v43 = vld [vmem:[#allocation3 + $0xa1] sm:$0xff]  ;;  %vm2186_vm7 = vcmp.ge.s32.totalorder %v2137_v55, 0  ;;  %v2091_v38 = vadd.s32 256, %v6002_v41 }
 0x1d6   : > { %2476 = vst.msk [vmem:[#allocation3 + $0xb8] sm:$0xff] %vm1390_vm15, %v2427_v0  ;;  %vm1935_vm10 = vcmp.ge.f32.partialorder %v1788_v39, 0.0  ;;  %v1984_v44 = vmul.f32 0.3, %v1788_v39  ;;  %2925 = vrot.lane.b32.xlu1 %v2618_v1, %s5310_s29  ;;  %2735 = vrot.lane.b32.xlu0 %v2571_v43, %s5305_s25  ;;  %v2619_v51 = vld [vmem:[#allocation3 + $0xa2] sm:$0xff] }
 0x1d7   : > { %v1792_v61 = vpop.f32.mrb[50].mxu0 }
 0x1d8   : > { %v2033_v48 = vsel %vm1935_vm10, %v1788_v39, %v1984_v44  ;;  %v1793_v33 = vadd.f32 %v6012_v45, %v1792_v61  ;;  %v4793_v49 = vpop.f32.mrb[51].mxu0  ;;  %vm2284_vm10 = vmand %vm2186_vm7, %vm2235_vm8  ;;  %vm2238_vm7 = vcmp.lt.s32.totalorder %v2140_v26, 768 }
 0x1d9   : > { %v2428_v50 = vsel %vm2281_vm11, %v2033_v48, 0.0  ;;  %v2572_v52 = vld [vmem:[#allocation3 + $0xa9] sm:$0xff]  ;;  %vm2187_vm11 = vcmp.ge.s32.totalorder %v2138_v6, 0  ;;  %v2092_v48 = vadd.s32 264, %v6002_v41  ;;  %v6227_v49 = vld [vmem:[%s6866_s3] ss:$0 sm:$0xff] }
 0x1da   : > { %2477 = vst.msk [vmem:[#allocation3 + $0xc0] sm:$0xff] %vm1390_vm15, %v2428_v50  ;;  %vm1936_vm14 = vcmp.ge.f32.partialorder %v1793_v33, 0.0  ;;  %v1985_v53 = vmul.f32 0.3, %v1793_v33  ;;  %2927 = vrot.lane.b32.xlu0 %v2619_v51, %s5310_s29  ;;  %2737 = vrot.lane.b32.xlu1 %v2572_v52, %s5305_s25  ;;  %v2620_v62 = vld [vmem:[#allocation3 + $0xaa] sm:$0xff]  ;;  %v2506_v6 = vld [vmem:[#allocation3 + $0x18] sm:$0xff] }
 0x1db   : > { %v1797_v54 = vpop.f32.mrb[52].mxu0 }
 0x1dc   : > { %v2034_v57 = vsel %vm1936_vm14, %v1793_v33, %v1985_v53  ;;  %v1798_v58 = vadd.f32 %v6012_v45, %v1797_v54  ;;  %v4796_v59 = vpop.f32.mrb[53].mxu0  ;;  %vm2285_vm14 = vmand %vm2187_vm11, %vm2236_vm12  ;;  %vm2239_vm11 = vcmp.lt.s32.totalorder %v2141_v37, 768 }
 0x1dd   : > { %v2429_v60 = vsel %vm2282_vm0, %v2034_v57, 0.0  ;;  %v2573_v63 = vld [vmem:[#allocation3 + $0xb1] sm:$0xff]  ;;  %vm2188_vm0 = vcmp.ge.s32.totalorder %v2139_v16, 0  ;;  %v2143_v57 = vadd.s32 %v6004_v42, %v2092_v48 }
 0x1de   : > { %2478 = vst.msk [vmem:[#allocation3 + $0xc8] sm:$0xff] %vm1390_vm15, %v2429_v60  ;;  %vm1937_vm4 = vcmp.ge.f32.partialorder %v1798_v58, 0.0  ;;  %v1986_v2 = vmul.f32 0.3, %v1798_v58  ;;  %2929 = vrot.lane.b32.xlu1 %v2620_v62, %s5310_s29  ;;  %2739 = vrot.lane.b32.xlu0 %v2573_v63, %s5305_s25  ;;  %v2621_v12 = vld [vmem:[#allocation3 + $0xb2] sm:$0xff] }
 0x1df   : > { %v1802_v5 = vpop.f32.mrb[54].mxu0 }
 0x1e0   : > { %v2035_v8 = vsel %vm1937_vm4, %v1798_v58, %v1986_v2  ;;  %v1803_v9 = vadd.f32 %v6012_v45, %v1802_v5  ;;  %v4799_v10 = vpop.f32.mrb[55].mxu0  ;;  %vm2286_vm4 = vmand %vm2188_vm0, %vm2237_vm6  ;;  %v2093_v58 = vadd.s32 272, %v6002_v41 }
 0x1e1   : > { %v2430_v11 = vsel %vm6179_vm5, %v2035_v8, 0.0  ;;  %v2574_v13 = vld [vmem:[#allocation3 + $0xb9] sm:$0xff]  ;;  %vm2189_vm5 = vcmp.ge.s32.totalorder %v2140_v26, 0 }
 0x1e2   : > { %2479 = vst.msk [vmem:[#allocation3 + $0xd0] sm:$0xff] %vm1390_vm15, %v2430_v11  ;;  %vm1938_vm9 = vcmp.ge.f32.partialorder %v1803_v9, 0.0  ;;  %v1987_v14 = vmul.f32 0.3, %v1803_v9  ;;  %2931 = vrot.lane.b32.xlu0 %v2621_v12, %s5310_s29  ;;  %2741 = vrot.lane.b32.xlu1 %v2574_v13, %s5305_s25  ;;  %v2622_v22 = vld [vmem:[#allocation3 + $0xba] sm:$0xff]  ;;  %v2144_v8 = vadd.s32 %v6004_v42, %v2093_v58 }
 0x1e3   : > { %v1807_v15 = vpop.f32.mrb[56].mxu0 }
 0x1e4   : > { %v2036_v18 = vsel %vm1938_vm9, %v1803_v9, %v1987_v14  ;;  %v1808_v19 = vadd.f32 %v6012_v45, %v1807_v15  ;;  %v4802_v20 = vpop.f32.mrb[57].mxu0  ;;  %vm6216_vm9 = vmand %vm2189_vm5, %vm2238_vm7  ;;  %vm2241_vm5 = vcmp.lt.s32.totalorder %v2143_v57, 768  ;;  %v2094_v9 = vadd.s32 280, %v6002_v41 }
 0x1e5   : > { %v2431_v21 = vsel %vm2284_vm10, %v2036_v18, 0.0  ;;  %v2575_v23 = vld [vmem:[#allocation3 + $0xc1] sm:$0xff]  ;;  %vm2190_vm10 = vcmp.ge.s32.totalorder %v2141_v37, 0 }
 0x1e6   : > { %2480 = vst.msk [vmem:[#allocation3 + $0xd8] sm:$0xff] %vm1390_vm15, %v2431_v21  ;;  %vm1939_vm13 = vcmp.ge.f32.partialorder %v1808_v19, 0.0  ;;  %v1988_v24 = vmul.f32 0.3, %v1808_v19  ;;  %2933 = vrot.lane.b32.xlu1 %v2622_v22, %s5310_s29  ;;  %2743 = vrot.lane.b32.xlu0 %v2575_v23, %s5305_s25  ;;  %v2623_v32 = vld [vmem:[#allocation3 + $0xc2] sm:$0xff]  ;;  %v2145_v21 = vadd.s32 %v6004_v42, %v2094_v9  ;;  %v2095_v22 = vadd.s32 288, %v6002_v41 }
 0x1e7   : > { %v1812_v25 = vpop.f32.mrb[58].mxu0  ;;  %v2098_v9 = vadd.s32 312, %v6002_v41 }
 0x1e8   : > { %v2037_v28 = vsel %vm1939_vm13, %v1808_v19, %v1988_v24  ;;  %v1813_v29 = vadd.f32 %v6012_v45, %v1812_v25  ;;  %v4805_v30 = vpop.f32.mrb[59].mxu0  ;;  %vm2288_vm13 = vmand %vm2190_vm10, %vm2239_vm11  ;;  %vm3138_vm10 = vcmask 195584   ;;  %v2503_v19 = vld [vmem:[#allocation3] sm:$0xff]  ;;  %vm2193_vm11 = vcmp.ge.s32.totalorder %v2144_v8, 0 }
 0x1e9   : > { %v2432_v31 = vsel %vm2285_vm14, %v2037_v28, 0.0  ;;  %v2576_v34 = vld [vmem:[#allocation3 + $0xc9] sm:$0xff] }
 0x1ea   : > { %2481 = vst.msk [vmem:[#allocation3 + $0xe0] sm:$0xff] %vm1390_vm15, %v2432_v31  ;;  %vm1940_vm2 = vcmp.ge.f32.partialorder %v1813_v29, 0.0  ;;  %v1989_v35 = vmul.f32 0.3, %v1813_v29  ;;  %2935 = vrot.lane.b32.xlu0 %v2623_v32, %s5310_s29  ;;  %2745 = vrot.lane.b32.xlu1 %v2576_v34, %s5305_s25  ;;  %v2624_v43 = vld [vmem:[#allocation3 + $0xca] sm:$0xff] }
 0x1eb   : > { %v1817_v36 = vpop.f32.mrb[60].mxu0 }
 0x1ec   : > { %v2038_v39 = vsel %vm1940_vm2, %v1813_v29, %v1989_v35  ;;  %v1818_v40 = vadd.f32 %v6012_v45, %v1817_v36  ;;  %v4808_v0 = vpop.f32.mrb[61].mxu0  ;;  %v2142_v45 = vadd.s32 %v6004_v42, %v2091_v38  ;;  %v2504_v36 = vld [vmem:[#allocation3 + $0x8] sm:$0xff]  ;;  %v2146_v38 = vadd.s32 %v6004_v42, %v2095_v22  ;;  %v2507_v22 = vld [vmem:[#allocation3 + $0x20] sm:$0xff] }
 0x1ed   : > { %v2433_v1 = vsel %vm2286_vm4, %v2038_v39, 0.0  ;;  %v2577_v44 = vld [vmem:[#allocation3 + $0xd1] sm:$0xff]  ;;  %vm2192_vm4 = vcmp.ge.s32.totalorder %v2143_v57, 0  ;;  %v2096_v39 = vadd.s32 296, %v6002_v41 }
 0x1ee   : > { %2482 = vst.msk [vmem:[#allocation3 + $0xe8] sm:$0xff] %vm1390_vm15, %v2433_v1  ;;  %vm1941_vm8 = vcmp.ge.f32.partialorder %v1818_v40, 0.0  ;;  %v1990_v61 = vmul.f32 0.3, %v1818_v40  ;;  %2937 = vrot.lane.b32.xlu1 %v2624_v43, %s5310_s29  ;;  %2747 = vrot.lane.b32.xlu0 %v2577_v44, %s5305_s25  ;;  %v2625_v53 = vld [vmem:[#allocation3 + $0xd2] sm:$0xff]  ;;  %vm2191_vm14 = vcmp.ge.s32.totalorder %v2142_v45, 0 }
 0x1ef   : > { %v1822_v47 = vpop.f32.mrb[62].mxu0  ;;  %vm2240_vm0 = vcmp.lt.s32.totalorder %v2142_v45, 768 }
 0x1f0   : > { %v2039_v33 = vsel %vm1941_vm8, %v1818_v40, %v1990_v61  ;;  %v1823_v50 = vadd.f32 %v6227_v49, %v1822_v47  ;;  %v4811_v51 = vpop.f32.mrb[63].mxu0  ;;  %vm6239_vm2 = vmand %vm2191_vm14, %vm2240_vm0  ;;  %vm2194_vm0 = vcmp.ge.s32.totalorder %v2145_v21, 0 }
 0x1f1   : > { %v2434_v52 = vsel %vm6216_vm9, %v2039_v33, 0.0  ;;  %v2578_v54 = vld [vmem:[#allocation3 + $0xd9] sm:$0xff]  ;;  %vm6251_vm8 = vmand %vm2192_vm4, %vm2241_vm5  ;;  %vm3079_vm9 = vcmask 130048   ;;  %v2505_v51 = vld [vmem:[#allocation3 + $0x10] sm:$0xff]  ;;  %vm2195_vm5 = vcmp.ge.s32.totalorder %v2146_v38, 0 }
 0x1f2   : > { %2483 = vst.msk [vmem:[#allocation3 + $0xf0] sm:$0xff] %vm1390_vm15, %v2434_v52  ;;  %vm1942_vm12 = vcmp.ge.f32.partialorder %v1823_v50, 0.0  ;;  %v1991_v55 = vmul.f32 0.3, %v1823_v50  ;;  %2939 = vrot.lane.b32.xlu0 %v2625_v53, %s5310_s29  ;;  %2749 = vrot.lane.b32.xlu1 %v2578_v54, %s5305_s25  ;;  %v2626_v2 = vld [vmem:[#allocation3 + $0xda] sm:$0xff]  ;;  %v2147_v53 = vadd.s32 %v6004_v42, %v2096_v39  ;;  %v2097_v54 = vadd.s32 304, %v6002_v41 }
 0x1f3   : > { %v1827_v56 = vpop.f32.mrb[64].mxu0  ;;  %v2508_v39 = vld [vmem:[#allocation3 + $0x28] sm:$0xff] }
 0x1f4   : > { %v2040_v59 = vsel %vm1942_vm12, %v1823_v50, %v1991_v55  ;;  %v1828_v60 = vadd.f32 %v6227_v49, %v1827_v56  ;;  %v4814_v62 = vpop.f32.mrb[65].mxu0  ;;  %vm2242_vm12 = vcmp.lt.s32.totalorder %v2144_v8, 768  ;;  %v2148_v8 = vadd.s32 %v6004_v42, %v2097_v54  ;;  %v2509_v54 = vld [vmem:[#allocation3 + $0x30] sm:$0xff] }
 0x1f5   : > { %v2435_v63 = vsel %vm2288_vm13, %v2040_v59, 0.0  ;;  %v2579_v3 = vld [vmem:[#allocation3 + $0xe1] sm:$0xff]  ;;  %vm6267_vm14 = vmand %vm2193_vm11, %vm2242_vm12  ;;  %vm2196_vm11 = vcmp.ge.s32.totalorder %v2147_v53, 0  ;;  %vm2245_vm12 = vcmp.lt.s32.totalorder %v2147_v53, 768 }
 0x1f6   : > { %2484 = vst.msk [vmem:[#allocation3 + $0xf8] sm:$0xff] %vm1390_vm15, %v2435_v63  ;;  %vm1943_vm6 = vcmp.ge.f32.partialorder %v1828_v60, 0.0  ;;  %v1992_v5 = vmul.f32 0.3, %v1828_v60  ;;  %2941 = vrot.lane.b32.xlu1 %v2626_v2, %s5310_s29  ;;  %2751 = vrot.lane.b32.xlu0 %v2579_v3, %s5305_s25  ;;  %v2627_v15 = vld [vmem:[#allocation3 + $0xe2] sm:$0xff] }
 0x1f7   : > { %v1832_v7 = vpop.f32.mrb[66].mxu0 }
 0x1f8   : > { %v2041_v10 = vsel %vm1943_vm6, %v1828_v60, %v1992_v5  ;;  %v1833_v11 = vadd.f32 %v6227_v49, %v1832_v7  ;;  %v2696_v12 = vpop.permute.xlu0 %2695  ;;  %v4817_v13 = vpop.f32.mrb[67].mxu0  ;;  %vm2243_vm6 = vcmp.lt.s32.totalorder %v2145_v21, 768 }
 0x1f9   : > { %v2436_v14 = vsel %vm6239_vm2, %v2041_v10, 0.0  ;;  %v2580_v16 = vld [vmem:[#allocation3 + $0xe9] sm:$0xff]  ;;  %v3031_v24 = vsel %vm1390_vm15, %v2503_v19, %v2696_v12  ;;  %vm6284_vm4 = vmand %vm2194_vm0, %vm2243_vm6  ;;  %vm2197_vm0 = vcmp.ge.s32.totalorder %v2148_v8, 0  ;;  %vm2246_vm6 = vcmp.lt.s32.totalorder %v2148_v8, 768 }
 0x1fa   : > { %2485 = vst.msk [vmem:[#allocation3 + $0x100] sm:$0xff] %vm1390_vm15, %v2436_v14  ;;  %vm1944_vm7 = vcmp.ge.f32.partialorder %v1833_v11, 0.0  ;;  %v1993_v17 = vmul.f32 0.3, %v1833_v11  ;;  %2943 = vrot.lane.b32.xlu0 %v2627_v15, %s5310_s29  ;;  %2753 = vrot.lane.b32.xlu1 %v2580_v16, %s5305_s25  ;;  %v2628_v31 = vld [vmem:[#allocation3 + $0xea] sm:$0xff] }
 0x1fb   : > { %v1837_v20 = vpop.f32.mrb[68].mxu0 }
 0x1fc   : > { %v2042_v23 = vsel %vm1944_vm7, %v1833_v11, %v1993_v17  ;;  %v1838_v25 = vadd.f32 %v6227_v49, %v1837_v20  ;;  %v2888_v26 = vpop.permute.xlu0 %2887  ;;  %v2698_v27 = vpop.permute.xlu1 %2697  ;;  %vm2244_vm7 = vcmp.lt.s32.totalorder %v2146_v38, 768 }
 0x1fd   : > { %v2437_v28 = vsel %vm6251_vm8, %v2042_v23, 0.0  ;;  %v4820_v29 = vpop.f32.mrb[69].mxu0  ;;  %v3080_v30 = vsel %vm3079_vm9, %v3031_v24, %v2888_v26  ;;  %v2581_v32 = vld [vmem:[#allocation3 + $0xf1] sm:$0xff]  ;;  %v3032_v0 = vsel %vm1390_vm15, %v2504_v36, %v2698_v27  ;;  %v2149_v24 = vadd.s32 %v6004_v42, %v2098_v9 }
 0x1fe   : > { %2486 = vst.msk [vmem:[#allocation3 + $0x108] sm:$0xff] %vm1390_vm15, %v2437_v28  ;;  %vm1945_vm13 = vcmp.ge.f32.partialorder %v1838_v25, 0.0  ;;  %v1994_v34 = vmul.f32 0.3, %v1838_v25  ;;  %4869 = vmatprep.mubr.msk.f32.mxu1 %vm3138_vm10, %v3080_v30  ;;  %2945 = vrot.lane.b32.xlu1 %v2628_v31, %s5310_s29  ;;  %v2629_v50 = vld [vmem:[#allocation3 + $0xf2] sm:$0xff] }
 0x1ff   : > { %2755 = vrot.lane.b32.xlu0 %v2581_v32, %s5305_s25  ;;  %v1842_v37 = vpop.f32.mrb[70].mxu0  ;;  %v2510_v9 = vld [vmem:[#allocation3 + $0x38] sm:$0xff] }
 0x200   : > { %v2043_v40 = vsel %vm1945_vm13, %v1838_v25, %v1994_v34  ;;  %v1843_v1 = vadd.f32 %v6227_v49, %v1842_v37  ;;  %v2890_v43 = vpop.permute.xlu1 %2889  ;;  %v2700_v44 = vpop.permute.xlu0 %2699  ;;  %v2099_v25 = vadd.s32 320, %v6002_v41 }
 0x201   : > { %v2438_v61 = vsel %vm6267_vm14, %v2043_v40, 0.0  ;;  %v3081_v46 = vsel %vm3079_vm9, %v3032_v0, %v2890_v43  ;;  %v4823_v47 = vpop.f32.mrb[71].mxu0  ;;  %v2582_v45 = vld [vmem:[#allocation3 + $0xf9] sm:$0xff]  ;;  %v3033_v56 = vsel %vm1390_vm15, %v2505_v51, %v2700_v44  ;;  %vm6320_vm14 = vmand %vm2196_vm11, %vm2245_vm12 }
 0x202   : > { %2487 = vst.msk [vmem:[#allocation3 + $0x110] sm:$0xff] %vm1390_vm15, %v2438_v61  ;;  %vm1946_vm2 = vcmp.ge.f32.partialorder %v1843_v1, 0.0  ;;  %v1995_v48 = vmul.f32 0.3, %v1843_v1  ;;  %4870 = vmatmul.mubr.msk.f32.vlgmr.msra.gmra.mrb[0].mxu1 %vm3138_vm10, %v3081_v46  ;;  %2757 = vrot.lane.b32.xlu1 %v2582_v45, %s5305_s25  ;;  %v2630_v2 = vld [vmem:[#allocation3 + $0xfa] sm:$0xff]  ;;  %v2150_v0 = vadd.s32 %v6004_v42, %v2099_v25 }
 0x203   : > { %2947 = vrot.lane.b32.xlu0 %v2629_v50, %s5310_s29  ;;  %v1847_v52 = vpop.f32.mrb[72].mxu0  ;;  %4942 = vmatpush3.msk.msra.mxu1 %vm1597_vm3, %v6188_v4  ;;  %vm6303_vm3 = vmand %vm2195_vm5, %vm2244_vm7  ;;  %vm2198_vm5 = vcmp.ge.s32.totalorder %v2149_v24, 0  ;;  %vm2247_vm7 = vcmp.lt.s32.totalorder %v2149_v24, 768  ;;  %v2511_v25 = vld [vmem:[#allocation3 + $0x40] sm:$0xff] }
 0x204   : > { %v2044_v55 = vsel %vm1946_vm2, %v1843_v1, %v1995_v48  ;;  %v1848_v57 = vadd.f32 %v6227_v49, %v1847_v52  ;;  %v2892_v58 = vpop.permute.xlu0 %2891  ;;  %v2702_v59 = vpop.permute.xlu1 %2701  ;;  %v2100_v1 = vadd.s32 328, %v6002_v41  ;;  %vm2199_vm11 = vcmp.ge.s32.totalorder %v2150_v0, 0 }
 0x205   : > { %v2439_v60 = vsel %vm6284_vm4, %v2044_v55, 0.0  ;;  %v3082_v62 = vsel %vm3079_vm9, %v3033_v56, %v2892_v58  ;;  %v4826_v63 = vpop.f32.mrb[73].mxu0  ;;  %v2583_v3 = vld [vmem:[#allocation3 + $0x101] sm:$0xff]  ;;  %v3034_v11 = vsel %vm1390_vm15, %v2506_v6, %v2702_v59  ;;  %vm6337_vm4 = vmand %vm2197_vm0, %vm2246_vm6  ;;  %vm2248_vm12 = vcmp.lt.s32.totalorder %v2150_v0, 768 }
 0x206   : > { %2488 = vst.msk [vmem:[#allocation3 + $0x118] sm:$0xff] %vm1390_vm15, %v2439_v60  ;;  %vm1947_vm8 = vcmp.ge.f32.partialorder %v1848_v57, 0.0  ;;  %v1996_v5 = vmul.f32 0.3, %v1848_v57  ;;  %4872 = vmatprep.mubr.msk.f32.mxu1 %vm3138_vm10, %v3082_v62  ;;  %2949 = vrot.lane.b32.xlu1 %v2630_v2, %s5310_s29  ;;  %v2631_v21 = vld [vmem:[#allocation3 + $0x102] sm:$0xff]  ;;  %v2151_v56 = vadd.s32 %v6004_v42, %v2100_v1 }
 0x207   : > { %2759 = vrot.lane.b32.xlu0 %v2583_v3, %s5305_s25  ;;  %v1852_v7 = vpop.f32.mrb[74].mxu0  ;;  %v2512_v1 = vld [vmem:[#allocation3 + $0x48] sm:$0xff] }
 0x208   : > { %v2045_v10 = vsel %vm1947_vm8, %v1848_v57, %v1996_v5  ;;  %v1853_v12 = vadd.f32 %v6227_v49, %v1852_v7  ;;  %v2894_v13 = vpop.permute.xlu1 %2893  ;;  %v2704_v14 = vpop.permute.xlu0 %2703  ;;  %v2101_v57 = vadd.s32 336, %v6002_v41  ;;  %vm2200_vm0 = vcmp.ge.s32.totalorder %v2151_v56, 0 }
 0x209   : > { %v2440_v15 = vsel %vm6303_vm3, %v2045_v10, 0.0  ;;  %v3083_v16 = vsel %vm3079_vm9, %v3034_v11, %v2894_v13  ;;  %v4829_v17 = vpop.f32.mrb[75].mxu0  ;;  %v2584_v18 = vld [vmem:[#allocation3 + $0x109] sm:$0xff]  ;;  %v3035_v27 = vsel %vm1390_vm15, %v2507_v22, %v2704_v14  ;;  %vm6354_vm3 = vmand %vm2198_vm5, %vm2247_vm7  ;;  %vm2249_vm6 = vcmp.lt.s32.totalorder %v2151_v56, 768 }
 0x20a   : > { %2489 = vst.msk [vmem:[#allocation3 + $0x120] sm:$0xff] %vm1390_vm15, %v2440_v15  ;;  %vm1948_vm13 = vcmp.ge.f32.partialorder %v1853_v12, 0.0  ;;  %v1997_v19 = vmul.f32 0.3, %v1853_v12  ;;  %4873 = vmatmul.mubr.msk.f32.gmra.mrb[2].mxu1 %vm3138_vm10, %v3083_v16  ;;  %2761 = vrot.lane.b32.xlu1 %v2584_v18, %s5305_s25  ;;  %v2632_v35 = vld [vmem:[#allocation3 + $0x10a] sm:$0xff]  ;;  %v2152_v11 = vadd.s32 %v6004_v42, %v2101_v57 }
 0x20b   : > { %2951 = vrot.lane.b32.xlu0 %v2631_v21, %s5310_s29  ;;  %v1857_v23 = vpop.f32.mrb[76].mxu0  ;;  %v2513_v57 = vld [vmem:[#allocation3 + $0x50] sm:$0xff] }
 0x20c   : > { %v2046_v26 = vsel %vm1948_vm13, %v1853_v12, %v1997_v19  ;;  %v1858_v28 = vadd.f32 %v6227_v49, %v1857_v23  ;;  %v2896_v29 = vpop.permute.xlu0 %2895  ;;  %v2706_v30 = vpop.permute.xlu1 %2705  ;;  %v2102_v12 = vadd.s32 344, %v6002_v41  ;;  %vm2201_vm5 = vcmp.ge.s32.totalorder %v2152_v11, 0 }
 0x20d   : > { %v2441_v31 = vsel %vm6320_vm14, %v2046_v26, 0.0  ;;  %v3084_v32 = vsel %vm3079_vm9, %v3035_v27, %v2896_v29  ;;  %v4832_v34 = vpop.f32.mrb[77].mxu0  ;;  %v2585_v36 = vld [vmem:[#allocation3 + $0x111] sm:$0xff]  ;;  %v3036_v44 = vsel %vm1390_vm15, %v2508_v39, %v2706_v30  ;;  %vm6371_vm14 = vmand %vm2199_vm11, %vm2248_vm12  ;;  %vm2250_vm7 = vcmp.lt.s32.totalorder %v2152_v11, 768 }
 0x20e   : > { %2490 = vst.msk [vmem:[#allocation3 + $0x128] sm:$0xff] %vm1390_vm15, %v2441_v31  ;;  %vm1949_vm2 = vcmp.ge.f32.partialorder %v1858_v28, 0.0  ;;  %v1998_v37 = vmul.f32 0.3, %v1858_v28  ;;  %4875 = vmatprep.mubr.msk.f32.mxu1 %vm3138_vm10, %v3084_v32  ;;  %2953 = vrot.lane.b32.xlu1 %v2632_v35, %s5310_s29  ;;  %v2633_v53 = vld [vmem:[#allocation3 + $0x112] sm:$0xff]  ;;  %v2153_v27 = vadd.s32 %v6004_v42, %v2102_v12 }
 0x20f   : > { %2763 = vrot.lane.b32.xlu0 %v2585_v36, %s5305_s25  ;;  %v1862_v40 = vpop.f32.mrb[78].mxu0  ;;  %v2514_v12 = vld [vmem:[#allocation3 + $0x58] sm:$0xff] }
 0x210   : > { %v2047_v43 = vsel %vm1949_vm2, %v1858_v28, %v1998_v37  ;;  %v1863_v61 = vadd.f32 %v6227_v49, %v1862_v40  ;;  %v2898_v46 = vpop.permute.xlu1 %2897  ;;  %v2708_v47 = vpop.permute.xlu0 %2707  ;;  %v2103_v28 = vadd.s32 352, %v6002_v41  ;;  %vm2202_vm11 = vcmp.ge.s32.totalorder %v2153_v27, 0 }
 0x211   : > { %v2442_v45 = vsel %vm6337_vm4, %v2047_v43, 0.0  ;;  %v3085_v48 = vsel %vm3079_vm9, %v3036_v44, %v2898_v46  ;;  %v4835_v33 = vpop.f32.mrb[79].mxu0  ;;  %v2586_v50 = vld [vmem:[#allocation3 + $0x119] sm:$0xff]  ;;  %v3037_v59 = vsel %vm1390_vm15, %v2509_v54, %v2708_v47  ;;  %vm6388_vm4 = vmand %vm2200_vm0, %vm2249_vm6  ;;  %vm2251_vm12 = vcmp.lt.s32.totalorder %v2153_v27, 768 }
 0x212   : > { %2491 = vst.msk [vmem:[#allocation3 + $0x130] sm:$0xff] %vm1390_vm15, %v2442_v45  ;;  %vm1950_vm8 = vcmp.ge.f32.partialorder %v1863_v61, 0.0  ;;  %v1999_v51 = vmul.f32 0.3, %v1863_v61  ;;  %4876 = vmatmul.mubr.msk.f32.gmra.mrb[4].mxu1 %vm3138_vm10, %v3085_v48  ;;  %2765 = vrot.lane.b32.xlu1 %v2586_v50, %s5305_s25  ;;  %v2634_v4 = vld [vmem:[#allocation3 + $0x11a] sm:$0xff]  ;;  %v2154_v44 = vadd.s32 %v6004_v42, %v2103_v28 }
 0x213   : > { %2955 = vrot.lane.b32.xlu0 %v2633_v53, %s5310_s29  ;;  %v1867_v55 = vpop.f32.mrb[80].mxu0  ;;  %v2515_v28 = vld [vmem:[#allocation3 + $0x60] sm:$0xff] }
 0x214   : > { %v2048_v58 = vsel %vm1950_vm8, %v1863_v61, %v1999_v51  ;;  %v1868_v60 = vadd.f32 %v6227_v49, %v1867_v55  ;;  %v2900_v62 = vpop.permute.xlu0 %2899  ;;  %v2710_v63 = vpop.permute.xlu1 %2709  ;;  %v2104_v61 = vadd.s32 360, %v6002_v41  ;;  %vm2203_vm0 = vcmp.ge.s32.totalorder %v2154_v44, 0 }
 0x215   : > { %v2443_v2 = vsel %vm6354_vm3, %v2048_v58, 0.0  ;;  %v3086_v3 = vsel %vm3079_vm9, %v3037_v59, %v2900_v62  ;;  %v4838_v5 = vpop.f32.mrb[81].mxu0  ;;  %v2587_v6 = vld [vmem:[#allocation3 + $0x121] sm:$0xff]  ;;  %v3038_v14 = vsel %vm1390_vm15, %v2510_v9, %v2710_v63  ;;  %vm6405_vm3 = vmand %vm2201_vm5, %vm2250_vm7  ;;  %vm2252_vm6 = vcmp.lt.s32.totalorder %v2154_v44, 768 }
 0x216   : > { %2492 = vst.msk [vmem:[#allocation3 + $0x138] sm:$0xff] %vm1390_vm15, %v2443_v2  ;;  %vm1951_vm13 = vcmp.ge.f32.partialorder %v1868_v60, 0.0  ;;  %v2000_v7 = vmul.f32 0.3, %v1868_v60  ;;  %4878 = vmatprep.mubr.msk.f32.mxu1 %vm3138_vm10, %v3086_v3  ;;  %2957 = vrot.lane.b32.xlu1 %v2634_v4, %s5310_s29  ;;  %v2635_v24 = vld [vmem:[#allocation3 + $0x122] sm:$0xff]  ;;  %v2155_v59 = vadd.s32 %v6004_v42, %v2104_v61 }
 0x217   : > { %2767 = vrot.lane.b32.xlu0 %v2587_v6, %s5305_s25  ;;  %v1872_v10 = vpop.f32.mrb[82].mxu0  ;;  %v2516_v44 = vld [vmem:[#allocation3 + $0x68] sm:$0xff] }
 0x218   : > { %v2049_v13 = vsel %vm1951_vm13, %v1868_v60, %v2000_v7  ;;  %v1873_v15 = vadd.f32 %v6227_v49, %v1872_v10  ;;  %v2902_v16 = vpop.permute.xlu1 %2901  ;;  %v2712_v17 = vpop.permute.xlu0 %2711  ;;  %v2105_v60 = vadd.s32 368, %v6002_v41  ;;  %vm2204_vm5 = vcmp.ge.s32.totalorder %v2155_v59, 0 }
 0x219   : > { %v2444_v18 = vsel %vm6371_vm14, %v2049_v13, 0.0  ;;  %v3087_v19 = vsel %vm3079_vm9, %v3038_v14, %v2902_v16  ;;  %v4841_v20 = vpop.f32.mrb[83].mxu0  ;;  %v2588_v21 = vld [vmem:[#allocation3 + $0x129] sm:$0xff]  ;;  %v3039_v30 = vsel %vm1390_vm15, %v2511_v25, %v2712_v17  ;;  %vm6422_vm14 = vmand %vm2202_vm11, %vm2251_vm12  ;;  %vm2253_vm7 = vcmp.lt.s32.totalorder %v2155_v59, 768 }
 0x21a   : > { %2493 = vst.msk [vmem:[#allocation3 + $0x140] sm:$0xff] %vm1390_vm15, %v2444_v18  ;;  %vm1952_vm2 = vcmp.ge.f32.partialorder %v1873_v15, 0.0  ;;  %v2001_v22 = vmul.f32 0.3, %v1873_v15  ;;  %4879 = vmatmul.mubr.msk.f32.gmra.mrb[6].mxu1 %vm3138_vm10, %v3087_v19  ;;  %2769 = vrot.lane.b32.xlu1 %v2588_v21, %s5305_s25  ;;  %v2636_v38 = vld [vmem:[#allocation3 + $0x12a] sm:$0xff]  ;;  %v2156_v14 = vadd.s32 %v6004_v42, %v2105_v60 }
 0x21b   : > { %2959 = vrot.lane.b32.xlu0 %v2635_v24, %s5310_s29  ;;  %v1877_v26 = vpop.f32.mrb[84].mxu0 }
 0x21c   : > { %v2050_v29 = vsel %vm1952_vm2, %v1873_v15, %v2001_v22  ;;  %v1878_v31 = vadd.f32 %v6227_v49, %v1877_v26  ;;  %v2904_v32 = vpop.permute.xlu0 %2903  ;;  %v2714_v34 = vpop.permute.xlu1 %2713  ;;  %v2106_v15 = vadd.s32 376, %v6002_v41  ;;  %vm2205_vm11 = vcmp.ge.s32.totalorder %v2156_v14, 0 }
 0x21d   : > { %v2445_v35 = vsel %vm6388_vm4, %v2050_v29, 0.0  ;;  %v3088_v36 = vsel %vm3079_vm9, %v3039_v30, %v2904_v32  ;;  %v4844_v37 = vpop.f32.mrb[85].mxu0  ;;  %v2589_v39 = vld [vmem:[#allocation3 + $0x131] sm:$0xff]  ;;  %v3040_v47 = vsel %vm1390_vm15, %v2512_v1, %v2714_v34  ;;  %vm6439_vm4 = vmand %vm2203_vm0, %vm2252_vm6  ;;  %vm2254_vm12 = vcmp.lt.s32.totalorder %v2156_v14, 768 }
 0x21e   : > { %2494 = vst.msk [vmem:[#allocation3 + $0x148] sm:$0xff] %vm1390_vm15, %v2445_v35  ;;  %vm1953_vm8 = vcmp.ge.f32.partialorder %v1878_v31, 0.0  ;;  %v2002_v40 = vmul.f32 0.3, %v1878_v31  ;;  %4881 = vmatprep.mubr.msk.f32.mxu1 %vm3138_vm10, %v3088_v36  ;;  %2961 = vrot.lane.b32.xlu1 %v2636_v38, %s5310_s29  ;;  %v2637_v56 = vld [vmem:[#allocation3 + $0x132] sm:$0xff]  ;;  %v2157_v30 = vadd.s32 %v6004_v42, %v2106_v15 }
 0x21f   : > { %2771 = vrot.lane.b32.xlu0 %v2589_v39, %s5305_s25  ;;  %v1882_v43 = vpop.f32.mrb[86].mxu0 }
 0x220   : > { %v2051_v46 = vsel %vm1953_vm8, %v1878_v31, %v2002_v40  ;;  %v1883_v45 = vadd.f32 %v6227_v49, %v1882_v43  ;;  %v2906_v48 = vpop.permute.xlu1 %2905  ;;  %v2716_v33 = vpop.permute.xlu0 %2715  ;;  %v2107_v31 = vadd.s32 384, %v6002_v41  ;;  %vm2206_vm0 = vcmp.ge.s32.totalorder %v2157_v30, 0 }
 0x221   : > { %v2446_v50 = vsel %vm6405_vm3, %v2051_v46, 0.0  ;;  %v3089_v51 = vsel %vm3079_vm9, %v3040_v47, %v2906_v48  ;;  %v4847_v52 = vpop.f32.mrb[87].mxu0  ;;  %v2590_v53 = vld [vmem:[#allocation3 + $0x139] sm:$0xff]  ;;  %v3041_v63 = vsel %vm1390_vm15, %v2513_v57, %v2716_v33  ;;  %vm6456_vm3 = vmand %vm2204_vm5, %vm2253_vm7  ;;  %vm2255_vm6 = vcmp.lt.s32.totalorder %v2157_v30, 768  ;;  %v2517_v57 = vld [vmem:[#allocation3 + $0x70] sm:$0xff] }
 0x222   : > { %2495 = vst.msk [vmem:[#allocation3 + $0x150] sm:$0xff] %vm1390_vm15, %v2446_v50  ;;  %vm1954_vm13 = vcmp.ge.f32.partialorder %v1883_v45, 0.0  ;;  %v2003_v54 = vmul.f32 0.3, %v1883_v45  ;;  %4882 = vmatmul.mubr.msk.f32.gmra.mrb[8].mxu1 %vm3138_vm10, %v3089_v51  ;;  %2773 = vrot.lane.b32.xlu1 %v2590_v53, %s5305_s25  ;;  %v2638_v8 = vld [vmem:[#allocation3 + $0x13a] sm:$0xff]  ;;  %v2158_v46 = vadd.s32 %v6004_v42, %v2107_v31  ;;  %v2521_v31 = vld [vmem:[#allocation3 + $0x90] sm:$0xff] }
 0x223   : > { %2963 = vrot.lane.b32.xlu0 %v2637_v56, %s5310_s29  ;;  %v1887_v58 = vpop.f32.mrb[88].mxu0  ;;  %v2526_v42 = vld [vmem:[#allocation3 + $0xb8] sm:$0xff] }
 0x224   : > { %v2052_v62 = vsel %vm1954_vm13, %v1883_v45, %v2003_v54  ;;  %v1888_v2 = vadd.f32 %v6227_v49, %v1887_v58  ;;  %v2908_v3 = vpop.permute.xlu0 %2907  ;;  %v2718_v5 = vpop.permute.xlu1 %2717  ;;  %vm2207_vm5 = vcmp.ge.s32.totalorder %v2158_v46, 0  ;;  %vm2256_vm7 = vcmp.lt.s32.totalorder %v2158_v46, 768 }
 0x225   : > { %v2447_v4 = vsel %vm6422_vm14, %v2052_v62, 0.0  ;;  %v3090_v6 = vsel %vm3079_vm9, %v3041_v63, %v2908_v3  ;;  %v4850_v7 = vpop.f32.mrb[89].mxu0  ;;  %v2591_v9 = vld [vmem:[#allocation3 + $0x141] sm:$0xff]  ;;  %v3042_v17 = vsel %vm1390_vm15, %v2514_v12, %v2718_v5  ;;  %vm6473_vm14 = vmand %vm2205_vm11, %vm2254_vm12  ;;  %vm2501_vm11 = vcmask 58368  }
 0x226   : > { %2496 = vst.msk [vmem:[#allocation3 + $0x158] sm:$0xff] %vm1390_vm15, %v2447_v4  ;;  %vm1955_vm2 = vcmp.ge.f32.partialorder %v1888_v2, 0.0  ;;  %v2004_v10 = vmul.f32 0.3, %v1888_v2  ;;  %4884 = vmatprep.mubr.msk.f32.mxu1 %vm3138_vm10, %v3090_v6  ;;  %2965 = vrot.lane.b32.xlu1 %v2638_v8, %s5310_s29  ;;  %v2639_v27 = vld [vmem:[#allocation3 + $0x142] sm:$0xff] }
 0x227   : > { %2775 = vrot.lane.b32.xlu0 %v2591_v9, %s5305_s25  ;;  %v1892_v13 = vpop.f32.mrb[90].mxu0 }
 0x228   : > { %v2053_v16 = vsel %vm1955_vm2, %v1888_v2, %v2004_v10  ;;  %v1893_v18 = vadd.f32 %v6227_v49, %v1892_v13  ;;  %v2910_v19 = vpop.permute.xlu1 %2909  ;;  %v2720_v20 = vpop.permute.xlu0 %2719 }
 0x229   : > { %v2448_v21 = vsel %vm6439_vm4, %v2053_v16, 0.0  ;;  %v3091_v22 = vsel %vm3079_vm9, %v3042_v17, %v2910_v19  ;;  %v4853_v23 = vpop.f32.mrb[91].mxu0  ;;  %v2592_v24 = vld [vmem:[#allocation3 + $0x149] sm:$0xff]  ;;  %v3043_v34 = vsel %vm1390_vm15, %v2515_v28, %v2720_v20  ;;  %vm6488_vm4 = vmand %vm2206_vm0, %vm2255_vm6  ;;  %v2519_v17 = vld [vmem:[#allocation3 + $0x80] sm:$0xff] }
 0x22a   : > { %2497 = vst.msk [vmem:[#allocation3 + $0x160] sm:$0xff] %vm1390_vm15, %v2448_v21  ;;  %vm1956_vm8 = vcmp.ge.f32.partialorder %v1893_v18, 0.0  ;;  %v2005_v25 = vmul.f32 0.3, %v1893_v18  ;;  %4885 = vmatmul.mubr.msk.f32.gmra.mrb[10].mxu1 %vm3138_vm10, %v3091_v22  ;;  %2777 = vrot.lane.b32.xlu1 %v2592_v24, %s5305_s25  ;;  %v2640_v0 = vld [vmem:[#allocation3 + $0x14a] sm:$0xff] }
 0x22b   : > { %2967 = vrot.lane.b32.xlu0 %v2639_v27, %s5310_s29  ;;  %v1897_v29 = vpop.f32.mrb[92].mxu0  ;;  %v2520_v24 = vld [vmem:[#allocation3 + $0x88] sm:$0xff] }
 0x22c   : > { %v2054_v32 = vsel %vm1956_vm8, %v1893_v18, %v2005_v25  ;;  %v1898_v35 = vadd.f32 %v6227_v49, %v1897_v29  ;;  %v2912_v36 = vpop.permute.xlu0 %2911  ;;  %v2722_v37 = vpop.permute.xlu1 %2721 }
 0x22d   : > { %v2449_v38 = vsel %vm6456_vm3, %v2054_v32, 0.0  ;;  %v3092_v39 = vsel %vm3079_vm9, %v3043_v34, %v2912_v36  ;;  %v4856_v40 = vpop.f32.mrb[93].mxu0  ;;  %v2593_v1 = vld [vmem:[#allocation3 + $0x151] sm:$0xff]  ;;  %v3044_v45 = vsel %vm1390_vm15, %v2516_v44, %v2722_v37  ;;  %vm2305_vm3 = vmand %vm2207_vm5, %vm2256_vm7 }
 0x22e   : > { %2498 = vst.msk [vmem:[#allocation3 + $0x168] sm:$0xff] %vm1390_vm15, %v2449_v38  ;;  %vm1957_vm13 = vcmp.ge.f32.partialorder %v1898_v35, 0.0  ;;  %v2006_v43 = vmul.f32 0.3, %v1898_v35  ;;  %4887 = vmatprep.mubr.msk.f32.mxu1 %vm3138_vm10, %v3092_v39  ;;  %2969 = vrot.lane.b32.xlu1 %v2640_v0, %s5310_s29  ;;  %v2641_v56 = vld [vmem:[#allocation3 + $0x152] sm:$0xff] }
 0x22f   : > { %2779 = vrot.lane.b32.xlu0 %v2593_v1, %s5305_s25  ;;  %v1902_v61 = vpop.f32.mrb[94].mxu0  ;;  %v2522_v38 = vld [vmem:[#allocation3 + $0x98] sm:$0xff] }
 0x230   : > { %v2055_v47 = vsel %vm1957_vm13, %v1898_v35, %v2006_v43  ;;  %v1903_v48 = vadd.f32 %v6227_v49, %v1902_v61  ;;  %v2914_v33 = vpop.permute.xlu1 %2913  ;;  %v2724_v50 = vpop.permute.xlu0 %2723  ;;  %v2523_v43 = vld [vmem:[#allocation3 + $0xa0] sm:$0xff] }
 0x231   : > { %v2450_v51 = vsel %vm6473_vm14, %v2055_v47, 0.0  ;;  %v3093_v52 = vsel %vm3079_vm9, %v3044_v45, %v2914_v33  ;;  %v4859_v53 = vpop.f32.mrb[95].mxu0  ;;  %v2594_v54 = vld [vmem:[#allocation3 + $0x159] sm:$0xff]  ;;  %v3045_v60 = vsel %vm1390_vm15, %v2517_v57, %v2724_v50  ;;  %v2524_v47 = vld [vmem:[#allocation3 + $0xa8] sm:$0xff] }
 0x232   : > { %2499 = vst.msk [vmem:[#allocation3 + $0x170] sm:$0xff] %vm1390_vm15, %v2450_v51  ;;  %vm1958_vm2 = vcmp.ge.f32.partialorder %v1903_v48, 0.0  ;;  %v2007_v55 = vmul.f32 0.3, %v1903_v48  ;;  %4888 = vmatmul.mubr.msk.f32.gmra.mrb[12].mxu1 %vm3138_vm10, %v3093_v52  ;;  %2781 = vrot.lane.b32.xlu1 %v2594_v54, %s5305_s25  ;;  %v2642_v6 = vld [vmem:[#allocation3 + $0x15a] sm:$0xff]  ;;  %v2525_v51 = vld [vmem:[#allocation3 + $0xb0] sm:$0xff] }
 0x233   : > { %2971 = vrot.lane.b32.xlu0 %v2641_v56, %s5310_s29  ;;  %v1907_v58 = vpop.f32.mrb[96].mxu0 }
 0x234   : > { %v2056_v59 = vsel %vm1958_vm2, %v1903_v48, %v2007_v55  ;;  %v1908_v62 = vadd.f32 %v6227_v49, %v1907_v58  ;;  %v2916_v63 = vpop.permute.xlu0 %2915  ;;  %v2726_v2 = vpop.permute.xlu1 %2725  ;;  %v2518_v49 = vld [vmem:[#allocation3 + $0x78] sm:$0xff] }
 0x235   : > { %v2451_v3 = vsel %vm6488_vm4, %v2056_v59, 0.0  ;;  %v3094_v5 = vsel %vm3079_vm9, %v3045_v60, %v2916_v63  ;;  %v4862_v4 = vpop.f32.mrb[97].mxu0  ;;  %v2595_v7 = vld [vmem:[#allocation3 + $0x161] sm:$0xff]  ;;  %v3046_v10 = vsel %vm1390_vm15, %v2518_v49, %v2726_v2  ;;  %v2529_v49 = vld [vmem:[#allocation3 + $0xd0] sm:$0xff] }
 0x236   : > { %2500 = vst.msk [vmem:[#allocation3 + $0x178] sm:$0xff] %vm1390_vm15, %v2451_v3  ;;  %vm1959_vm8 = vcmp.ge.f32.partialorder %v1908_v62, 0.0  ;;  %v2008_v8 = vmul.f32 0.3, %v1908_v62  ;;  %4890 = vmatprep.mubr.msk.f32.mxu1 %vm3138_vm10, %v3094_v5  ;;  %2973 = vrot.lane.b32.xlu1 %v2642_v6, %s5310_s29  ;;  %v2643_v16 = vld [vmem:[#allocation3 + $0x162] sm:$0xff] }
 0x237   : > { %2783 = vrot.lane.b32.xlu0 %v2595_v7, %s5305_s25  ;;  %v2527_v60 = vld [vmem:[#allocation3 + $0xc0] sm:$0xff]  ;;  %v2528_v5 = vld [vmem:[#allocation3 + $0xc8] sm:$0xff] }
 0x238   : > { %v2057_v9 = vsel %vm1959_vm8, %v1908_v62, %v2008_v8  ;;  %v2918_v11 = vpop.permute.xlu1 %2917  ;;  %v2728_v12 = vpop.permute.xlu0 %2727 }
 0x239   : > { %v2452_v13 = vsel %vm2305_vm3, %v2057_v9, 0.0  ;;  %v3095_v14 = vsel %vm3079_vm9, %v3046_v10, %v2918_v11  ;;  %v2596_v15 = vld [vmem:[#allocation3 + $0x169] sm:$0xff]  ;;  %v3047_v18 = vsel %vm1390_vm15, %v2519_v17, %v2728_v12 }
 0x23a   : > { %2502 = vst.msk [vmem:[#allocation3 + $0x180] sm:$0x3] %vm2501_vm11, %v2452_v13  ;;  %4891 = vmatmul.mubr.msk.f32.gmra.mrb[14].mxu1 %vm3138_vm10, %v3095_v14  ;;  %2785 = vrot.lane.b32.xlu1 %v2596_v15, %s5305_s25  ;;  %v2644_v22 = vld [vmem:[#allocation3 + $0x16a] sm:$0xff]  ;;  %v2530_v13 = vld [vmem:[#allocation3 + $0xd8] sm:$0xff] }
 0x23b   : > { %2975 = vrot.lane.b32.xlu0 %v2643_v16, %s5310_s29 }
 0x23c   : > { %v2920_v19 = vpop.permute.xlu0 %2919  ;;  %v2730_v20 = vpop.permute.xlu1 %2729 }
 0x23d   : > { %v3096_v21 = vsel %vm3079_vm9, %v3047_v18, %v2920_v19  ;;  %v2597_v23 = vld [vmem:[#allocation3 + $0x171] sm:$0xff]  ;;  %v3048_v25 = vsel %vm1390_vm15, %v2520_v24, %v2730_v20  ;;  %v2531_v18 = vld [vmem:[#allocation3 + $0xe0] sm:$0xff] }
 0x23e   : > { %4893 = vmatprep.mubr.msk.f32.mxu1 %vm3138_vm10, %v3096_v21  ;;  %2977 = vrot.lane.b32.xlu1 %v2644_v22, %s5310_s29  ;;  %v2645_v30 = vld [vmem:[#allocation3 + $0x172] sm:$0xff] }
 0x23f   : > { %2787 = vrot.lane.b32.xlu0 %v2597_v23, %s5305_s25  ;;  %v2532_v23 = vld [vmem:[#allocation3 + $0xe8] sm:$0xff] }
 0x240   : > { %v2922_v26 = vpop.permute.xlu1 %2921  ;;  %v2732_v27 = vpop.permute.xlu0 %2731 }
 0x241   : > { %v3097_v28 = vsel %vm3079_vm9, %v3048_v25, %v2922_v26  ;;  %v2598_v29 = vld [vmem:[#allocation3 + $0x179] sm:$0xff]  ;;  %v3049_v32 = vsel %vm1390_vm15, %v2521_v31, %v2732_v27 }
 0x242   : > { %4894 = vmatmul.mubr.msk.f32.gmra.mrb[16].mxu1 %vm3138_vm10, %v3097_v28  ;;  %2789 = vrot.lane.b32.xlu1 %v2598_v29, %s5305_s25  ;;  %v2646_v37 = vld [vmem:[#allocation3 + $0x17a] sm:$0xff]  ;;  %v2533_v28 = vld [vmem:[#allocation3 + $0xf0] sm:$0xff] }
 0x243   : > { %2979 = vrot.lane.b32.xlu0 %v2645_v30, %s5310_s29 }
 0x244   : > { %v2924_v34 = vpop.permute.xlu0 %2923  ;;  %v2734_v35 = vpop.permute.xlu1 %2733 }
 0x245   : > { %v3098_v36 = vsel %vm3079_vm9, %v3049_v32, %v2924_v34  ;;  %v3050_v39 = vsel %vm1390_vm15, %v2522_v38, %v2734_v35  ;;  %v2534_v34 = vld [vmem:[#allocation3 + $0xf8] sm:$0xff] }
 0x246   : > { %4896 = vmatprep.mubr.msk.f32.mxu1 %vm3138_vm10, %v3098_v36  ;;  %2981 = vrot.lane.b32.xlu1 %v2646_v37, %s5310_s29 }
 0x248   : > { %v2926_v40 = vpop.permute.xlu1 %2925  ;;  %v2736_v0 = vpop.permute.xlu0 %2735 }
 0x249   : > { %v3099_v1 = vsel %vm3079_vm9, %v3050_v39, %v2926_v40  ;;  %v3051_v41 = vsel %vm1390_vm15, %v2523_v43, %v2736_v0  ;;  %v2535_v39 = vld [vmem:[#allocation3 + $0x100] sm:$0xff] }
 0x24a   : > { %4897 = vmatmul.mubr.msk.f32.gmra.mrb[18].mxu1 %vm3138_vm10, %v3099_v1 }
 0x24c   : > { %v2928_v44 = vpop.permute.xlu0 %2927  ;;  %v2738_v61 = vpop.permute.xlu1 %2737 }
 0x24d   : > { %v3100_v46 = vsel %vm3079_vm9, %v3051_v41, %v2928_v44  ;;  %v3052_v45 = vsel %vm1390_vm15, %v2524_v47, %v2738_v61  ;;  %v2536_v41 = vld [vmem:[#allocation3 + $0x108] sm:$0xff] }
 0x24e   : > { %4899 = vmatprep.mubr.msk.f32.mxu1 %vm3138_vm10, %v3100_v46 }
 0x250   : > { %v2930_v48 = vpop.permute.xlu1 %2929  ;;  %v2740_v33 = vpop.permute.xlu0 %2739 }
 0x251   : > { %v3101_v50 = vsel %vm3079_vm9, %v3052_v45, %v2930_v48  ;;  %v3053_v52 = vsel %vm1390_vm15, %v2525_v51, %v2740_v33  ;;  %v2537_v45 = vld [vmem:[#allocation3 + $0x110] sm:$0xff] }
 0x252   : > { %4900 = vmatmul.mubr.msk.f32.gmra.mrb[20].mxu1 %vm3138_vm10, %v3101_v50 }
 0x254   : > { %v2932_v53 = vpop.permute.xlu0 %2931  ;;  %v2742_v54 = vpop.permute.xlu1 %2741 }
 0x255   : > { %v3102_v55 = vsel %vm3079_vm9, %v3053_v52, %v2932_v53  ;;  %v3054_v56 = vsel %vm1390_vm15, %v2526_v42, %v2742_v54  ;;  %v2538_v52 = vld [vmem:[#allocation3 + $0x118] sm:$0xff] }
 0x256   : > { %4902 = vmatprep.mubr.msk.f32.mxu1 %vm3138_vm10, %v3102_v55 }
 0x258   : > { %v2934_v57 = vpop.permute.xlu1 %2933  ;;  %v2744_v58 = vpop.permute.xlu0 %2743 }
 0x259   : > { %v3103_v59 = vsel %vm3079_vm9, %v3054_v56, %v2934_v57  ;;  %v3055_v62 = vsel %vm1390_vm15, %v2527_v60, %v2744_v58  ;;  %v2539_v56 = vld [vmem:[#allocation3 + $0x120] sm:$0xff] }
 0x25a   : > { %4903 = vmatmul.mubr.msk.f32.gmra.mrb[22].mxu1 %vm3138_vm10, %v3103_v59 }
 0x25c   : > { %v2936_v63 = vpop.permute.xlu0 %2935  ;;  %v2746_v2 = vpop.permute.xlu1 %2745 }
 0x25d   : > { %v3104_v3 = vsel %vm3079_vm9, %v3055_v62, %v2936_v63  ;;  %v3056_v4 = vsel %vm1390_vm15, %v2528_v5, %v2746_v2  ;;  %v2540_v62 = vld [vmem:[#allocation3 + $0x128] sm:$0xff] }
 0x25e   : > { %4905 = vmatprep.mubr.msk.f32.mxu1 %vm3138_vm10, %v3104_v3 }
 0x260   : > { %v2938_v6 = vpop.permute.xlu1 %2937  ;;  %v2748_v7 = vpop.permute.xlu0 %2747 }
 0x261   : > { %v3105_v8 = vsel %vm3079_vm9, %v3056_v4, %v2938_v6  ;;  %v3057_v9 = vsel %vm1390_vm15, %v2529_v49, %v2748_v7  ;;  %v2541_v4 = vld [vmem:[#allocation3 + $0x130] sm:$0xff] }
 0x262   : > { %4906 = vmatmul.mubr.msk.f32.gmra.mrb[24].mxu1 %vm3138_vm10, %v3105_v8 }
 0x264   : > { %v2940_v10 = vpop.permute.xlu0 %2939  ;;  %v2750_v11 = vpop.permute.xlu1 %2749 }
 0x265   : > { %v3106_v12 = vsel %vm3079_vm9, %v3057_v9, %v2940_v10  ;;  %v3058_v14 = vsel %vm1390_vm15, %v2530_v13, %v2750_v11  ;;  %v2542_v9 = vld [vmem:[#allocation3 + $0x138] sm:$0xff] }
 0x266   : > { %4908 = vmatprep.mubr.msk.f32.mxu1 %vm3138_vm10, %v3106_v12 }
 0x268   : > { %v2942_v15 = vpop.permute.xlu1 %2941  ;;  %v2752_v16 = vpop.permute.xlu0 %2751 }
 0x269   : > { %v3107_v17 = vsel %vm3079_vm9, %v3058_v14, %v2942_v15  ;;  %v3059_v19 = vsel %vm1390_vm15, %v2531_v18, %v2752_v16  ;;  %v2543_v14 = vld [vmem:[#allocation3 + $0x140] sm:$0xff] }
 0x26a   : > { %4909 = vmatmul.mubr.msk.f32.gmra.mrb[26].mxu1 %vm3138_vm10, %v3107_v17 }
 0x26c   : > { %v2944_v20 = vpop.permute.xlu0 %2943  ;;  %v2754_v21 = vpop.permute.xlu1 %2753 }
 0x26d   : > { %v3108_v22 = vsel %vm3079_vm9, %v3059_v19, %v2944_v20  ;;  %v3060_v24 = vsel %vm1390_vm15, %v2532_v23, %v2754_v21  ;;  %v2544_v19 = vld [vmem:[#allocation3 + $0x148] sm:$0xff] }
 0x26e   : > { %4911 = vmatprep.mubr.msk.f32.mxu1 %vm3138_vm10, %v3108_v22 }
 0x270   : > { %v2946_v25 = vpop.permute.xlu1 %2945 }
 0x271   : > { %v3109_v26 = vsel %vm3079_vm9, %v3060_v24, %v2946_v25  ;;  %v2756_v27 = vpop.permute.xlu0 %2755  ;;  %v2545_v24 = vld [vmem:[#allocation3 + $0x150] sm:$0xff] }
 0x272   : > { %4912 = vmatmul.mubr.msk.f32.gmra.mrb[28].mxu1 %vm3138_vm10, %v3109_v26  ;;  %v3061_v30 = vsel %vm1390_vm15, %v2533_v28, %v2756_v27 }
 0x274   : > { %v2758_v29 = vpop.permute.xlu1 %2757 }
 0x275   : > { %v2948_v31 = vpop.permute.xlu0 %2947  ;;  %v3062_v35 = vsel %vm1390_vm15, %v2534_v34, %v2758_v29  ;;  %v2546_v29 = vld [vmem:[#allocation3 + $0x158] sm:$0xff] }
 0x276   : > { %v3110_v32 = vsel %vm3079_vm9, %v3061_v30, %v2948_v31 }
 0x277   : > { %4914 = vmatprep.mubr.msk.f32.mxu1 %vm3138_vm10, %v3110_v32 }
 0x278   : > { %v2950_v36 = vpop.permute.xlu1 %2949 }
 0x279   : > { %v3111_v37 = vsel %vm3079_vm9, %v3062_v35, %v2950_v36  ;;  %v2760_v38 = vpop.permute.xlu0 %2759  ;;  %v2547_v35 = vld [vmem:[#allocation3 + $0x160] sm:$0xff] }
 0x27a   : > { %4915 = vmatmul.mubr.msk.f32.gmra.mrb[30].mxu1 %vm3138_vm10, %v3111_v37  ;;  %v3063_v0 = vsel %vm1390_vm15, %v2535_v39, %v2760_v38 }
 0x27c   : > { %v2762_v40 = vpop.permute.xlu1 %2761 }
 0x27d   : > { %v2952_v1 = vpop.permute.xlu0 %2951  ;;  %v3064_v44 = vsel %vm1390_vm15, %v2536_v41, %v2762_v40  ;;  %v2548_v40 = vld [vmem:[#allocation3 + $0x168] sm:$0xff] }
 0x27e   : > { %v3112_v43 = vsel %vm3079_vm9, %v3063_v0, %v2952_v1 }
 0x27f   : > { %4917 = vmatprep.mubr.msk.f32.mxu1 %vm3138_vm10, %v3112_v43 }
 0x280   : > { %v2954_v61 = vpop.permute.xlu1 %2953 }
 0x281   : > { %v3113_v46 = vsel %vm3079_vm9, %v3064_v44, %v2954_v61  ;;  %v2764_v47 = vpop.permute.xlu0 %2763  ;;  %v2549_v44 = vld [vmem:[#allocation3 + $0x170] sm:$0xff] }
 0x282   : > { %4918 = vmatmul.mubr.msk.f32.gmra.mrb[32].mxu1 %vm3138_vm10, %v3113_v46  ;;  %v3065_v33 = vsel %vm1390_vm15, %v2537_v45, %v2764_v47 }
 0x284   : > { %v2766_v48 = vpop.permute.xlu1 %2765 }
 0x285   : > { %v2956_v50 = vpop.permute.xlu0 %2955  ;;  %v3066_v53 = vsel %vm1390_vm15, %v2538_v52, %v2766_v48  ;;  %v2550_v48 = vld [vmem:[#allocation3 + $0x178] sm:$0xff] }
 0x286   : > { %v3114_v51 = vsel %vm3079_vm9, %v3065_v33, %v2956_v50  ;;  %v5216_v52 = vld [vmem:[%s5415_s11] sm:$0xff] }
 0x287   : > { %4920 = vmatprep.mubr.msk.f32.mxu1 %vm3138_vm10, %v3114_v51 }
 0x288   : > { %v2958_v54 = vpop.permute.xlu1 %2957 }
 0x289   : > { %v3115_v55 = vsel %vm3079_vm9, %v3066_v53, %v2958_v54  ;;  %v2768_v42 = vpop.permute.xlu0 %2767  ;;  %v5217_v53 = vld [vmem:[%s5415_s11 + $0x8] sm:$0xff]  ;;  %v5218_v54 = vld [vmem:[%s5415_s11 + $0x10] sm:$0xff] }
 0x28a   : > { %4921 = vmatmul.mubr.msk.f32.gmra.mrb[34].mxu1 %vm3138_vm10, %v3115_v55  ;;  %v3067_v58 = vsel %vm1390_vm15, %v2539_v56, %v2768_v42  ;;  %v5219_v55 = vld [vmem:[%s5415_s11 + $0x18] sm:$0xff]  ;;  %v5220_v42 = vld [vmem:[%s5415_s11 + $0x20] sm:$0xff]  ;;  %v5221_v56 = vld [vmem:[%s5415_s11 + $0x28] sm:$0xff] }
 0x28c   : > { %v2770_v57 = vpop.permute.xlu1 %2769 }
 0x28d   : > { %v2960_v59 = vpop.permute.xlu0 %2959  ;;  %v3068_v63 = vsel %vm1390_vm15, %v2540_v62, %v2770_v57  ;;  %v5222_v57 = vld [vmem:[%s5415_s11 + $0x30] sm:$0xff] }
 0x28e   : > { %v3116_v60 = vsel %vm3079_vm9, %v3067_v58, %v2960_v59  ;;  %v5223_v58 = vld [vmem:[%s5415_s11 + $0x38] sm:$0xff]  ;;  %v5224_v59 = vld [vmem:[%s5415_s11 + $0x40] sm:$0xff]  ;;  %v5226_v62 = vld [vmem:[%s5415_s11 + $0x50] sm:$0xff] }
 0x28f   : > { %4923 = vmatprep.mubr.msk.f32.mxu1 %vm3138_vm10, %v3116_v60  ;;  %v5225_v60 = vld [vmem:[%s5415_s11 + $0x48] sm:$0xff] }
 0x290   : > { %v2962_v2 = vpop.permute.xlu1 %2961 }
 0x291   : > { %v3117_v3 = vsel %vm3079_vm9, %v3068_v63, %v2962_v2  ;;  %v2772_v5 = vpop.permute.xlu0 %2771  ;;  %v5227_v63 = vld [vmem:[%s5415_s11 + $0x58] sm:$0xff]  ;;  %v5228_v2 = vld [vmem:[%s5415_s11 + $0x60] sm:$0xff] }
 0x292   : > { %4924 = vmatmul.mubr.msk.f32.gmra.mrb[36].mxu1 %vm3138_vm10, %v3117_v3  ;;  %v3069_v7 = vsel %vm1390_vm15, %v2541_v4, %v2772_v5  ;;  %v5229_v3 = vld [vmem:[%s5415_s11 + $0x68] sm:$0xff]  ;;  %v5230_v5 = vld [vmem:[%s5415_s11 + $0x70] sm:$0xff]  ;;  %v5231_v4 = vld [vmem:[%s5415_s11 + $0x78] sm:$0xff] }
 0x294   : > { %v2774_v6 = vpop.permute.xlu1 %2773 }
 0x295   : > { %v2964_v8 = vpop.permute.xlu0 %2963  ;;  %v3070_v10 = vsel %vm1390_vm15, %v2542_v9, %v2774_v6  ;;  %v5232_v6 = vld [vmem:[%s5415_s11 + $0x80] sm:$0xff] }
 0x296   : > { %v3118_v49 = vsel %vm3079_vm9, %v3069_v7, %v2964_v8  ;;  %v5233_v7 = vld [vmem:[%s5415_s11 + $0x88] sm:$0xff]  ;;  %v5234_v8 = vld [vmem:[%s5415_s11 + $0x90] sm:$0xff]  ;;  %v5236_v9 = vld [vmem:[%s5415_s11 + $0xa0] sm:$0xff] }
 0x297   : > { %4926 = vmatprep.mubr.msk.f32.mxu1 %vm3138_vm10, %v3118_v49  ;;  %v5235_v49 = vld [vmem:[%s5415_s11 + $0x98] sm:$0xff] }
 0x298   : > { %v2966_v11 = vpop.permute.xlu1 %2965 }
 0x299   : > { %v3119_v12 = vsel %vm3079_vm9, %v3070_v10, %v2966_v11  ;;  %v2776_v13 = vpop.permute.xlu0 %2775  ;;  %v5237_v10 = vld [vmem:[%s5415_s11 + $0xa8] sm:$0xff]  ;;  %v5238_v11 = vld [vmem:[%s5415_s11 + $0xb0] sm:$0xff] }
 0x29a   : > { %4927 = vmatmul.mubr.msk.f32.gmra.mrb[38].mxu1 %vm3138_vm10, %v3119_v12  ;;  %v3071_v16 = vsel %vm1390_vm15, %v2543_v14, %v2776_v13  ;;  %v5239_v12 = vld [vmem:[%s5415_s11 + $0xb8] sm:$0xff]  ;;  %v5240_v13 = vld [vmem:[%s5415_s11 + $0xc0] sm:$0xff]  ;;  %v5241_v14 = vld [vmem:[%s5415_s11 + $0xc8] sm:$0xff] }
 0x29c   : > { %v2778_v15 = vpop.permute.xlu1 %2777 }
 0x29d   : > { %v2968_v17 = vpop.permute.xlu0 %2967  ;;  %v3072_v20 = vsel %vm1390_vm15, %v2544_v19, %v2778_v15  ;;  %v5242_v15 = vld [vmem:[%s5415_s11 + $0xd0] sm:$0xff] }
 0x29e   : > { %v3120_v18 = vsel %vm3079_vm9, %v3071_v16, %v2968_v17  ;;  %v5243_v16 = vld [vmem:[%s5415_s11 + $0xd8] sm:$0xff]  ;;  %v5244_v17 = vld [vmem:[%s5415_s11 + $0xe0] sm:$0xff]  ;;  %v5246_v19 = vld [vmem:[%s5415_s11 + $0xf0] sm:$0xff] }
 0x29f   : > { %4929 = vmatprep.mubr.msk.f32.mxu1 %vm3138_vm10, %v3120_v18  ;;  %v5245_v18 = vld [vmem:[%s5415_s11 + $0xe8] sm:$0xff] }
 0x2a0   : > { %v2970_v21 = vpop.permute.xlu1 %2969 }
 0x2a1   : > { %v3121_v22 = vsel %vm3079_vm9, %v3072_v20, %v2970_v21  ;;  %v2780_v23 = vpop.permute.xlu0 %2779  ;;  %v5247_v20 = vld [vmem:[%s5415_s11 + $0xf8] sm:$0xff]  ;;  %v5248_v21 = vld [vmem:[%s5415_s11 + $0x100] sm:$0xff] }
 0x2a2   : > { %4930 = vmatmul.mubr.msk.f32.gmra.mrb[40].mxu1 %vm3138_vm10, %v3121_v22  ;;  %v3073_v26 = vsel %vm1390_vm15, %v2545_v24, %v2780_v23  ;;  %v5249_v22 = vld [vmem:[%s5415_s11 + $0x108] sm:$0xff]  ;;  %v5250_v23 = vld [vmem:[%s5415_s11 + $0x110] sm:$0xff]  ;;  %v5251_v24 = vld [vmem:[%s5415_s11 + $0x118] sm:$0xff] }
 0x2a4   : > { %v2782_v25 = vpop.permute.xlu1 %2781 }
 0x2a5   : > { %v2972_v27 = vpop.permute.xlu0 %2971  ;;  %v3074_v30 = vsel %vm1390_vm15, %v2546_v29, %v2782_v25  ;;  %v5252_v25 = vld [vmem:[%s5415_s11 + $0x120] sm:$0xff] }
 0x2a6   : > { %v3122_v28 = vsel %vm3079_vm9, %v3073_v26, %v2972_v27  ;;  %v5253_v26 = vld [vmem:[%s5415_s11 + $0x128] sm:$0xff]  ;;  %v5254_v27 = vld [vmem:[%s5415_s11 + $0x130] sm:$0xff]  ;;  %v5256_v29 = vld [vmem:[%s5415_s11 + $0x140] sm:$0xff] }
 0x2a7   : > { %4932 = vmatprep.mubr.msk.f32.mxu1 %vm3138_vm10, %v3122_v28  ;;  %v5255_v28 = vld [vmem:[%s5415_s11 + $0x138] sm:$0xff] }
 0x2a8   : > { %v2974_v31 = vpop.permute.xlu1 %2973 }
 0x2a9   : > { %v3123_v32 = vsel %vm3079_vm9, %v3074_v30, %v2974_v31  ;;  %v2784_v34 = vpop.permute.xlu0 %2783  ;;  %v5257_v30 = vld [vmem:[%s5415_s11 + $0x148] sm:$0xff]  ;;  %v5258_v31 = vld [vmem:[%s5415_s11 + $0x150] sm:$0xff] }
 0x2aa   : > { %4933 = vmatmul.mubr.msk.f32.gmra.mrb[42].mxu1 %vm3138_vm10, %v3123_v32  ;;  %v3075_v37 = vsel %vm1390_vm15, %v2547_v35, %v2784_v34  ;;  %v5259_v32 = vld [vmem:[%s5415_s11 + $0x158] sm:$0xff]  ;;  %v5260_v34 = vld [vmem:[%s5415_s11 + $0x160] sm:$0xff]  ;;  %v5261_v35 = vld [vmem:[%s5415_s11 + $0x168] sm:$0xff] }
 0x2ac   : > { %v2786_v36 = vpop.permute.xlu1 %2785 }
 0x2ad   : > { %v2976_v38 = vpop.permute.xlu0 %2975  ;;  %v3076_v0 = vsel %vm1390_vm15, %v2548_v40, %v2786_v36  ;;  %v5262_v36 = vld [vmem:[%s5415_s11 + $0x170] sm:$0xff] }
 0x2ae   : > { %v3124_v39 = vsel %vm3079_vm9, %v3075_v37, %v2976_v38  ;;  %v5263_v37 = vld [vmem:[%s5415_s11 + $0x178] sm:$0xff]  ;;  %v4460_v38 = vld [vmem:[%s6870_s7] ss:$0 sm:$0xff]  ;;  %s426_s11 = sadd.s32 %s4404_s13, %s6931_s24 }
 0x2af   : > { %4935 = vmatprep.mubr.msk.f32.mxu1 %vm3138_vm10, %v3124_v39  ;;  %v4509_v39 = vld [vmem:[%s6872_s9] ss:$0 sm:$0xff]  ;;  %s4405_s26 = sshll.u32 %s426_s11, 3 }
 0x2b0   : > { %v2978_v1 = vpop.permute.xlu1 %2977  ;;  %s6734_s28 = scalar_lea.vmem %s6873_s10, %s4405_s26 }
 0x2b1   : > { %v3125_v43 = vsel %vm3079_vm9, %v3076_v0, %v2978_v1  ;;  %v2788_v41 = vpop.permute.xlu0 %2787  ;;  %v6714_v1 = vadd.f32 %v4509_v39, %v4460_v38 }
 0x2b2   : > { %4936 = vmatmul.mubr.msk.f32.gmra.mrb[44].mxu1 %vm3138_vm10, %v3125_v43  ;;  %v3077_v46 = vsel %vm1390_vm15, %v2549_v44, %v2788_v41 }
 0x2b4   : > { %v2790_v61 = vpop.permute.xlu1 %2789 }
 0x2b5   : > { %v2980_v47 = vpop.permute.xlu0 %2979  ;;  %v3078_v33 = vsel %vm1390_vm15, %v2550_v48, %v2790_v61 }
 0x2b6   : > { %v3126_v45 = vsel %vm3079_vm9, %v3077_v46, %v2980_v47 }
 0x2b7   : > { %4938 = vmatprep.mubr.msk.f32.mxu1 %vm3138_vm10, %v3126_v45 }
 0x2b8   : > { %v2982_v50 = vpop.permute.xlu1 %2981 }
 0x2b9   : > { %v3127_v51 = vsel %vm3079_vm9, %v3078_v33, %v2982_v50 }
 0x2ba   : > { %4939 = vmatmul.mubr.msk.f32.gmra.mrb[46].mxu1 %vm3138_vm10, %v3127_v51 }
 0x2bb   : > { %4943 = vmatprep.mubr.msk.f32.mxu1 %vm751_vm1, %v5216_v52 }
 0x2be   : > { %4944 = vmatmul.mubr.msk.f32.vlgmr.msra.gmra.mrb[0].mxu1 %vm751_vm1, %v5217_v53 }
 0x2bf   : > { %4946 = vmatprep.mubr.msk.f32.mxu1 %vm751_vm1, %v5218_v54 }
 0x2c2   : > { %4947 = vmatmul.mubr.msk.f32.gmra.mrb[2].mxu1 %vm751_vm1, %v5219_v55 }
 0x2c3   : > { %4949 = vmatprep.mubr.msk.f32.mxu1 %vm751_vm1, %v5220_v42 }
 0x2c6   : > { %4950 = vmatmul.mubr.msk.f32.gmra.mrb[4].mxu1 %vm751_vm1, %v5221_v56 }
 0x2c7   : > { %4952 = vmatprep.mubr.msk.f32.mxu1 %vm751_vm1, %v5222_v57 }
 0x2ca   : > { %4953 = vmatmul.mubr.msk.f32.gmra.mrb[6].mxu1 %vm751_vm1, %v5223_v58 }
 0x2cb   : > { %4955 = vmatprep.mubr.msk.f32.mxu1 %vm751_vm1, %v5224_v59 }
 0x2ce   : > { %4956 = vmatmul.mubr.msk.f32.gmra.mrb[8].mxu1 %vm751_vm1, %v5225_v60 }
 0x2cf   : > { %4958 = vmatprep.mubr.msk.f32.mxu1 %vm751_vm1, %v5226_v62 }
 0x2d2   : > { %4959 = vmatmul.mubr.msk.f32.gmra.mrb[10].mxu1 %vm751_vm1, %v5227_v63 }
 0x2d3   : > { %4961 = vmatprep.mubr.msk.f32.mxu1 %vm751_vm1, %v5228_v2 }
 0x2d6   : > { %4962 = vmatmul.mubr.msk.f32.gmra.mrb[12].mxu1 %vm751_vm1, %v5229_v3 }
 0x2d7   : > { %4964 = vmatprep.mubr.msk.f32.mxu1 %vm751_vm1, %v5230_v5 }
 0x2da   : > { %4965 = vmatmul.mubr.msk.f32.gmra.mrb[14].mxu1 %vm751_vm1, %v5231_v4 }
 0x2db   : > { %4967 = vmatprep.mubr.msk.f32.mxu1 %vm751_vm1, %v5232_v6 }
 0x2de   : > { %4968 = vmatmul.mubr.msk.f32.gmra.mrb[16].mxu1 %vm751_vm1, %v5233_v7 }
 0x2df   : > { %4970 = vmatprep.mubr.msk.f32.mxu1 %vm751_vm1, %v5234_v8 }
 0x2e2   : > { %4971 = vmatmul.mubr.msk.f32.gmra.mrb[18].mxu1 %vm751_vm1, %v5235_v49 }
 0x2e3   : > { %4973 = vmatprep.mubr.msk.f32.mxu1 %vm751_vm1, %v5236_v9 }
 0x2e6   : > { %4974 = vmatmul.mubr.msk.f32.gmra.mrb[20].mxu1 %vm751_vm1, %v5237_v10 }
 0x2e7   : > { %4976 = vmatprep.mubr.msk.f32.mxu1 %vm751_vm1, %v5238_v11 }
 0x2ea   : > { %4977 = vmatmul.mubr.msk.f32.gmra.mrb[22].mxu1 %vm751_vm1, %v5239_v12 }
 0x2eb   : > { %4979 = vmatprep.mubr.msk.f32.mxu1 %vm751_vm1, %v5240_v13 }
 0x2ee   : > { %4980 = vmatmul.mubr.msk.f32.gmra.mrb[24].mxu1 %vm751_vm1, %v5241_v14 }
 0x2ef   : > { %4982 = vmatprep.mubr.msk.f32.mxu1 %vm751_vm1, %v5242_v15 }
 0x2f2   : > { %4983 = vmatmul.mubr.msk.f32.gmra.mrb[26].mxu1 %vm751_vm1, %v5243_v16 }
 0x2f3   : > { %4985 = vmatprep.mubr.msk.f32.mxu1 %vm751_vm1, %v5244_v17 }
 0x2f6   : > { %4986 = vmatmul.mubr.msk.f32.gmra.mrb[28].mxu1 %vm751_vm1, %v5245_v18 }
 0x2f7   : > { %4988 = vmatprep.mubr.msk.f32.mxu1 %vm751_vm1, %v5246_v19 }
 0x2fa   : > { %4989 = vmatmul.mubr.msk.f32.gmra.mrb[30].mxu1 %vm751_vm1, %v5247_v20 }
 0x2fb   : > { %4991 = vmatprep.mubr.msk.f32.mxu1 %vm751_vm1, %v5248_v21 }
 0x2fe   : > { %4992 = vmatmul.mubr.msk.f32.gmra.mrb[32].mxu1 %vm751_vm1, %v5249_v22 }
 0x2ff   : > { %4994 = vmatprep.mubr.msk.f32.mxu1 %vm751_vm1, %v5250_v23 }
 0x302   : > { %4995 = vmatmul.mubr.msk.f32.gmra.mrb[34].mxu1 %vm751_vm1, %v5251_v24 }
 0x303   : > { %4997 = vmatprep.mubr.msk.f32.mxu1 %vm751_vm1, %v5252_v25 }
 0x306   : > { %4998 = vmatmul.mubr.msk.f32.gmra.mrb[36].mxu1 %vm751_vm1, %v5253_v26 }
 0x307   : > { %5000 = vmatprep.mubr.msk.f32.mxu1 %vm751_vm1, %v5254_v27 }
 0x30a   : > { %5001 = vmatmul.mubr.msk.f32.gmra.mrb[38].mxu1 %vm751_vm1, %v5255_v28 }
 0x30b   : > { %5003 = vmatprep.mubr.msk.f32.mxu1 %vm751_vm1, %v5256_v29 }
 0x30e   : > { %5004 = vmatmul.mubr.msk.f32.gmra.mrb[40].mxu1 %vm751_vm1, %v5257_v30 }
 0x30f   : > { %5006 = vmatprep.mubr.msk.f32.mxu1 %vm751_vm1, %v5258_v31 }
 0x312   : > { %5007 = vmatmul.mubr.msk.f32.gmra.mrb[42].mxu1 %vm751_vm1, %v5259_v32 }
 0x313   : > { %5009 = vmatprep.mubr.msk.f32.mxu1 %vm751_vm1, %v5260_v34 }
 0x316   : > { %5010 = vmatmul.mubr.msk.f32.gmra.mrb[44].mxu1 %vm751_vm1, %v5261_v35 }
 0x317   : > { %5012 = vmatprep.mubr.msk.f32.mxu1 %vm751_vm1, %v5262_v36 }
 0x31a   : > { %5013 = vmatmul.mubr.msk.f32.gmra.mrb[46].mxu1 %vm751_vm1, %v5263_v37 }
 0x391   : > { %v4945_v40 = vpop.f32.mrb[0].mxu1 }
 0x392   : > { %v5023_v0 = vadd.f32 %v4945_v40, %v4460_v38  ;;  %v3809_v43 = vpop.f32.mrb[1].mxu1 }
 0x393   : > { %v5025_v41 = vadd.f32 %v4460_v38, %v3809_v43 }
 0x394   : > { %v5024_v44 = vadd.f32 %v5023_v0, %v4509_v39 }
 0x395   : > { %v5026_v61 = vadd.f32 %v5025_v41, %v4509_v39  ;;  %v4948_v46 = vpop.f32.mrb[2].mxu1 }
 0x396   : > { %4097 = vst.msk [vmem:[#allocation4 + $0x8] sm:$0xff] %vm1390_vm15, %v5024_v44  ;;  %v5028_v47 = vadd.f32 %v6714_v1, %v4948_v46  ;;  %v3819_v45 = vpop.f32.mrb[3].mxu1 }
 0x397   : > { %4096 = vst.msk [vmem:[#allocation4] sm:$0xff] %vm1390_vm15, %v5026_v61  ;;  %v5030_v48 = vadd.f32 %v6714_v1, %v3819_v45 }
 0x398   : > { %4099 = vst.msk [vmem:[#allocation4 + $0x18] sm:$0xff] %vm1390_vm15, %v5028_v47 }
 0x399   : > { %4098 = vst.msk [vmem:[#allocation4 + $0x10] sm:$0xff] %vm1390_vm15, %v5030_v48  ;;  %v4951_v33 = vpop.f32.mrb[4].mxu1 }
 0x39a   : > { %v5032_v50 = vadd.f32 %v6714_v1, %v4951_v33  ;;  %v3829_v51 = vpop.f32.mrb[5].mxu1 }
 0x39b   : > { %v5034_v52 = vadd.f32 %v6714_v1, %v3829_v51 }
 0x39c   : > { %4101 = vst.msk [vmem:[#allocation4 + $0x28] sm:$0xff] %vm1390_vm15, %v5032_v50 }
 0x39d   : > { %4100 = vst.msk [vmem:[#allocation4 + $0x20] sm:$0xff] %vm1390_vm15, %v5034_v52  ;;  %v4954_v53 = vpop.f32.mrb[6].mxu1 }
 0x39e   : > { %v5036_v54 = vadd.f32 %v6714_v1, %v4954_v53  ;;  %v3839_v55 = vpop.f32.mrb[7].mxu1 }
 0x39f   : > { %v5038_v42 = vadd.f32 %v6714_v1, %v3839_v55 }
 0x3a0   : > { %v4144_v56 = vld [vmem:[#allocation4] ss:$3 sm:$0xff]  ;;  %v4176_v57 = vld [vmem:[#allocation4 + $0x1] ss:$3 sm:$0xff]  ;;  %4103 = vst.msk [vmem:[#allocation4 + $0x38] sm:$0xff] %vm1390_vm15, %v5036_v54 }
 0x3a1   : > { %v4239_v58 = vmax.f32 %v4144_v56, %v4176_v57  ;;  %4102 = vst.msk [vmem:[#allocation4 + $0x30] sm:$0xff] %vm1390_vm15, %v5038_v42  ;;  %v4957_v59 = vpop.f32.mrb[8].mxu1  ;;  %v4208_v60 = vld [vmem:[#allocation4 + $0x2] ss:$3 sm:$0xff] }
 0x3a2   : > { %v5040_v62 = vadd.f32 %v6714_v1, %v4957_v59  ;;  %v3849_v63 = vpop.f32.mrb[9].mxu1 }
 0x3a3   : > { %v4255_v2 = vmax.f32 %v4239_v58, %v4208_v60  ;;  %v5042_v3 = vadd.f32 %v6714_v1, %v3849_v63 }
 0x3a4   : > { %v4146_v5 = vld [vmem:[#allocation4 + $0x18] ss:$3 sm:$0xff]  ;;  %v4178_v4 = vld [vmem:[#allocation4 + $0x19] ss:$3 sm:$0xff]  ;;  %4105 = vst.msk [vmem:[#allocation4 + $0x48] sm:$0xff] %vm1390_vm15, %v5040_v62 }
 0x3a5   : > { %4271 = vst.msk [vmem:[%s6734_s28] sm:$0xff] %vm1390_vm15, %v4255_v2  ;;  %v4240_v6 = vmax.f32 %v4146_v5, %v4178_v4  ;;  %4104 = vst.msk [vmem:[#allocation4 + $0x40] sm:$0xff] %vm1390_vm15, %v5042_v3  ;;  %v4960_v7 = vpop.f32.mrb[10].mxu1  ;;  %v4210_v8 = vld [vmem:[#allocation4 + $0x1a] ss:$3 sm:$0xff] }
 0x3a6   : > { %v5044_v49 = vadd.f32 %v6714_v1, %v4960_v7  ;;  %v3859_v9 = vpop.f32.mrb[11].mxu1 }
 0x3a7   : > { %v4256_v10 = vmax.f32 %v4240_v6, %v4210_v8  ;;  %v5046_v11 = vadd.f32 %v6714_v1, %v3859_v9 }
 0x3a8   : > { %4107 = vst.msk [vmem:[#allocation4 + $0x58] sm:$0xff] %vm1390_vm15, %v5044_v49 }
 0x3a9   : > { %4272 = vst.msk [vmem:[%s6734_s28 + $0x8] sm:$0xff] %vm1390_vm15, %v4256_v10  ;;  %4106 = vst.msk [vmem:[#allocation4 + $0x50] sm:$0xff] %vm1390_vm15, %v5046_v11  ;;  %v4963_v12 = vpop.f32.mrb[12].mxu1 }
 0x3aa   : > { %v5048_v13 = vadd.f32 %v6714_v1, %v4963_v12  ;;  %v3869_v14 = vpop.f32.mrb[13].mxu1 }
 0x3ab   : > { %v5050_v15 = vadd.f32 %v6714_v1, %v3869_v14 }
 0x3ac   : > { %v4148_v16 = vld [vmem:[#allocation4 + $0x30] ss:$3 sm:$0xff]  ;;  %v4180_v17 = vld [vmem:[#allocation4 + $0x31] ss:$3 sm:$0xff]  ;;  %4109 = vst.msk [vmem:[#allocation4 + $0x68] sm:$0xff] %vm1390_vm15, %v5048_v13 }
 0x3ad   : > { %v4241_v18 = vmax.f32 %v4148_v16, %v4180_v17  ;;  %4108 = vst.msk [vmem:[#allocation4 + $0x60] sm:$0xff] %vm1390_vm15, %v5050_v15  ;;  %v4966_v19 = vpop.f32.mrb[14].mxu1  ;;  %v4212_v20 = vld [vmem:[#allocation4 + $0x32] ss:$3 sm:$0xff] }
 0x3ae   : > { %v5052_v21 = vadd.f32 %v6714_v1, %v4966_v19  ;;  %v3879_v22 = vpop.f32.mrb[15].mxu1 }
 0x3af   : > { %v4257_v23 = vmax.f32 %v4241_v18, %v4212_v20  ;;  %v5054_v24 = vadd.f32 %v6714_v1, %v3879_v22 }
 0x3b0   : > { %v4150_v25 = vld [vmem:[#allocation4 + $0x48] ss:$3 sm:$0xff]  ;;  %v4182_v26 = vld [vmem:[#allocation4 + $0x49] ss:$3 sm:$0xff]  ;;  %4111 = vst.msk [vmem:[#allocation4 + $0x78] sm:$0xff] %vm1390_vm15, %v5052_v21 }
 0x3b1   : > { %4273 = vst.msk [vmem:[%s6734_s28 + $0x10] sm:$0xff] %vm1390_vm15, %v4257_v23  ;;  %v4242_v27 = vmax.f32 %v4150_v25, %v4182_v26  ;;  %4110 = vst.msk [vmem:[#allocation4 + $0x70] sm:$0xff] %vm1390_vm15, %v5054_v24  ;;  %v4969_v28 = vpop.f32.mrb[16].mxu1  ;;  %v4214_v29 = vld [vmem:[#allocation4 + $0x4a] ss:$3 sm:$0xff] }
 0x3b2   : > { %v5056_v30 = vadd.f32 %v6714_v1, %v4969_v28  ;;  %v3889_v31 = vpop.f32.mrb[17].mxu1 }
 0x3b3   : > { %v4258_v32 = vmax.f32 %v4242_v27, %v4214_v29  ;;  %v5058_v34 = vadd.f32 %v6714_v1, %v3889_v31 }
 0x3b4   : > { %4113 = vst.msk [vmem:[#allocation4 + $0x88] sm:$0xff] %vm1390_vm15, %v5056_v30 }
 0x3b5   : > { %4274 = vst.msk [vmem:[%s6734_s28 + $0x18] sm:$0xff] %vm1390_vm15, %v4258_v32  ;;  %4112 = vst.msk [vmem:[#allocation4 + $0x80] sm:$0xff] %vm1390_vm15, %v5058_v34  ;;  %v4972_v35 = vpop.f32.mrb[18].mxu1 }
 0x3b6   : > { %v5060_v36 = vadd.f32 %v6714_v1, %v4972_v35  ;;  %v3899_v37 = vpop.f32.mrb[19].mxu1 }
 0x3b7   : > { %v5062_v38 = vadd.f32 %v6714_v1, %v3899_v37 }
 0x3b8   : > { %v4152_v39 = vld [vmem:[#allocation4 + $0x60] ss:$3 sm:$0xff]  ;;  %v4184_v40 = vld [vmem:[#allocation4 + $0x61] ss:$3 sm:$0xff]  ;;  %4115 = vst.msk [vmem:[#allocation4 + $0x98] sm:$0xff] %vm1390_vm15, %v5060_v36 }
 0x3b9   : > { %v4243_v0 = vmax.f32 %v4152_v39, %v4184_v40  ;;  %4114 = vst.msk [vmem:[#allocation4 + $0x90] sm:$0xff] %vm1390_vm15, %v5062_v38  ;;  %v4975_v43 = vpop.f32.mrb[20].mxu1  ;;  %v4216_v41 = vld [vmem:[#allocation4 + $0x62] ss:$3 sm:$0xff] }
 0x3ba   : > { %v5064_v44 = vadd.f32 %v6714_v1, %v4975_v43  ;;  %v3909_v61 = vpop.f32.mrb[21].mxu1 }
 0x3bb   : > { %v4259_v46 = vmax.f32 %v4243_v0, %v4216_v41  ;;  %v5066_v47 = vadd.f32 %v6714_v1, %v3909_v61 }
 0x3bc   : > { %v4154_v45 = vld [vmem:[#allocation4 + $0x78] ss:$3 sm:$0xff]  ;;  %v4186_v48 = vld [vmem:[#allocation4 + $0x79] ss:$3 sm:$0xff]  ;;  %4117 = vst.msk [vmem:[#allocation4 + $0xa8] sm:$0xff] %vm1390_vm15, %v5064_v44 }
 0x3bd   : > { %4275 = vst.msk [vmem:[%s6734_s28 + $0x20] sm:$0xff] %vm1390_vm15, %v4259_v46  ;;  %v4244_v33 = vmax.f32 %v4154_v45, %v4186_v48  ;;  %4116 = vst.msk [vmem:[#allocation4 + $0xa0] sm:$0xff] %vm1390_vm15, %v5066_v47  ;;  %v4978_v50 = vpop.f32.mrb[22].mxu1  ;;  %v4218_v51 = vld [vmem:[#allocation4 + $0x7a] ss:$3 sm:$0xff] }
 0x3be   : > { %v5068_v52 = vadd.f32 %v6714_v1, %v4978_v50  ;;  %v3919_v53 = vpop.f32.mrb[23].mxu1 }
 0x3bf   : > { %v4260_v54 = vmax.f32 %v4244_v33, %v4218_v51  ;;  %v5070_v55 = vadd.f32 %v6714_v1, %v3919_v53 }
 0x3c0   : > { %4119 = vst.msk [vmem:[#allocation4 + $0xb8] sm:$0xff] %vm1390_vm15, %v5068_v52 }
 0x3c1   : > { %4276 = vst.msk [vmem:[%s6734_s28 + $0x28] sm:$0xff] %vm1390_vm15, %v4260_v54  ;;  %4118 = vst.msk [vmem:[#allocation4 + $0xb0] sm:$0xff] %vm1390_vm15, %v5070_v55  ;;  %v4981_v42 = vpop.f32.mrb[24].mxu1 }
 0x3c2   : > { %v5072_v56 = vadd.f32 %v6714_v1, %v4981_v42  ;;  %v3929_v57 = vpop.f32.mrb[25].mxu1 }
 0x3c3   : > { %v5074_v58 = vadd.f32 %v6714_v1, %v3929_v57 }
 0x3c4   : > { %v4156_v59 = vld [vmem:[#allocation4 + $0x90] ss:$3 sm:$0xff]  ;;  %v4188_v60 = vld [vmem:[#allocation4 + $0x91] ss:$3 sm:$0xff]  ;;  %4121 = vst.msk [vmem:[#allocation4 + $0xc8] sm:$0xff] %vm1390_vm15, %v5072_v56 }
 0x3c5   : > { %v4245_v62 = vmax.f32 %v4156_v59, %v4188_v60  ;;  %4120 = vst.msk [vmem:[#allocation4 + $0xc0] sm:$0xff] %vm1390_vm15, %v5074_v58  ;;  %v4984_v63 = vpop.f32.mrb[26].mxu1  ;;  %v4220_v2 = vld [vmem:[#allocation4 + $0x92] ss:$3 sm:$0xff] }
 0x3c6   : > { %v5076_v3 = vadd.f32 %v6714_v1, %v4984_v63  ;;  %v3939_v5 = vpop.f32.mrb[27].mxu1 }
 0x3c7   : > { %v4261_v4 = vmax.f32 %v4245_v62, %v4220_v2  ;;  %v5078_v6 = vadd.f32 %v6714_v1, %v3939_v5 }
 0x3c8   : > { %v4158_v7 = vld [vmem:[#allocation4 + $0xa8] ss:$3 sm:$0xff]  ;;  %v4190_v8 = vld [vmem:[#allocation4 + $0xa9] ss:$3 sm:$0xff]  ;;  %4123 = vst.msk [vmem:[#allocation4 + $0xd8] sm:$0xff] %vm1390_vm15, %v5076_v3 }
 0x3c9   : > { %4277 = vst.msk [vmem:[%s6734_s28 + $0x30] sm:$0xff] %vm1390_vm15, %v4261_v4  ;;  %v4246_v49 = vmax.f32 %v4158_v7, %v4190_v8  ;;  %4122 = vst.msk [vmem:[#allocation4 + $0xd0] sm:$0xff] %vm1390_vm15, %v5078_v6  ;;  %v4987_v9 = vpop.f32.mrb[28].mxu1  ;;  %v4222_v10 = vld [vmem:[#allocation4 + $0xaa] ss:$3 sm:$0xff] }
 0x3ca   : > { %v5080_v11 = vadd.f32 %v6714_v1, %v4987_v9  ;;  %v3949_v12 = vpop.f32.mrb[29].mxu1 }
 0x3cb   : > { %v4262_v13 = vmax.f32 %v4246_v49, %v4222_v10  ;;  %v5082_v14 = vadd.f32 %v6714_v1, %v3949_v12 }
 0x3cc   : > { %4125 = vst.msk [vmem:[#allocation4 + $0xe8] sm:$0xff] %vm1390_vm15, %v5080_v11 }
 0x3cd   : > { %4278 = vst.msk [vmem:[%s6734_s28 + $0x38] sm:$0xff] %vm1390_vm15, %v4262_v13  ;;  %4124 = vst.msk [vmem:[#allocation4 + $0xe0] sm:$0xff] %vm1390_vm15, %v5082_v14  ;;  %v4990_v15 = vpop.f32.mrb[30].mxu1 }
 0x3ce   : > { %v5084_v16 = vadd.f32 %v6714_v1, %v4990_v15  ;;  %v3959_v17 = vpop.f32.mrb[31].mxu1 }
 0x3cf   : > { %v5086_v18 = vadd.f32 %v6714_v1, %v3959_v17 }
 0x3d0   : > { %v4160_v19 = vld [vmem:[#allocation4 + $0xc0] ss:$3 sm:$0xff]  ;;  %v4192_v20 = vld [vmem:[#allocation4 + $0xc1] ss:$3 sm:$0xff]  ;;  %4127 = vst.msk [vmem:[#allocation4 + $0xf8] sm:$0xff] %vm1390_vm15, %v5084_v16 }
 0x3d1   : > { %v4247_v21 = vmax.f32 %v4160_v19, %v4192_v20  ;;  %4126 = vst.msk [vmem:[#allocation4 + $0xf0] sm:$0xff] %vm1390_vm15, %v5086_v18  ;;  %v4993_v22 = vpop.f32.mrb[32].mxu1  ;;  %v4224_v23 = vld [vmem:[#allocation4 + $0xc2] ss:$3 sm:$0xff] }
 0x3d2   : > { %v5088_v24 = vadd.f32 %v6714_v1, %v4993_v22  ;;  %v3969_v25 = vpop.f32.mrb[33].mxu1 }
 0x3d3   : > { %v4263_v26 = vmax.f32 %v4247_v21, %v4224_v23  ;;  %v5090_v27 = vadd.f32 %v6714_v1, %v3969_v25 }
 0x3d4   : > { %v4162_v28 = vld [vmem:[#allocation4 + $0xd8] ss:$3 sm:$0xff]  ;;  %v4194_v29 = vld [vmem:[#allocation4 + $0xd9] ss:$3 sm:$0xff]  ;;  %4129 = vst.msk [vmem:[#allocation4 + $0x108] sm:$0xff] %vm1390_vm15, %v5088_v24 }
 0x3d5   : > { %4279 = vst.msk [vmem:[%s6734_s28 + $0x40] sm:$0xff] %vm1390_vm15, %v4263_v26  ;;  %v4248_v30 = vmax.f32 %v4162_v28, %v4194_v29  ;;  %4128 = vst.msk [vmem:[#allocation4 + $0x100] sm:$0xff] %vm1390_vm15, %v5090_v27  ;;  %v4996_v31 = vpop.f32.mrb[34].mxu1  ;;  %v4226_v32 = vld [vmem:[#allocation4 + $0xda] ss:$3 sm:$0xff] }
 0x3d6   : > { %v5092_v34 = vadd.f32 %v6714_v1, %v4996_v31  ;;  %v3979_v35 = vpop.f32.mrb[35].mxu1 }
 0x3d7   : > { %v4264_v36 = vmax.f32 %v4248_v30, %v4226_v32  ;;  %v5094_v37 = vadd.f32 %v6714_v1, %v3979_v35 }
 0x3d8   : > { %4131 = vst.msk [vmem:[#allocation4 + $0x118] sm:$0xff] %vm1390_vm15, %v5092_v34 }
 0x3d9   : > { %4280 = vst.msk [vmem:[%s6734_s28 + $0x48] sm:$0xff] %vm1390_vm15, %v4264_v36  ;;  %4130 = vst.msk [vmem:[#allocation4 + $0x110] sm:$0xff] %vm1390_vm15, %v5094_v37  ;;  %v4999_v38 = vpop.f32.mrb[36].mxu1 }
 0x3da   : > { %v5096_v39 = vadd.f32 %v6714_v1, %v4999_v38  ;;  %v3989_v40 = vpop.f32.mrb[37].mxu1 }
 0x3db   : > { %v5098_v0 = vadd.f32 %v6714_v1, %v3989_v40 }
 0x3dc   : > { %v4164_v43 = vld [vmem:[#allocation4 + $0xf0] ss:$3 sm:$0xff]  ;;  %v4196_v41 = vld [vmem:[#allocation4 + $0xf1] ss:$3 sm:$0xff]  ;;  %4133 = vst.msk [vmem:[#allocation4 + $0x128] sm:$0xff] %vm1390_vm15, %v5096_v39 }
 0x3dd   : > { %v4249_v44 = vmax.f32 %v4164_v43, %v4196_v41  ;;  %4132 = vst.msk [vmem:[#allocation4 + $0x120] sm:$0xff] %vm1390_vm15, %v5098_v0  ;;  %v5002_v61 = vpop.f32.mrb[38].mxu1  ;;  %v4228_v46 = vld [vmem:[#allocation4 + $0xf2] ss:$3 sm:$0xff] }
 0x3de   : > { %v5100_v47 = vadd.f32 %v6714_v1, %v5002_v61  ;;  %v3999_v45 = vpop.f32.mrb[39].mxu1 }
 0x3df   : > { %v4265_v48 = vmax.f32 %v4249_v44, %v4228_v46  ;;  %v5102_v33 = vadd.f32 %v6714_v1, %v3999_v45 }
 0x3e0   : > { %v4166_v50 = vld [vmem:[#allocation4 + $0x108] ss:$3 sm:$0xff]  ;;  %v4198_v51 = vld [vmem:[#allocation4 + $0x109] ss:$3 sm:$0xff]  ;;  %4135 = vst.msk [vmem:[#allocation4 + $0x138] sm:$0xff] %vm1390_vm15, %v5100_v47 }
 0x3e1   : > { %4281 = vst.msk [vmem:[%s6734_s28 + $0x50] sm:$0xff] %vm1390_vm15, %v4265_v48  ;;  %v4250_v52 = vmax.f32 %v4166_v50, %v4198_v51  ;;  %4134 = vst.msk [vmem:[#allocation4 + $0x130] sm:$0xff] %vm1390_vm15, %v5102_v33  ;;  %v5005_v53 = vpop.f32.mrb[40].mxu1  ;;  %v4230_v54 = vld [vmem:[#allocation4 + $0x10a] ss:$3 sm:$0xff] }
 0x3e2   : > { %v5104_v55 = vadd.f32 %v6714_v1, %v5005_v53  ;;  %v4009_v42 = vpop.f32.mrb[41].mxu1 }
 0x3e3   : > { %v4266_v56 = vmax.f32 %v4250_v52, %v4230_v54  ;;  %v5106_v57 = vadd.f32 %v6714_v1, %v4009_v42 }
 0x3e4   : > { %4137 = vst.msk [vmem:[#allocation4 + $0x148] sm:$0xff] %vm1390_vm15, %v5104_v55 }
 0x3e5   : > { %4282 = vst.msk [vmem:[%s6734_s28 + $0x58] sm:$0xff] %vm1390_vm15, %v4266_v56  ;;  %4136 = vst.msk [vmem:[#allocation4 + $0x140] sm:$0xff] %vm1390_vm15, %v5106_v57  ;;  %v5008_v58 = vpop.f32.mrb[42].mxu1 }
 0x3e6   : > { %v5108_v59 = vadd.f32 %v6714_v1, %v5008_v58  ;;  %v4019_v60 = vpop.f32.mrb[43].mxu1 }
 0x3e7   : > { %v5110_v62 = vadd.f32 %v6714_v1, %v4019_v60 }
 0x3e8   : > { %v4168_v63 = vld [vmem:[#allocation4 + $0x120] ss:$3 sm:$0xff]  ;;  %v4200_v2 = vld [vmem:[#allocation4 + $0x121] ss:$3 sm:$0xff]  ;;  %4139 = vst.msk [vmem:[#allocation4 + $0x158] sm:$0xff] %vm1390_vm15, %v5108_v59 }
 0x3e9   : > { %v4251_v3 = vmax.f32 %v4168_v63, %v4200_v2  ;;  %4138 = vst.msk [vmem:[#allocation4 + $0x150] sm:$0xff] %vm1390_vm15, %v5110_v62  ;;  %v5011_v5 = vpop.f32.mrb[44].mxu1  ;;  %v4232_v4 = vld [vmem:[#allocation4 + $0x122] ss:$3 sm:$0xff] }
 0x3ea   : > { %v5112_v6 = vadd.f32 %v6714_v1, %v5011_v5  ;;  %v4029_v7 = vpop.f32.mrb[45].mxu1 }
 0x3eb   : > { %v4267_v8 = vmax.f32 %v4251_v3, %v4232_v4  ;;  %v5114_v49 = vadd.f32 %v6714_v1, %v4029_v7 }
 0x3ec   : > { %v4170_v9 = vld [vmem:[#allocation4 + $0x138] ss:$3 sm:$0xff]  ;;  %v4202_v10 = vld [vmem:[#allocation4 + $0x139] ss:$3 sm:$0xff]  ;;  %4141 = vst.msk [vmem:[#allocation4 + $0x168] sm:$0xff] %vm1390_vm15, %v5112_v6 }
 0x3ed   : > { %4283 = vst.msk [vmem:[%s6734_s28 + $0x60] sm:$0xff] %vm1390_vm15, %v4267_v8  ;;  %v4252_v11 = vmax.f32 %v4170_v9, %v4202_v10  ;;  %4140 = vst.msk [vmem:[#allocation4 + $0x160] sm:$0xff] %vm1390_vm15, %v5114_v49  ;;  %v5014_v12 = vpop.f32.mrb[46].mxu1  ;;  %v4234_v13 = vld [vmem:[#allocation4 + $0x13a] ss:$3 sm:$0xff] }
 0x3ee   : > { %v5116_v14 = vadd.f32 %v6714_v1, %v5014_v12  ;;  %v4039_v15 = vpop.f32.mrb[47].mxu1 }
 0x3ef   : > { %v4268_v16 = vmax.f32 %v4252_v11, %v4234_v13  ;;  %v5118_v17 = vadd.f32 %v6714_v1, %v4039_v15 }
 0x3f0   : > { %4143 = vst.msk [vmem:[#allocation4 + $0x178] sm:$0xff] %vm1390_vm15, %v5116_v14 }
 0x3f1   : > { %4284 = vst.msk [vmem:[%s6734_s28 + $0x68] sm:$0xff] %vm1390_vm15, %v4268_v16  ;;  %4142 = vst.msk [vmem:[#allocation4 + $0x170] sm:$0xff] %vm1390_vm15, %v5118_v17 }
 0x3f4   : > { %v4172_v18 = vld [vmem:[#allocation4 + $0x150] ss:$3 sm:$0xff]  ;;  %v4204_v19 = vld [vmem:[#allocation4 + $0x151] ss:$3 sm:$0xff]  ;;  %v4236_v21 = vld [vmem:[#allocation4 + $0x152] ss:$3 sm:$0xff] }
 0x3f5   : > { %v4253_v20 = vmax.f32 %v4172_v18, %v4204_v19 }
 0x3f7   : > { %v4269_v22 = vmax.f32 %v4253_v20, %v4236_v21 }
 0x3f8   : > { %v4174_v23 = vld [vmem:[#allocation4 + $0x168] ss:$3 sm:$0xff]  ;;  %v4206_v24 = vld [vmem:[#allocation4 + $0x169] ss:$3 sm:$0xff]  ;;  %v4238_v26 = vld [vmem:[#allocation4 + $0x16a] ss:$3 sm:$0xff] }
 0x3f9   : > { %4285 = vst.msk [vmem:[%s6734_s28 + $0x70] sm:$0xff] %vm1390_vm15, %v4269_v22  ;;  %v4254_v25 = vmax.f32 %v4174_v23, %v4206_v24 }
 0x3fb   : > { %v4270_v27 = vmax.f32 %v4254_v25, %v4238_v26 }
 0x3fd   : > { %4286 = vst.msk [vmem:[%s6734_s28 + $0x78] sm:$0xff] %vm1390_vm15, %v4270_v27 }
 0x3fe PF: > { %s20_s17 = sadd.s32 1, %s5302_s17   ;;  %s6915_s29 = sld [smem:[#allocation5_spill]] }
 0x3ff   : > { %p17_p10 = scmp.ge.s32.totalorder %s20_s17, 6   ;;  %s6916_s13 = smov %s5294_s15 }
 0x400   : > { %s6917_s14 = smov %s5298_s16  ;;  %s6918_s15 = smov %s6921_s18 }
 0x401   :  { %19 = sbr.rel (!%p17_p10) target bundleno = 3 (0x3), region = 140 }
 0x404   : > { %s6919_s16 = smov %s6915_s29 }

</bundles_post_ra>
